<compile_context>
chip_gen: v6e
topology: v6e:2x2x1
jax: 0.10.0
libtpu: 0.0.40
codegen_flags: <defaults>
</compile_context>

<pallas_src>
import numpy as np
import jax
import jax.numpy as jnp
from jax.experimental import pallas as pl
from jax.experimental.pallas import tpu as pltpu

_LANE = 128  # vreg lane width: per-gate blocks are padded to this


def _r8(n):
    return ((n + 7) // 8) * 8


def sim_module_forward(x, y, params, logit_scale_exp, eps, batch_block=None):
    """Pallas implementation of SimModule.forward(x, y).

    params holds LSTM gate weights stacked per-gate (4, in, H) in PyTorch order
    (i, f, g, o), biases (4, 1, H) = b_ih + b_hh pre-summed, and linear weights
    stored as (in_features, out_features).
    """
    B, T, Dx = x.shape
    By, Ty, Dy = y.shape
    assert By == B
    bblk = B if batch_block is None else int(batch_block)
    assert B % bblk == 0, "batch_block must divide the batch"
    nb = B // bblk

    f32 = jnp.float32
    H = params["whh0"].shape[-1]          # out_seq_len + 1 (includes blank)
    O = H - 1                             # out_seq_len
    S = params["wpx"].shape[1]            # shared_dim
    O2 = params["wf1"].shape[1]           # fc1 output size
    Hp = _LANE                            # lane-aligned per-gate width
    Gp = 4 * Hp

    # ---------------- wrapper-side packing (pure layout plumbing) ------------

    def pack_w(w, rows):
        """(4, din, H) gate-stacked -> (rows, 4*Hp), each gate 128-lane aligned."""
        din, h = w.shape[1], w.shape[2]
        wp = jnp.zeros((rows, Gp), f32)
        for g in range(4):
            wp = wp.at[:din, g * Hp:g * Hp + h].set(w[g].astype(f32))
        return wp

    def pack_b(b):
        """(4, 1, H) -> (1, 4*Hp)."""
        h = b.shape[-1]
        bp = jnp.zeros((1, Gp), f32)
        for g in range(4):
            bp = bp.at[:, g * Hp:g * Hp + h].set(b[g].astype(f32))
        return bp

    # Blank class -> LAST position of layer 1 (permute gate columns of
    # wih1/whh1/b1 and the matching rows of whh1), so the downstream drop of
    # the blank row becomes a free prefix slice.
    perm = np.concatenate([np.arange(1, H), np.array([0])]).astype(np.int32)
    wih1 = jnp.take(params["wih1"], perm, axis=-1)
    whh1 = jnp.take(jnp.take(params["whh1"], perm, axis=1), perm, axis=-1)
    b1 = jnp.take(params["b1"], perm, axis=-1)

    # Packed operand 0: layer-0 LSTM  [wih0 | whh0 | b0] stacked on rows.
    pack0 = jnp.concatenate([
        pack_w(params["wih0"], Dx),          # rows [0, Dx)
        pack_w(params["whh0"], Hp),          # rows [Dx, Dx+Hp)
        pack_b(params["b0"]),                # row  Dx+Hp
    ], axis=0)
    # Packed operand 1: layer-1 LSTM  [wih1 | whh1 | b1].
    pack1 = jnp.concatenate([
        pack_w(wih1, Hp),                    # rows [0, Hp)
        pack_w(whh1, Hp),                    # rows [Hp, 2*Hp)
        pack_b(b1),                          # row  2*Hp
    ], axis=0)

    def pad_rows(a, rows):
        a = a.astype(f32)
        if a.shape[0] < rows:
            a = jnp.concatenate(
                [a, jnp.zeros((rows - a.shape[0], a.shape[1]), f32)], axis=0)
        return a

    def pad_cols(a, cols):
        a = a.astype(f32)
        if a.shape[1] < cols:
            a = jnp.concatenate(
                [a, jnp.zeros((a.shape[0], cols - a.shape[1]), f32)], axis=1)
        return a

    # Packed operand 2: proj_x / proj_y (common width S), 8-row-aligned.
    o_wpx, o_bpx = 0, _r8(Dx)
    o_wpy, o_bpy = o_bpx + 8, o_bpx + 8 + _r8(Dy)
    packp = jnp.concatenate([
        pad_rows(params["wpx"], _r8(Dx)), pad_rows(params["bpx"], 8),
        pad_rows(params["wpy"], _r8(Dy)), pad_rows(params["bpy"], 8),
    ], axis=0)

    # Packed operand 3: fc1 / fc2, zero-padded to a common column width.
    Wc = max(O, O2)
    o_wf1, o_bf1 = 0, _r8(O)
    o_wf2, o_bf2 = o_bf1 + 8, o_bf1 + 8 + _r8(O2)
    packf = jnp.concatenate([
        pad_rows(pad_cols(params["wf1"], Wc), _r8(O)),
        pad_rows(pad_cols(params["bf1"], Wc), 8),
        pad_rows(pad_cols(params["wf2"], Wc), _r8(O2)),
        pad_rows(pad_cols(params["bf2"], Wc), 8),
    ], axis=0)

    scale = float(logit_scale_exp)   # exp(logit_scale); inference-time const
    eps_c = float(eps)

    def kernel(x_ref, y_ref, p0_ref, p1_ref, pp_ref, pf_ref, out_ref,
               h0s_ref, h1s_ref):
        xb = x_ref[...].astype(f32)              # (bblk, T, Dx)
        yb = y_ref[...].astype(f32)              # (bblk, Ty, Dy)

        def lin2d(x3, w, b):
            """(b, n, d) @ (d, s) + (1, s) as one flattened 2D matmul."""
            bb, n, d = x3.shape
            out = jnp.dot(x3.reshape(bb * n, d), w,
                          preferred_element_type=f32) + b
            return out.reshape(bb, n, w.shape[1])

        def cell(gates, c):
            # Gates at lane-aligned offsets 0/Hp/2Hp/3Hp (PyTorch i,f,g,o):
            # whole-vreg slices; sigmoid only on i/f/o, tanh only on g.
            i = jax.nn.sigmoid(gates[:, 0:Hp])
            f = jax.nn.sigmoid(gates[:, Hp:2 * Hp])
            g = jnp.tanh(gates[:, 2 * Hp:3 * Hp])
            o = jax.nn.sigmoid(gates[:, 3 * Hp:4 * Hp])
            c_new = f * c + i * g
            return o * jnp.tanh(c_new), c_new

        # -------- layer-0 pass (serial); input projection hoisted ------------
        wih0 = p0_ref[0:Dx, :]
        whh0 = p0_ref[Dx:Dx + Hp, :]
        b0 = p0_ref[Dx + Hp:Dx + Hp + 1, :]
        xproj0 = lin2d(xb, wih0, b0)             # (bblk, T, Gp)

        h0 = jnp.zeros((bblk, Hp), f32)
        c0 = jnp.zeros((bblk, Hp), f32)
        for t in range(T):                       # T small & static
            g0 = xproj0[:, t, :] + jnp.dot(h0, whh0,
                                           preferred_element_type=f32)
            h0, c0 = cell(g0, c0)
            h0s_ref[:, t, :] = h0                # direct row store

        # -------- layer-1 input projection: one batched matmul ---------------
        wih1_ = p1_ref[0:Hp, :]
        whh1_ = p1_ref[Hp:2 * Hp, :]
        b1_ = p1_ref[2 * Hp:2 * Hp + 1, :]
        xproj1 = lin2d(h0s_ref[...], wih1_, b1_)  # (bblk, T, Gp)

        # -------- layer-1 pass (serial) ---------------------------------------
        h1 = jnp.zeros((bblk, Hp), f32)
        c1 = jnp.zeros((bblk, Hp), f32)
        for t in range(T):
            g1 = xproj1[:, t, :] + jnp.dot(h1, whh1_,
                                           preferred_element_type=f32)
            h1, c1 = cell(g1, c1)
            h1s_ref[:, t, :] = h1[:, :H]         # only the H real classes

        # -------- CTC head: softmax over classes + pseudo-alignment ----------
        lstm_out = h1s_ref[...]                  # (bblk, T, H)
        m = jnp.max(lstm_out, axis=-1, keepdims=True)
        e = jnp.exp(lstm_out - m)
        prob = e / jnp.sum(e, axis=-1, keepdims=True)
        pseudo_full = jnp.einsum("bth,btd->bhd", prob, xb,
                                 preferred_element_type=f32)  # (bblk, H, Dx)
        pseudo = pseudo_full[:, :O, :]           # blank is LAST -> prefix slice

        # -------- shared-space projections + eps-clamped L2 normalization ----
        wpx = pp_ref[o_wpx:o_wpx + Dx, :]
        bpx = pp_ref[o_bpx:o_bpx + 1, :]
        wpy = pp_ref[o_wpy:o_wpy + Dy, :]
        bpy = pp_ref[o_bpy:o_bpy + 1, :]

        x_common = lin2d(pseudo, wpx, bpx)       # (bblk, O, S)
        x_n = jnp.sqrt(jnp.sum(x_common * x_common, axis=-1, keepdims=True))
        x_norm = x_common / jnp.maximum(x_n, eps_c)

        y_common = lin2d(yb, wpy, bpy)           # (bblk, Ty, S)
        y_n = jnp.sqrt(jnp.sum(y_common * y_common, axis=-1, keepdims=True))
        y_norm = y_common / jnp.maximum(y_n, eps_c)

        # -------- scaled cosine sim + softmax + fc1/relu/fc2/sigmoid ----------
        sim = scale * jnp.einsum("bts,bos->bto", y_norm, x_norm,
                                 preferred_element_type=f32)  # (bblk, Ty, O)
        sm = jnp.max(sim, axis=-1, keepdims=True)
        se = jnp.exp(sim - sm)
        logits = se / jnp.sum(se, axis=-1, keepdims=True)

        wf1 = pf_ref[o_wf1:o_wf1 + O, 0:O2]
        bf1 = pf_ref[o_bf1:o_bf1 + 1, 0:O2]
        wf2 = pf_ref[o_wf2:o_wf2 + O2, 0:O]
        bf2 = pf_ref[o_bf2:o_bf2 + 1, 0:O]
        hfc = jnp.maximum(lin2d(logits, wf1, bf1), 0.0)
        gate = jax.nn.sigmoid(lin2d(hfc, wf2, bf2))

        # -------- re-weight the pseudo-aligned features -----------------------
        aligned = jnp.einsum("bto,bod->btd", gate, pseudo,
                             preferred_element_type=f32)      # (bblk, Ty, Dx)
        out_ref[...] = aligned.astype(out_ref.dtype)

    in_specs = [
        pl.BlockSpec((bblk, T, Dx), lambda b: (b, 0, 0)),
        pl.BlockSpec((bblk, Ty, Dy), lambda b: (b, 0, 0)),
        pl.BlockSpec(pack0.shape, lambda b: (0, 0)),
        pl.BlockSpec(pack1.shape, lambda b: (0, 0)),
        pl.BlockSpec(packp.shape, lambda b: (0, 0)),
        pl.BlockSpec(packf.shape, lambda b: (0, 0)),
    ]

    flops = 2 * B * (T * Dx * Gp + 3 * T * Hp * Gp + T * H * Dx
                     + O * Dx * S + Ty * Dy * S + Ty * O * S
                     + 2 * Ty * O * O2 + Ty * O * Dx)
    transcendentals = B * (2 * T * 5 * Hp + T * H + 2 * Ty * O + O + Ty)
    bytes_accessed = 4 * (int(x.size) + int(y.size) + int(pack0.size)
                          + int(pack1.size) + int(packp.size)
                          + int(packf.size) + B * Ty * Dx)

    return pl.pallas_call(
        kernel,
        out_shape=jax.ShapeDtypeStruct((B, Ty, Dx), jnp.float32),
        grid=(nb,),
        in_specs=in_specs,
        out_specs=pl.BlockSpec((bblk, Ty, Dx), lambda b: (b, 0, 0)),
        scratch_shapes=[pltpu.VMEM((bblk, T, Hp), jnp.float32),
                        pltpu.VMEM((bblk, T, H), jnp.float32)],
        compiler_params=pltpu.CompilerParams(dimension_semantics=("parallel",)),
        cost_estimate=pl.CostEstimate(flops=flops,
                                      transcendentals=transcendentals,
                                      bytes_accessed=bytes_accessed),
    )(x, y, pack0, pack1, packp, packf)


def reference_forward(x, y, params, logit_scale_exp, eps):
    """Pure-JAX (XLA) reference mirroring the PyTorch module, for validation."""
    with jax.default_matmul_precision("highest"):
        wih0, whh0, b0 = params["wih0"], params["whh0"], params["b0"]
        wih1, whh1, b1 = params["wih1"], params["whh1"], params["b1"]
        B, T, _ = x.shape
        H = whh0.shape[-1]

        def cell(inp, h, c, wih, whh, bias):
            gates = (jnp.einsum("bd,gdh->gbh", inp, wih)
                     + jnp.einsum("bh,ghk->gbk", h, whh) + bias)
            i = jax.nn.sigmoid(gates[0]); f = jax.nn.sigmoid(gates[1])
            g_ = jnp.tanh(gates[2]); o = jax.nn.sigmoid(gates[3])
            c_new = f * c + i * g_
            return o * jnp.tanh(c_new), c_new

        h0 = jnp.zeros((B, H)); c0 = h0
        h1 = jnp.zeros((B, H)); c1 = h1
        hs = []
        for t in range(T):
            h0, c0 = cell(x[:, t, :], h0, c0, wih0, whh0, b0)
            h1, c1 = cell(h0, h1, c1, wih1, whh1, b1)
            hs.append(h1)
        lstm_out = jnp.stack(hs, axis=1)                        # (B, T, H)
        prob = jax.nn.softmax(lstm_out, axis=-1)[:, :, 1:]      # (B, T, O)
        pseudo = jnp.einsum("bto,btd->bod", prob, x)            # (B, O, Dx)

        x_common = pseudo @ params["wpx"] + params["bpx"]
        x_norm = x_common / jnp.maximum(
            jnp.linalg.norm(x_common, axis=-1, keepdims=True), eps)
        y_common = y @ params["wpy"] + params["bpy"]
        y_norm = y_common / jnp.maximum(
            jnp.linalg.norm(y_common, axis=-1, keepdims=True), eps)

        sim = logit_scale_exp * jnp.einsum("bts,bos->bto", y_norm, x_norm)
        logits = jax.nn.softmax(sim, axis=-1)
        hfc = jax.nn.relu(logits @ params["wf1"] + params["bf1"])
        gate = jax.nn.sigmoid(hfc @ params["wf2"] + params["bf2"])
        return jnp.einsum("bto,bod->btd", gate, pseudo)


if __name__ == "__main__":
    B, T, Dx = 2, 8, 32          # batch, x seq len, in_dim_x
    Ty, Dy = 8, 24               # y seq len, in_dim_y
    S = 32                       # shared_dim
    O = 8                        # out_seq_len
    H = O + 1                    # LSTM hidden size = out_seq_len + 1 (blank)
    O2 = round(O / 2)            # fc1 output size
    EPS = 1e-6                   # args.eps
    LOGIT_SCALE_EXP = float(jnp.exp(jnp.log(1.0 / 0.07)))

    key = jax.random.PRNGKey(0)
    ks = iter(jax.random.split(key, 20))

    def uinit(shape, fan_in):
        bound = 1.0 / (fan_in ** 0.5)
        return jax.random.uniform(next(ks), shape, jnp.float32, -bound, bound)

    params = {
        # 2-layer LSTM(in_dim_x -> out_seq_len+1), gate-stacked (i,f,g,o)
        "wih0": uinit((4, Dx, H), H), "whh0": uinit((4, H, H), H),
        "b0": uinit((4, 1, H), H),
        "wih1": uinit((4, H, H), H), "whh1": uinit((4, H, H), H),
        "b1": uinit((4, 1, H), H),
        # proj_x / proj_y (stored as (in, out))
        "wpx": uinit((Dx, S), Dx), "bpx": uinit((1, S), Dx),
        "wpy": uinit((Dy, S), Dy), "bpy": uinit((1, S), Dy),
        # fc1 / fc2
        "wf1": uinit((O, O2), O), "bf1": uinit((1, O2), O),
        "wf2": uinit((O2, O), O2), "bf2": uinit((1, O), O2),
    }
    x = jax.random.normal(next(ks), (B, T, Dx), jnp.float32)
    y = jax.random.normal(next(ks), (B, Ty, Dy), jnp.float32)

    # Whole batch in one program; do NOT shard a tiny batch across v7x's two
    # TensorCores (only pass batch_block when >= 8 rows land on each core).
    out = jax.block_until_ready(sim_module_forward(x, y, params,
                                                   LOGIT_SCALE_EXP, EPS))
    ref = reference_forward(x, y, params, LOGIT_SCALE_EXP, EPS)

    assert out.shape == (B, Ty, Dx), out.shape
    err = float(jnp.max(jnp.abs(out - ref)))
    assert err < 1e-4, f"max |pallas - reference| = {err}"
    print("KERNEL_OK")
</pallas_src>

<mosaic_0001>
module attributes {stable_mosaic.version = 11 : i64} {
  func.func @kernel(%arg0: i32, %arg1: memref<2x8x32xf32, #tpu.memory_space<vmem>>, %arg2: memref<2x8x24xf32, #tpu.memory_space<vmem>>, %arg3: memref<161x512xf32, #tpu.memory_space<vmem>>, %arg4: memref<257x512xf32, #tpu.memory_space<vmem>>, %arg5: memref<72x32xf32, #tpu.memory_space<vmem>>, %arg6: memref<32x8xf32, #tpu.memory_space<vmem>>, %arg7: memref<2x8x32xf32, #tpu.memory_space<vmem>>, %arg8: memref<2x8x128xf32, #tpu.memory_space<vmem>>, %arg9: memref<2x8x9xf32, #tpu.memory_space<vmem>>) attributes {dimension_semantics = [#tpu.dimension_semantics<parallel>], iteration_bounds = array<i64: 1>, scalar_prefetch = 0 : i64, scratch_operands = 2 : i64, tpu.core_type = #tpu.core_type<tc>, window_params = [{transform_indices = @transform_0, window_bounds = array<i64: 2, 8, 32>}, {transform_indices = @transform_1, window_bounds = array<i64: 2, 8, 24>}, {pipeline_mode = #tpu.pipeline_mode<synchronous>, transform_indices = @transform_2, window_bounds = array<i64: 161, 512>}, {pipeline_mode = #tpu.pipeline_mode<synchronous>, transform_indices = @transform_3, window_bounds = array<i64: 257, 512>}, {pipeline_mode = #tpu.pipeline_mode<synchronous>, transform_indices = @transform_4, window_bounds = array<i64: 72, 32>}, {pipeline_mode = #tpu.pipeline_mode<synchronous>, transform_indices = @transform_5, window_bounds = array<i64: 32, 8>}, {transform_indices = @transform_6, window_bounds = array<i64: 2, 8, 32>}]} {
    %c0 = arith.constant 0 : index
    %c0_0 = arith.constant 0 : index
    %c0_1 = arith.constant 0 : index
    %0 = vector.load %arg1[%c0, %c0_0, %c0_1] : memref<2x8x32xf32, #tpu.memory_space<vmem>>, vector<2x8x32xf32>
    %c0_2 = arith.constant 0 : index
    %c0_3 = arith.constant 0 : index
    %c0_4 = arith.constant 0 : index
    %1 = vector.load %arg2[%c0_2, %c0_3, %c0_4] : memref<2x8x24xf32, #tpu.memory_space<vmem>>, vector<2x8x24xf32>
    %c0_5 = arith.constant 0 : index
    %c0_6 = arith.constant 0 : index
    %2 = vector.load %arg3[%c0_5, %c0_6] : memref<161x512xf32, #tpu.memory_space<vmem>>, vector<32x512xf32>
    %c32 = arith.constant 32 : index
    %c0_7 = arith.constant 0 : index
    %3 = vector.load %arg3[%c32, %c0_7] : memref<161x512xf32, #tpu.memory_space<vmem>>, vector<128x512xf32>
    %c160 = arith.constant 160 : index
    %c0_8 = arith.constant 0 : index
    %4 = vector.load %arg3[%c160, %c0_8] : memref<161x512xf32, #tpu.memory_space<vmem>>, vector<1x512xf32>
    %5 = vector.shape_cast %0 : vector<2x8x32xf32> to vector<16x32xf32>
    %cst = arith.constant dense<0.000000e+00> : vector<16x512xf32>
    %6 = tpu.matmul %5, %2, %cst {dimension_numbers = #tpu.dot_dimension_numbers<[1], [0], [0], [1], [0, 0, 1, 1], [], []>} : vector<16x32xf32>, vector<32x512xf32>, vector<16x512xf32> -> vector<16x512xf32>
    %7 = vector.broadcast %4 : vector<1x512xf32> to vector<16x512xf32>
    %8 = arith.addf %6, %7 : vector<16x512xf32>
    %9 = vector.shape_cast %8 : vector<16x512xf32> to vector<2x8x512xf32>
    %cst_9 = arith.constant 0.000000e+00 : f32
    %10 = vector.broadcast %cst_9 : f32 to vector<2x128xf32>
    %cst_10 = arith.constant 0.000000e+00 : f32
    %11 = vector.broadcast %cst_10 : f32 to vector<2x128xf32>
    %12 = vector.extract_strided_slice %9 {offsets = [0, 0, 0], sizes = [2, 1, 512], strides = [1, 1, 1]} : vector<2x8x512xf32> to vector<2x1x512xf32>
    %13 = vector.shape_cast %12 : vector<2x1x512xf32> to vector<2x512xf32>
    %cst_11 = arith.constant dense<0.000000e+00> : vector<2x512xf32>
    %14 = tpu.matmul %10, %3, %cst_11 {dimension_numbers = #tpu.dot_dimension_numbers<[1], [0], [0], [1], [0, 0, 1, 1], [], []>} : vector<2x128xf32>, vector<128x512xf32>, vector<2x512xf32> -> vector<2x512xf32>
    %15 = arith.addf %13, %14 : vector<2x512xf32>
    %16 = vector.extract_strided_slice %15 {offsets = [0, 0], sizes = [2, 128], strides = [1, 1]} : vector<2x512xf32> to vector<2x128xf32>
    %17 = arith.negf %16 : vector<2x128xf32>
    %18 = math.exp %17 : vector<2x128xf32>
    %cst_12 = arith.constant 1.000000e+00 : f32
    %19 = vector.broadcast %cst_12 : f32 to vector<2x128xf32>
    %20 = arith.addf %19, %18 : vector<2x128xf32>
    %21 = arith.divf %19, %20 : vector<2x128xf32>
    %22 = vector.extract_strided_slice %15 {offsets = [0, 128], sizes = [2, 128], strides = [1, 1]} : vector<2x512xf32> to vector<2x128xf32>
    %23 = arith.negf %22 : vector<2x128xf32>
    %24 = math.exp %23 : vector<2x128xf32>
    %cst_13 = arith.constant 1.000000e+00 : f32
    %25 = vector.broadcast %cst_13 : f32 to vector<2x128xf32>
    %26 = arith.addf %25, %24 : vector<2x128xf32>
    %27 = arith.divf %25, %26 : vector<2x128xf32>
    %28 = vector.extract_strided_slice %15 {offsets = [0, 256], sizes = [2, 128], strides = [1, 1]} : vector<2x512xf32> to vector<2x128xf32>
    %29 = math.tanh %28 : vector<2x128xf32>
    %30 = vector.extract_strided_slice %15 {offsets = [0, 384], sizes = [2, 128], strides = [1, 1]} : vector<2x512xf32> to vector<2x128xf32>
    %31 = arith.negf %30 : vector<2x128xf32>
    %32 = math.exp %31 : vector<2x128xf32>
    %cst_14 = arith.constant 1.000000e+00 : f32
    %33 = vector.broadcast %cst_14 : f32 to vector<2x128xf32>
    %34 = arith.addf %33, %32 : vector<2x128xf32>
    %35 = arith.divf %33, %34 : vector<2x128xf32>
    %36 = arith.mulf %27, %11 : vector<2x128xf32>
    %37 = arith.mulf %21, %29 : vector<2x128xf32>
    %38 = arith.addf %36, %37 : vector<2x128xf32>
    %39 = math.tanh %38 : vector<2x128xf32>
    %40 = arith.mulf %35, %39 : vector<2x128xf32>
    %c0_15 = arith.constant 0 : index
    %c0_16 = arith.constant 0 : index
    %c0_17 = arith.constant 0 : index
    %41 = vector.load %arg8[%c0_15, %c0_16, %c0_17] : memref<2x8x128xf32, #tpu.memory_space<vmem>>, vector<2x1x128xf32>
    %42 = vector.shape_cast %41 : vector<2x1x128xf32> to vector<2x128xf32>
    %43 = vector.shape_cast %40 : vector<2x128xf32> to vector<2x1x128xf32>
    tpu.vector_store %arg8[%c0_15, %c0_16, %c0_17], %43 {strides = array<i32>} : memref<2x8x128xf32, #tpu.memory_space<vmem>>, vector<2x1x128xf32>,
    %44 = vector.extract_strided_slice %9 {offsets = [0, 1, 0], sizes = [2, 1, 512], strides = [1, 1, 1]} : vector<2x8x512xf32> to vector<2x1x512xf32>
    %45 = vector.shape_cast %44 : vector<2x1x512xf32> to vector<2x512xf32>
    %cst_18 = arith.constant dense<0.000000e+00> : vector<2x512xf32>
    %46 = tpu.matmul %40, %3, %cst_18 {dimension_numbers = #tpu.dot_dimension_numbers<[1], [0], [0], [1], [0, 0, 1, 1], [], []>} : vector<2x128xf32>, vector<128x512xf32>, vector<2x512xf32> -> vector<2x512xf32>
    %47 = arith.addf %45, %46 : vector<2x512xf32>
    %48 = vector.extract_strided_slice %47 {offsets = [0, 0], sizes = [2, 128], strides = [1, 1]} : vector<2x512xf32> to vector<2x128xf32>
    %49 = arith.negf %48 : vector<2x128xf32>
    %50 = math.exp %49 : vector<2x128xf32>
    %cst_19 = arith.constant 1.000000e+00 : f32
    %51 = vector.broadcast %cst_19 : f32 to vector<2x128xf32>
    %52 = arith.addf %51, %50 : vector<2x128xf32>
    %53 = arith.divf %51, %52 : vector<2x128xf32>
    %54 = vector.extract_strided_slice %47 {offsets = [0, 128], sizes = [2, 128], strides = [1, 1]} : vector<2x512xf32> to vector<2x128xf32>
    %55 = arith.negf %54 : vector<2x128xf32>
    %56 = math.exp %55 : vector<2x128xf32>
    %cst_20 = arith.constant 1.000000e+00 : f32
    %57 = vector.broadcast %cst_20 : f32 to vector<2x128xf32>
    %58 = arith.addf %57, %56 : vector<2x128xf32>
    %59 = arith.divf %57, %58 : vector<2x128xf32>
    %60 = vector.extract_strided_slice %47 {offsets = [0, 256], sizes = [2, 128], strides = [1, 1]} : vector<2x512xf32> to vector<2x128xf32>
    %61 = math.tanh %60 : vector<2x128xf32>
    %62 = vector.extract_strided_slice %47 {offsets = [0, 384], sizes = [2, 128], strides = [1, 1]} : vector<2x512xf32> to vector<2x128xf32>
    %63 = arith.negf %62 : vector<2x128xf32>
    %64 = math.exp %63 : vector<2x128xf32>
    %cst_21 = arith.constant 1.000000e+00 : f32
    %65 = vector.broadcast %cst_21 : f32 to vector<2x128xf32>
    %66 = arith.addf %65, %64 : vector<2x128xf32>
    %67 = arith.divf %65, %66 : vector<2x128xf32>
    %68 = arith.mulf %59, %38 : vector<2x128xf32>
    %69 = arith.mulf %53, %61 : vector<2x128xf32>
    %70 = arith.addf %68, %69 : vector<2x128xf32>
    %71 = math.tanh %70 : vector<2x128xf32>
    %72 = arith.mulf %67, %71 : vector<2x128xf32>
    %c0_22 = arith.constant 0 : index
    %c1 = arith.constant 1 : index
    %c0_23 = arith.constant 0 : index
    %73 = vector.load %arg8[%c0_22, %c1, %c0_23] : memref<2x8x128xf32, #tpu.memory_space<vmem>>, vector<2x1x128xf32>
    %74 = vector.shape_cast %73 : vector<2x1x128xf32> to vector<2x128xf32>
    %75 = vector.shape_cast %72 : vector<2x128xf32> to vector<2x1x128xf32>
    tpu.vector_store %arg8[%c0_22, %c1, %c0_23], %75 {strides = array<i32>} : memref<2x8x128xf32, #tpu.memory_space<vmem>>, vector<2x1x128xf32>,
    %76 = vector.extract_strided_slice %9 {offsets = [0, 2, 0], sizes = [2, 1, 512], strides = [1, 1, 1]} : vector<2x8x512xf32> to vector<2x1x512xf32>
    %77 = vector.shape_cast %76 : vector<2x1x512xf32> to vector<2x512xf32>
    %cst_24 = arith.constant dense<0.000000e+00> : vector<2x512xf32>
    %78 = tpu.matmul %72, %3, %cst_24 {dimension_numbers = #tpu.dot_dimension_numbers<[1], [0], [0], [1], [0, 0, 1, 1], [], []>} : vector<2x128xf32>, vector<128x512xf32>, vector<2x512xf32> -> vector<2x512xf32>
    %79 = arith.addf %77, %78 : vector<2x512xf32>
    %80 = vector.extract_strided_slice %79 {offsets = [0, 0], sizes = [2, 128], strides = [1, 1]} : vector<2x512xf32> to vector<2x128xf32>
    %81 = arith.negf %80 : vector<2x128xf32>
    %82 = math.exp %81 : vector<2x128xf32>
    %cst_25 = arith.constant 1.000000e+00 : f32
    %83 = vector.broadcast %cst_25 : f32 to vector<2x128xf32>
    %84 = arith.addf %83, %82 : vector<2x128xf32>
    %85 = arith.divf %83, %84 : vector<2x128xf32>
    %86 = vector.extract_strided_slice %79 {offsets = [0, 128], sizes = [2, 128], strides = [1, 1]} : vector<2x512xf32> to vector<2x128xf32>
    %87 = arith.negf %86 : vector<2x128xf32>
    %88 = math.exp %87 : vector<2x128xf32>
    %cst_26 = arith.constant 1.000000e+00 : f32
    %89 = vector.broadcast %cst_26 : f32 to vector<2x128xf32>
    %90 = arith.addf %89, %88 : vector<2x128xf32>
    %91 = arith.divf %89, %90 : vector<2x128xf32>
    %92 = vector.extract_strided_slice %79 {offsets = [0, 256], sizes = [2, 128], strides = [1, 1]} : vector<2x512xf32> to vector<2x128xf32>
    %93 = math.tanh %92 : vector<2x128xf32>
    %94 = vector.extract_strided_slice %79 {offsets = [0, 384], sizes = [2, 128], strides = [1, 1]} : vector<2x512xf32> to vector<2x128xf32>
    %95 = arith.negf %94 : vector<2x128xf32>
    %96 = math.exp %95 : vector<2x128xf32>
    %cst_27 = arith.constant 1.000000e+00 : f32
    %97 = vector.broadcast %cst_27 : f32 to vector<2x128xf32>
    %98 = arith.addf %97, %96 : vector<2x128xf32>
    %99 = arith.divf %97, %98 : vector<2x128xf32>
    %100 = arith.mulf %91, %70 : vector<2x128xf32>
    %101 = arith.mulf %85, %93 : vector<2x128xf32>
    %102 = arith.addf %100, %101 : vector<2x128xf32>
    %103 = math.tanh %102 : vector<2x128xf32>
    %104 = arith.mulf %99, %103 : vector<2x128xf32>
    %c0_28 = arith.constant 0 : index
    %c2 = arith.constant 2 : index
    %c0_29 = arith.constant 0 : index
    %105 = vector.load %arg8[%c0_28, %c2, %c0_29] : memref<2x8x128xf32, #tpu.memory_space<vmem>>, vector<2x1x128xf32>
    %106 = vector.shape_cast %105 : vector<2x1x128xf32> to vector<2x128xf32>
    %107 = vector.shape_cast %104 : vector<2x128xf32> to vector<2x1x128xf32>
    tpu.vector_store %arg8[%c0_28, %c2, %c0_29], %107 {strides = array<i32>} : memref<2x8x128xf32, #tpu.memory_space<vmem>>, vector<2x1x128xf32>,
    %108 = vector.extract_strided_slice %9 {offsets = [0, 3, 0], sizes = [2, 1, 512], strides = [1, 1, 1]} : vector<2x8x512xf32> to vector<2x1x512xf32>
    %109 = vector.shape_cast %108 : vector<2x1x512xf32> to vector<2x512xf32>
    %cst_30 = arith.constant dense<0.000000e+00> : vector<2x512xf32>
    %110 = tpu.matmul %104, %3, %cst_30 {dimension_numbers = #tpu.dot_dimension_numbers<[1], [0], [0], [1], [0, 0, 1, 1], [], []>} : vector<2x128xf32>, vector<128x512xf32>, vector<2x512xf32> -> vector<2x512xf32>
    %111 = arith.addf %109, %110 : vector<2x512xf32>
    %112 = vector.extract_strided_slice %111 {offsets = [0, 0], sizes = [2, 128], strides = [1, 1]} : vector<2x512xf32> to vector<2x128xf32>
    %113 = arith.negf %112 : vector<2x128xf32>
    %114 = math.exp %113 : vector<2x128xf32>
    %cst_31 = arith.constant 1.000000e+00 : f32
    %115 = vector.broadcast %cst_31 : f32 to vector<2x128xf32>
    %116 = arith.addf %115, %114 : vector<2x128xf32>
    %117 = arith.divf %115, %116 : vector<2x128xf32>
    %118 = vector.extract_strided_slice %111 {offsets = [0, 128], sizes = [2, 128], strides = [1, 1]} : vector<2x512xf32> to vector<2x128xf32>
    %119 = arith.negf %118 : vector<2x128xf32>
    %120 = math.exp %119 : vector<2x128xf32>
    %cst_32 = arith.constant 1.000000e+00 : f32
    %121 = vector.broadcast %cst_32 : f32 to vector<2x128xf32>
    %122 = arith.addf %121, %120 : vector<2x128xf32>
    %123 = arith.divf %121, %122 : vector<2x128xf32>
    %124 = vector.extract_strided_slice %111 {offsets = [0, 256], sizes = [2, 128], strides = [1, 1]} : vector<2x512xf32> to vector<2x128xf32>
    %125 = math.tanh %124 : vector<2x128xf32>
    %126 = vector.extract_strided_slice %111 {offsets = [0, 384], sizes = [2, 128], strides = [1, 1]} : vector<2x512xf32> to vector<2x128xf32>
    %127 = arith.negf %126 : vector<2x128xf32>
    %128 = math.exp %127 : vector<2x128xf32>
    %cst_33 = arith.constant 1.000000e+00 : f32
    %129 = vector.broadcast %cst_33 : f32 to vector<2x128xf32>
    %130 = arith.addf %129, %128 : vector<2x128xf32>
    %131 = arith.divf %129, %130 : vector<2x128xf32>
    %132 = arith.mulf %123, %102 : vector<2x128xf32>
    %133 = arith.mulf %117, %125 : vector<2x128xf32>
    %134 = arith.addf %132, %133 : vector<2x128xf32>
    %135 = math.tanh %134 : vector<2x128xf32>
    %136 = arith.mulf %131, %135 : vector<2x128xf32>
    %c0_34 = arith.constant 0 : index
    %c3 = arith.constant 3 : index
    %c0_35 = arith.constant 0 : index
    %137 = vector.load %arg8[%c0_34, %c3, %c0_35] : memref<2x8x128xf32, #tpu.memory_space<vmem>>, vector<2x1x128xf32>
    %138 = vector.shape_cast %137 : vector<2x1x128xf32> to vector<2x128xf32>
    %139 = vector.shape_cast %136 : vector<2x128xf32> to vector<2x1x128xf32>
    tpu.vector_store %arg8[%c0_34, %c3, %c0_35], %139 {strides = array<i32>} : memref<2x8x128xf32, #tpu.memory_space<vmem>>, vector<2x1x128xf32>,
    %140 = vector.extract_strided_slice %9 {offsets = [0, 4, 0], sizes = [2, 1, 512], strides = [1, 1, 1]} : vector<2x8x512xf32> to vector<2x1x512xf32>
    %141 = vector.shape_cast %140 : vector<2x1x512xf32> to vector<2x512xf32>
    %cst_36 = arith.constant dense<0.000000e+00> : vector<2x512xf32>
    %142 = tpu.matmul %136, %3, %cst_36 {dimension_numbers = #tpu.dot_dimension_numbers<[1], [0], [0], [1], [0, 0, 1, 1], [], []>} : vector<2x128xf32>, vector<128x512xf32>, vector<2x512xf32> -> vector<2x512xf32>
    %143 = arith.addf %141, %142 : vector<2x512xf32>
    %144 = vector.extract_strided_slice %143 {offsets = [0, 0], sizes = [2, 128], strides = [1, 1]} : vector<2x512xf32> to vector<2x128xf32>
    %145 = arith.negf %144 : vector<2x128xf32>
    %146 = math.exp %145 : vector<2x128xf32>
    %cst_37 = arith.constant 1.000000e+00 : f32
    %147 = vector.broadcast %cst_37 : f32 to vector<2x128xf32>
    %148 = arith.addf %147, %146 : vector<2x128xf32>
    %149 = arith.divf %147, %148 : vector<2x128xf32>
    %150 = vector.extract_strided_slice %143 {offsets = [0, 128], sizes = [2, 128], strides = [1, 1]} : vector<2x512xf32> to vector<2x128xf32>
    %151 = arith.negf %150 : vector<2x128xf32>
    %152 = math.exp %151 : vector<2x128xf32>
    %cst_38 = arith.constant 1.000000e+00 : f32
    %153 = vector.broadcast %cst_38 : f32 to vector<2x128xf32>
    %154 = arith.addf %153, %152 : vector<2x128xf32>
    %155 = arith.divf %153, %154 : vector<2x128xf32>
    %156 = vector.extract_strided_slice %143 {offsets = [0, 256], sizes = [2, 128], strides = [1, 1]} : vector<2x512xf32> to vector<2x128xf32>
    %157 = math.tanh %156 : vector<2x128xf32>
    %158 = vector.extract_strided_slice %143 {offsets = [0, 384], sizes = [2, 128], strides = [1, 1]} : vector<2x512xf32> to vector<2x128xf32>
    %159 = arith.negf %158 : vector<2x128xf32>
    %160 = math.exp %159 : vector<2x128xf32>
    %cst_39 = arith.constant 1.000000e+00 : f32
    %161 = vector.broadcast %cst_39 : f32 to vector<2x128xf32>
    %162 = arith.addf %161, %160 : vector<2x128xf32>
    %163 = arith.divf %161, %162 : vector<2x128xf32>
    %164 = arith.mulf %155, %134 : vector<2x128xf32>
    %165 = arith.mulf %149, %157 : vector<2x128xf32>
    %166 = arith.addf %164, %165 : vector<2x128xf32>
    %167 = math.tanh %166 : vector<2x128xf32>
    %168 = arith.mulf %163, %167 : vector<2x128xf32>
    %c0_40 = arith.constant 0 : index
    %c4 = arith.constant 4 : index
    %c0_41 = arith.constant 0 : index
    %169 = vector.load %arg8[%c0_40, %c4, %c0_41] : memref<2x8x128xf32, #tpu.memory_space<vmem>>, vector<2x1x128xf32>
    %170 = vector.shape_cast %169 : vector<2x1x128xf32> to vector<2x128xf32>
    %171 = vector.shape_cast %168 : vector<2x128xf32> to vector<2x1x128xf32>
    tpu.vector_store %arg8[%c0_40, %c4, %c0_41], %171 {strides = array<i32>} : memref<2x8x128xf32, #tpu.memory_space<vmem>>, vector<2x1x128xf32>,
    %172 = vector.extract_strided_slice %9 {offsets = [0, 5, 0], sizes = [2, 1, 512], strides = [1, 1, 1]} : vector<2x8x512xf32> to vector<2x1x512xf32>
    %173 = vector.shape_cast %172 : vector<2x1x512xf32> to vector<2x512xf32>
    %cst_42 = arith.constant dense<0.000000e+00> : vector<2x512xf32>
    %174 = tpu.matmul %168, %3, %cst_42 {dimension_numbers = #tpu.dot_dimension_numbers<[1], [0], [0], [1], [0, 0, 1, 1], [], []>} : vector<2x128xf32>, vector<128x512xf32>, vector<2x512xf32> -> vector<2x512xf32>
    %175 = arith.addf %173, %174 : vector<2x512xf32>
    %176 = vector.extract_strided_slice %175 {offsets = [0, 0], sizes = [2, 128], strides = [1, 1]} : vector<2x512xf32> to vector<2x128xf32>
    %177 = arith.negf %176 : vector<2x128xf32>
    %178 = math.exp %177 : vector<2x128xf32>
    %cst_43 = arith.constant 1.000000e+00 : f32
    %179 = vector.broadcast %cst_43 : f32 to vector<2x128xf32>
    %180 = arith.addf %179, %178 : vector<2x128xf32>
    %181 = arith.divf %179, %180 : vector<2x128xf32>
    %182 = vector.extract_strided_slice %175 {offsets = [0, 128], sizes = [2, 128], strides = [1, 1]} : vector<2x512xf32> to vector<2x128xf32>
    %183 = arith.negf %182 : vector<2x128xf32>
    %184 = math.exp %183 : vector<2x128xf32>
    %cst_44 = arith.constant 1.000000e+00 : f32
    %185 = vector.broadcast %cst_44 : f32 to vector<2x128xf32>
    %186 = arith.addf %185, %184 : vector<2x128xf32>
    %187 = arith.divf %185, %186 : vector<2x128xf32>
    %188 = vector.extract_strided_slice %175 {offsets = [0, 256], sizes = [2, 128], strides = [1, 1]} : vector<2x512xf32> to vector<2x128xf32>
    %189 = math.tanh %188 : vector<2x128xf32>
    %190 = vector.extract_strided_slice %175 {offsets = [0, 384], sizes = [2, 128], strides = [1, 1]} : vector<2x512xf32> to vector<2x128xf32>
    %191 = arith.negf %190 : vector<2x128xf32>
    %192 = math.exp %191 : vector<2x128xf32>
    %cst_45 = arith.constant 1.000000e+00 : f32
    %193 = vector.broadcast %cst_45 : f32 to vector<2x128xf32>
    %194 = arith.addf %193, %192 : vector<2x128xf32>
    %195 = arith.divf %193, %194 : vector<2x128xf32>
    %196 = arith.mulf %187, %166 : vector<2x128xf32>
    %197 = arith.mulf %181, %189 : vector<2x128xf32>
    %198 = arith.addf %196, %197 : vector<2x128xf32>
    %199 = math.tanh %198 : vector<2x128xf32>
    %200 = arith.mulf %195, %199 : vector<2x128xf32>
    %c0_46 = arith.constant 0 : index
    %c5 = arith.constant 5 : index
    %c0_47 = arith.constant 0 : index
    %201 = vector.load %arg8[%c0_46, %c5, %c0_47] : memref<2x8x128xf32, #tpu.memory_space<vmem>>, vector<2x1x128xf32>
    %202 = vector.shape_cast %201 : vector<2x1x128xf32> to vector<2x128xf32>
    %203 = vector.shape_cast %200 : vector<2x128xf32> to vector<2x1x128xf32>
    tpu.vector_store %arg8[%c0_46, %c5, %c0_47], %203 {strides = array<i32>} : memref<2x8x128xf32, #tpu.memory_space<vmem>>, vector<2x1x128xf32>,
    %204 = vector.extract_strided_slice %9 {offsets = [0, 6, 0], sizes = [2, 1, 512], strides = [1, 1, 1]} : vector<2x8x512xf32> to vector<2x1x512xf32>
    %205 = vector.shape_cast %204 : vector<2x1x512xf32> to vector<2x512xf32>
    %cst_48 = arith.constant dense<0.000000e+00> : vector<2x512xf32>
    %206 = tpu.matmul %200, %3, %cst_48 {dimension_numbers = #tpu.dot_dimension_numbers<[1], [0], [0], [1], [0, 0, 1, 1], [], []>} : vector<2x128xf32>, vector<128x512xf32>, vector<2x512xf32> -> vector<2x512xf32>
    %207 = arith.addf %205, %206 : vector<2x512xf32>
    %208 = vector.extract_strided_slice %207 {offsets = [0, 0], sizes = [2, 128], strides = [1, 1]} : vector<2x512xf32> to vector<2x128xf32>
    %209 = arith.negf %208 : vector<2x128xf32>
    %210 = math.exp %209 : vector<2x128xf32>
    %cst_49 = arith.constant 1.000000e+00 : f32
    %211 = vector.broadcast %cst_49 : f32 to vector<2x128xf32>
    %212 = arith.addf %211, %210 : vector<2x128xf32>
    %213 = arith.divf %211, %212 : vector<2x128xf32>
    %214 = vector.extract_strided_slice %207 {offsets = [0, 128], sizes = [2, 128], strides = [1, 1]} : vector<2x512xf32> to vector<2x128xf32>
    %215 = arith.negf %214 : vector<2x128xf32>
    %216 = math.exp %215 : vector<2x128xf32>
    %cst_50 = arith.constant 1.000000e+00 : f32
    %217 = vector.broadcast %cst_50 : f32 to vector<2x128xf32>
    %218 = arith.addf %217, %216 : vector<2x128xf32>
    %219 = arith.divf %217, %218 : vector<2x128xf32>
    %220 = vector.extract_strided_slice %207 {offsets = [0, 256], sizes = [2, 128], strides = [1, 1]} : vector<2x512xf32> to vector<2x128xf32>
    %221 = math.tanh %220 : vector<2x128xf32>
    %222 = vector.extract_strided_slice %207 {offsets = [0, 384], sizes = [2, 128], strides = [1, 1]} : vector<2x512xf32> to vector<2x128xf32>
    %223 = arith.negf %222 : vector<2x128xf32>
    %224 = math.exp %223 : vector<2x128xf32>
    %cst_51 = arith.constant 1.000000e+00 : f32
    %225 = vector.broadcast %cst_51 : f32 to vector<2x128xf32>
    %226 = arith.addf %225, %224 : vector<2x128xf32>
    %227 = arith.divf %225, %226 : vector<2x128xf32>
    %228 = arith.mulf %219, %198 : vector<2x128xf32>
    %229 = arith.mulf %213, %221 : vector<2x128xf32>
    %230 = arith.addf %228, %229 : vector<2x128xf32>
    %231 = math.tanh %230 : vector<2x128xf32>
    %232 = arith.mulf %227, %231 : vector<2x128xf32>
    %c0_52 = arith.constant 0 : index
    %c6 = arith.constant 6 : index
    %c0_53 = arith.constant 0 : index
    %233 = vector.load %arg8[%c0_52, %c6, %c0_53] : memref<2x8x128xf32, #tpu.memory_space<vmem>>, vector<2x1x128xf32>
    %234 = vector.shape_cast %233 : vector<2x1x128xf32> to vector<2x128xf32>
    %235 = vector.shape_cast %232 : vector<2x128xf32> to vector<2x1x128xf32>
    tpu.vector_store %arg8[%c0_52, %c6, %c0_53], %235 {strides = array<i32>} : memref<2x8x128xf32, #tpu.memory_space<vmem>>, vector<2x1x128xf32>,
    %236 = vector.extract_strided_slice %9 {offsets = [0, 7, 0], sizes = [2, 1, 512], strides = [1, 1, 1]} : vector<2x8x512xf32> to vector<2x1x512xf32>
    %237 = vector.shape_cast %236 : vector<2x1x512xf32> to vector<2x512xf32>
    %cst_54 = arith.constant dense<0.000000e+00> : vector<2x512xf32>
    %238 = tpu.matmul %232, %3, %cst_54 {dimension_numbers = #tpu.dot_dimension_numbers<[1], [0], [0], [1], [0, 0, 1, 1], [], []>} : vector<2x128xf32>, vector<128x512xf32>, vector<2x512xf32> -> vector<2x512xf32>
    %239 = arith.addf %237, %238 : vector<2x512xf32>
    %240 = vector.extract_strided_slice %239 {offsets = [0, 0], sizes = [2, 128], strides = [1, 1]} : vector<2x512xf32> to vector<2x128xf32>
    %241 = arith.negf %240 : vector<2x128xf32>
    %242 = math.exp %241 : vector<2x128xf32>
    %cst_55 = arith.constant 1.000000e+00 : f32
    %243 = vector.broadcast %cst_55 : f32 to vector<2x128xf32>
    %244 = arith.addf %243, %242 : vector<2x128xf32>
    %245 = arith.divf %243, %244 : vector<2x128xf32>
    %246 = vector.extract_strided_slice %239 {offsets = [0, 128], sizes = [2, 128], strides = [1, 1]} : vector<2x512xf32> to vector<2x128xf32>
    %247 = arith.negf %246 : vector<2x128xf32>
    %248 = math.exp %247 : vector<2x128xf32>
    %cst_56 = arith.constant 1.000000e+00 : f32
    %249 = vector.broadcast %cst_56 : f32 to vector<2x128xf32>
    %250 = arith.addf %249, %248 : vector<2x128xf32>
    %251 = arith.divf %249, %250 : vector<2x128xf32>
    %252 = vector.extract_strided_slice %239 {offsets = [0, 256], sizes = [2, 128], strides = [1, 1]} : vector<2x512xf32> to vector<2x128xf32>
    %253 = math.tanh %252 : vector<2x128xf32>
    %254 = vector.extract_strided_slice %239 {offsets = [0, 384], sizes = [2, 128], strides = [1, 1]} : vector<2x512xf32> to vector<2x128xf32>
    %255 = arith.negf %254 : vector<2x128xf32>
    %256 = math.exp %255 : vector<2x128xf32>
    %cst_57 = arith.constant 1.000000e+00 : f32
    %257 = vector.broadcast %cst_57 : f32 to vector<2x128xf32>
    %258 = arith.addf %257, %256 : vector<2x128xf32>
    %259 = arith.divf %257, %258 : vector<2x128xf32>
    %260 = arith.mulf %251, %230 : vector<2x128xf32>
    %261 = arith.mulf %245, %253 : vector<2x128xf32>
    %262 = arith.addf %260, %261 : vector<2x128xf32>
    %263 = math.tanh %262 : vector<2x128xf32>
    %264 = arith.mulf %259, %263 : vector<2x128xf32>
    %c0_58 = arith.constant 0 : index
    %c7 = arith.constant 7 : index
    %c0_59 = arith.constant 0 : index
    %265 = vector.load %arg8[%c0_58, %c7, %c0_59] : memref<2x8x128xf32, #tpu.memory_space<vmem>>, vector<2x1x128xf32>
    %266 = vector.shape_cast %265 : vector<2x1x128xf32> to vector<2x128xf32>
    %267 = vector.shape_cast %264 : vector<2x128xf32> to vector<2x1x128xf32>
    tpu.vector_store %arg8[%c0_58, %c7, %c0_59], %267 {strides = array<i32>} : memref<2x8x128xf32, #tpu.memory_space<vmem>>, vector<2x1x128xf32>,
    %c0_60 = arith.constant 0 : index
    %c0_61 = arith.constant 0 : index
    %268 = vector.load %arg4[%c0_60, %c0_61] : memref<257x512xf32, #tpu.memory_space<vmem>>, vector<128x512xf32>
    %c128 = arith.constant 128 : index
    %c0_62 = arith.constant 0 : index
    %269 = vector.load %arg4[%c128, %c0_62] : memref<257x512xf32, #tpu.memory_space<vmem>>, vector<128x512xf32>
    %c256 = arith.constant 256 : index
    %c0_63 = arith.constant 0 : index
    %270 = vector.load %arg4[%c256, %c0_63] : memref<257x512xf32, #tpu.memory_space<vmem>>, vector<1x512xf32>
    %c0_64 = arith.constant 0 : index
    %c0_65 = arith.constant 0 : index
    %c0_66 = arith.constant 0 : index
    %271 = vector.load %arg8[%c0_64, %c0_65, %c0_66] : memref<2x8x128xf32, #tpu.memory_space<vmem>>, vector<2x8x128xf32>
    %272 = vector.shape_cast %271 : vector<2x8x128xf32> to vector<16x128xf32>
    %cst_67 = arith.constant dense<0.000000e+00> : vector<16x512xf32>
    %273 = tpu.matmul %272, %268, %cst_67 {dimension_numbers = #tpu.dot_dimension_numbers<[1], [0], [0], [1], [0, 0, 1, 1], [], []>} : vector<16x128xf32>, vector<128x512xf32>, vector<16x512xf32> -> vector<16x512xf32>
    %274 = vector.broadcast %270 : vector<1x512xf32> to vector<16x512xf32>
    %275 = arith.addf %273, %274 : vector<16x512xf32>
    %276 = vector.shape_cast %275 : vector<16x512xf32> to vector<2x8x512xf32>
    %cst_68 = arith.constant 0.000000e+00 : f32
    %277 = vector.broadcast %cst_68 : f32 to vector<2x128xf32>
    %cst_69 = arith.constant 0.000000e+00 : f32
    %278 = vector.broadcast %cst_69 : f32 to vector<2x128xf32>
    %279 = vector.extract_strided_slice %276 {offsets = [0, 0, 0], sizes = [2, 1, 512], strides = [1, 1, 1]} : vector<2x8x512xf32> to vector<2x1x512xf32>
    %280 = vector.shape_cast %279 : vector<2x1x512xf32> to vector<2x512xf32>
    %cst_70 = arith.constant dense<0.000000e+00> : vector<2x512xf32>
    %281 = tpu.matmul %277, %269, %cst_70 {dimension_numbers = #tpu.dot_dimension_numbers<[1], [0], [0], [1], [0, 0, 1, 1], [], []>} : vector<2x128xf32>, vector<128x512xf32>, vector<2x512xf32> -> vector<2x512xf32>
    %282 = arith.addf %280, %281 : vector<2x512xf32>
    %283 = vector.extract_strided_slice %282 {offsets = [0, 0], sizes = [2, 128], strides = [1, 1]} : vector<2x512xf32> to vector<2x128xf32>
    %284 = arith.negf %283 : vector<2x128xf32>
    %285 = math.exp %284 : vector<2x128xf32>
    %cst_71 = arith.constant 1.000000e+00 : f32
    %286 = vector.broadcast %cst_71 : f32 to vector<2x128xf32>
    %287 = arith.addf %286, %285 : vector<2x128xf32>
    %288 = arith.divf %286, %287 : vector<2x128xf32>
    %289 = vector.extract_strided_slice %282 {offsets = [0, 128], sizes = [2, 128], strides = [1, 1]} : vector<2x512xf32> to vector<2x128xf32>
    %290 = arith.negf %289 : vector<2x128xf32>
    %291 = math.exp %290 : vector<2x128xf32>
    %cst_72 = arith.constant 1.000000e+00 : f32
    %292 = vector.broadcast %cst_72 : f32 to vector<2x128xf32>
    %293 = arith.addf %292, %291 : vector<2x128xf32>
    %294 = arith.divf %292, %293 : vector<2x128xf32>
    %295 = vector.extract_strided_slice %282 {offsets = [0, 256], sizes = [2, 128], strides = [1, 1]} : vector<2x512xf32> to vector<2x128xf32>
    %296 = math.tanh %295 : vector<2x128xf32>
    %297 = vector.extract_strided_slice %282 {offsets = [0, 384], sizes = [2, 128], strides = [1, 1]} : vector<2x512xf32> to vector<2x128xf32>
    %298 = arith.negf %297 : vector<2x128xf32>
    %299 = math.exp %298 : vector<2x128xf32>
    %cst_73 = arith.constant 1.000000e+00 : f32
    %300 = vector.broadcast %cst_73 : f32 to vector<2x128xf32>
    %301 = arith.addf %300, %299 : vector<2x128xf32>
    %302 = arith.divf %300, %301 : vector<2x128xf32>
    %303 = arith.mulf %294, %278 : vector<2x128xf32>
    %304 = arith.mulf %288, %296 : vector<2x128xf32>
    %305 = arith.addf %303, %304 : vector<2x128xf32>
    %306 = math.tanh %305 : vector<2x128xf32>
    %307 = arith.mulf %302, %306 : vector<2x128xf32>
    %308 = vector.extract_strided_slice %307 {offsets = [0, 0], sizes = [2, 9], strides = [1, 1]} : vector<2x128xf32> to vector<2x9xf32>
    %c0_74 = arith.constant 0 : index
    %c0_75 = arith.constant 0 : index
    %c0_76 = arith.constant 0 : index
    %309 = vector.load %arg9[%c0_74, %c0_75, %c0_76] : memref<2x8x9xf32, #tpu.memory_space<vmem>>, vector<2x1x9xf32>
    %310 = vector.shape_cast %309 : vector<2x1x9xf32> to vector<2x9xf32>
    %311 = vector.shape_cast %308 : vector<2x9xf32> to vector<2x1x9xf32>
    tpu.vector_store %arg9[%c0_74, %c0_75, %c0_76], %311 {strides = array<i32>} : memref<2x8x9xf32, #tpu.memory_space<vmem>>, vector<2x1x9xf32>,
    %312 = vector.extract_strided_slice %276 {offsets = [0, 1, 0], sizes = [2, 1, 512], strides = [1, 1, 1]} : vector<2x8x512xf32> to vector<2x1x512xf32>
    %313 = vector.shape_cast %312 : vector<2x1x512xf32> to vector<2x512xf32>
    %cst_77 = arith.constant dense<0.000000e+00> : vector<2x512xf32>
    %314 = tpu.matmul %307, %269, %cst_77 {dimension_numbers = #tpu.dot_dimension_numbers<[1], [0], [0], [1], [0, 0, 1, 1], [], []>} : vector<2x128xf32>, vector<128x512xf32>, vector<2x512xf32> -> vector<2x512xf32>
    %315 = arith.addf %313, %314 : vector<2x512xf32>
    %316 = vector.extract_strided_slice %315 {offsets = [0, 0], sizes = [2, 128], strides = [1, 1]} : vector<2x512xf32> to vector<2x128xf32>
    %317 = arith.negf %316 : vector<2x128xf32>
    %318 = math.exp %317 : vector<2x128xf32>
    %cst_78 = arith.constant 1.000000e+00 : f32
    %319 = vector.broadcast %cst_78 : f32 to vector<2x128xf32>
    %320 = arith.addf %319, %318 : vector<2x128xf32>
    %321 = arith.divf %319, %320 : vector<2x128xf32>
    %322 = vector.extract_strided_slice %315 {offsets = [0, 128], sizes = [2, 128], strides = [1, 1]} : vector<2x512xf32> to vector<2x128xf32>
    %323 = arith.negf %322 : vector<2x128xf32>
    %324 = math.exp %323 : vector<2x128xf32>
    %cst_79 = arith.constant 1.000000e+00 : f32
    %325 = vector.broadcast %cst_79 : f32 to vector<2x128xf32>
    %326 = arith.addf %325, %324 : vector<2x128xf32>
    %327 = arith.divf %325, %326 : vector<2x128xf32>
    %328 = vector.extract_strided_slice %315 {offsets = [0, 256], sizes = [2, 128], strides = [1, 1]} : vector<2x512xf32> to vector<2x128xf32>
    %329 = math.tanh %328 : vector<2x128xf32>
    %330 = vector.extract_strided_slice %315 {offsets = [0, 384], sizes = [2, 128], strides = [1, 1]} : vector<2x512xf32> to vector<2x128xf32>
    %331 = arith.negf %330 : vector<2x128xf32>
    %332 = math.exp %331 : vector<2x128xf32>
    %cst_80 = arith.constant 1.000000e+00 : f32
    %333 = vector.broadcast %cst_80 : f32 to vector<2x128xf32>
    %334 = arith.addf %333, %332 : vector<2x128xf32>
    %335 = arith.divf %333, %334 : vector<2x128xf32>
    %336 = arith.mulf %327, %305 : vector<2x128xf32>
    %337 = arith.mulf %321, %329 : vector<2x128xf32>
    %338 = arith.addf %336, %337 : vector<2x128xf32>
    %339 = math.tanh %338 : vector<2x128xf32>
    %340 = arith.mulf %335, %339 : vector<2x128xf32>
    %341 = vector.extract_strided_slice %340 {offsets = [0, 0], sizes = [2, 9], strides = [1, 1]} : vector<2x128xf32> to vector<2x9xf32>
    %c0_81 = arith.constant 0 : index
    %c1_82 = arith.constant 1 : index
    %c0_83 = arith.constant 0 : index
    %342 = vector.load %arg9[%c0_81, %c1_82, %c0_83] : memref<2x8x9xf32, #tpu.memory_space<vmem>>, vector<2x1x9xf32>
    %343 = vector.shape_cast %342 : vector<2x1x9xf32> to vector<2x9xf32>
    %344 = vector.shape_cast %341 : vector<2x9xf32> to vector<2x1x9xf32>
    tpu.vector_store %arg9[%c0_81, %c1_82, %c0_83], %344 {strides = array<i32>} : memref<2x8x9xf32, #tpu.memory_space<vmem>>, vector<2x1x9xf32>,
    %345 = vector.extract_strided_slice %276 {offsets = [0, 2, 0], sizes = [2, 1, 512], strides = [1, 1, 1]} : vector<2x8x512xf32> to vector<2x1x512xf32>
    %346 = vector.shape_cast %345 : vector<2x1x512xf32> to vector<2x512xf32>
    %cst_84 = arith.constant dense<0.000000e+00> : vector<2x512xf32>
    %347 = tpu.matmul %340, %269, %cst_84 {dimension_numbers = #tpu.dot_dimension_numbers<[1], [0], [0], [1], [0, 0, 1, 1], [], []>} : vector<2x128xf32>, vector<128x512xf32>, vector<2x512xf32> -> vector<2x512xf32>
    %348 = arith.addf %346, %347 : vector<2x512xf32>
    %349 = vector.extract_strided_slice %348 {offsets = [0, 0], sizes = [2, 128], strides = [1, 1]} : vector<2x512xf32> to vector<2x128xf32>
    %350 = arith.negf %349 : vector<2x128xf32>
    %351 = math.exp %350 : vector<2x128xf32>
    %cst_85 = arith.constant 1.000000e+00 : f32
    %352 = vector.broadcast %cst_85 : f32 to vector<2x128xf32>
    %353 = arith.addf %352, %351 : vector<2x128xf32>
    %354 = arith.divf %352, %353 : vector<2x128xf32>
    %355 = vector.extract_strided_slice %348 {offsets = [0, 128], sizes = [2, 128], strides = [1, 1]} : vector<2x512xf32> to vector<2x128xf32>
    %356 = arith.negf %355 : vector<2x128xf32>
    %357 = math.exp %356 : vector<2x128xf32>
    %cst_86 = arith.constant 1.000000e+00 : f32
    %358 = vector.broadcast %cst_86 : f32 to vector<2x128xf32>
    %359 = arith.addf %358, %357 : vector<2x128xf32>
    %360 = arith.divf %358, %359 : vector<2x128xf32>
    %361 = vector.extract_strided_slice %348 {offsets = [0, 256], sizes = [2, 128], strides = [1, 1]} : vector<2x512xf32> to vector<2x128xf32>
    %362 = math.tanh %361 : vector<2x128xf32>
    %363 = vector.extract_strided_slice %348 {offsets = [0, 384], sizes = [2, 128], strides = [1, 1]} : vector<2x512xf32> to vector<2x128xf32>
    %364 = arith.negf %363 : vector<2x128xf32>
    %365 = math.exp %364 : vector<2x128xf32>
    %cst_87 = arith.constant 1.000000e+00 : f32
    %366 = vector.broadcast %cst_87 : f32 to vector<2x128xf32>
    %367 = arith.addf %366, %365 : vector<2x128xf32>
    %368 = arith.divf %366, %367 : vector<2x128xf32>
    %369 = arith.mulf %360, %338 : vector<2x128xf32>
    %370 = arith.mulf %354, %362 : vector<2x128xf32>
    %371 = arith.addf %369, %370 : vector<2x128xf32>
    %372 = math.tanh %371 : vector<2x128xf32>
    %373 = arith.mulf %368, %372 : vector<2x128xf32>
    %374 = vector.extract_strided_slice %373 {offsets = [0, 0], sizes = [2, 9], strides = [1, 1]} : vector<2x128xf32> to vector<2x9xf32>
    %c0_88 = arith.constant 0 : index
    %c2_89 = arith.constant 2 : index
    %c0_90 = arith.constant 0 : index
    %375 = vector.load %arg9[%c0_88, %c2_89, %c0_90] : memref<2x8x9xf32, #tpu.memory_space<vmem>>, vector<2x1x9xf32>
    %376 = vector.shape_cast %375 : vector<2x1x9xf32> to vector<2x9xf32>
    %377 = vector.shape_cast %374 : vector<2x9xf32> to vector<2x1x9xf32>
    tpu.vector_store %arg9[%c0_88, %c2_89, %c0_90], %377 {strides = array<i32>} : memref<2x8x9xf32, #tpu.memory_space<vmem>>, vector<2x1x9xf32>,
    %378 = vector.extract_strided_slice %276 {offsets = [0, 3, 0], sizes = [2, 1, 512], strides = [1, 1, 1]} : vector<2x8x512xf32> to vector<2x1x512xf32>
    %379 = vector.shape_cast %378 : vector<2x1x512xf32> to vector<2x512xf32>
    %cst_91 = arith.constant dense<0.000000e+00> : vector<2x512xf32>
    %380 = tpu.matmul %373, %269, %cst_91 {dimension_numbers = #tpu.dot_dimension_numbers<[1], [0], [0], [1], [0, 0, 1, 1], [], []>} : vector<2x128xf32>, vector<128x512xf32>, vector<2x512xf32> -> vector<2x512xf32>
    %381 = arith.addf %379, %380 : vector<2x512xf32>
    %382 = vector.extract_strided_slice %381 {offsets = [0, 0], sizes = [2, 128], strides = [1, 1]} : vector<2x512xf32> to vector<2x128xf32>
    %383 = arith.negf %382 : vector<2x128xf32>
    %384 = math.exp %383 : vector<2x128xf32>
    %cst_92 = arith.constant 1.000000e+00 : f32
    %385 = vector.broadcast %cst_92 : f32 to vector<2x128xf32>
    %386 = arith.addf %385, %384 : vector<2x128xf32>
    %387 = arith.divf %385, %386 : vector<2x128xf32>
    %388 = vector.extract_strided_slice %381 {offsets = [0, 128], sizes = [2, 128], strides = [1, 1]} : vector<2x512xf32> to vector<2x128xf32>
    %389 = arith.negf %388 : vector<2x128xf32>
    %390 = math.exp %389 : vector<2x128xf32>
    %cst_93 = arith.constant 1.000000e+00 : f32
    %391 = vector.broadcast %cst_93 : f32 to vector<2x128xf32>
    %392 = arith.addf %391, %390 : vector<2x128xf32>
    %393 = arith.divf %391, %392 : vector<2x128xf32>
    %394 = vector.extract_strided_slice %381 {offsets = [0, 256], sizes = [2, 128], strides = [1, 1]} : vector<2x512xf32> to vector<2x128xf32>
    %395 = math.tanh %394 : vector<2x128xf32>
    %396 = vector.extract_strided_slice %381 {offsets = [0, 384], sizes = [2, 128], strides = [1, 1]} : vector<2x512xf32> to vector<2x128xf32>
    %397 = arith.negf %396 : vector<2x128xf32>
    %398 = math.exp %397 : vector<2x128xf32>
    %cst_94 = arith.constant 1.000000e+00 : f32
    %399 = vector.broadcast %cst_94 : f32 to vector<2x128xf32>
    %400 = arith.addf %399, %398 : vector<2x128xf32>
    %401 = arith.divf %399, %400 : vector<2x128xf32>
    %402 = arith.mulf %393, %371 : vector<2x128xf32>
    %403 = arith.mulf %387, %395 : vector<2x128xf32>
    %404 = arith.addf %402, %403 : vector<2x128xf32>
    %405 = math.tanh %404 : vector<2x128xf32>
    %406 = arith.mulf %401, %405 : vector<2x128xf32>
    %407 = vector.extract_strided_slice %406 {offsets = [0, 0], sizes = [2, 9], strides = [1, 1]} : vector<2x128xf32> to vector<2x9xf32>
    %c0_95 = arith.constant 0 : index
    %c3_96 = arith.constant 3 : index
    %c0_97 = arith.constant 0 : index
    %408 = vector.load %arg9[%c0_95, %c3_96, %c0_97] : memref<2x8x9xf32, #tpu.memory_space<vmem>>, vector<2x1x9xf32>
    %409 = vector.shape_cast %408 : vector<2x1x9xf32> to vector<2x9xf32>
    %410 = vector.shape_cast %407 : vector<2x9xf32> to vector<2x1x9xf32>
    tpu.vector_store %arg9[%c0_95, %c3_96, %c0_97], %410 {strides = array<i32>} : memref<2x8x9xf32, #tpu.memory_space<vmem>>, vector<2x1x9xf32>,
    %411 = vector.extract_strided_slice %276 {offsets = [0, 4, 0], sizes = [2, 1, 512], strides = [1, 1, 1]} : vector<2x8x512xf32> to vector<2x1x512xf32>
    %412 = vector.shape_cast %411 : vector<2x1x512xf32> to vector<2x512xf32>
    %cst_98 = arith.constant dense<0.000000e+00> : vector<2x512xf32>
    %413 = tpu.matmul %406, %269, %cst_98 {dimension_numbers = #tpu.dot_dimension_numbers<[1], [0], [0], [1], [0, 0, 1, 1], [], []>} : vector<2x128xf32>, vector<128x512xf32>, vector<2x512xf32> -> vector<2x512xf32>
    %414 = arith.addf %412, %413 : vector<2x512xf32>
    %415 = vector.extract_strided_slice %414 {offsets = [0, 0], sizes = [2, 128], strides = [1, 1]} : vector<2x512xf32> to vector<2x128xf32>
    %416 = arith.negf %415 : vector<2x128xf32>
    %417 = math.exp %416 : vector<2x128xf32>
    %cst_99 = arith.constant 1.000000e+00 : f32
    %418 = vector.broadcast %cst_99 : f32 to vector<2x128xf32>
    %419 = arith.addf %418, %417 : vector<2x128xf32>
    %420 = arith.divf %418, %419 : vector<2x128xf32>
    %421 = vector.extract_strided_slice %414 {offsets = [0, 128], sizes = [2, 128], strides = [1, 1]} : vector<2x512xf32> to vector<2x128xf32>
    %422 = arith.negf %421 : vector<2x128xf32>
    %423 = math.exp %422 : vector<2x128xf32>
    %cst_100 = arith.constant 1.000000e+00 : f32
    %424 = vector.broadcast %cst_100 : f32 to vector<2x128xf32>
    %425 = arith.addf %424, %423 : vector<2x128xf32>
    %426 = arith.divf %424, %425 : vector<2x128xf32>
    %427 = vector.extract_strided_slice %414 {offsets = [0, 256], sizes = [2, 128], strides = [1, 1]} : vector<2x512xf32> to vector<2x128xf32>
    %428 = math.tanh %427 : vector<2x128xf32>
    %429 = vector.extract_strided_slice %414 {offsets = [0, 384], sizes = [2, 128], strides = [1, 1]} : vector<2x512xf32> to vector<2x128xf32>
    %430 = arith.negf %429 : vector<2x128xf32>
    %431 = math.exp %430 : vector<2x128xf32>
    %cst_101 = arith.constant 1.000000e+00 : f32
    %432 = vector.broadcast %cst_101 : f32 to vector<2x128xf32>
    %433 = arith.addf %432, %431 : vector<2x128xf32>
    %434 = arith.divf %432, %433 : vector<2x128xf32>
    %435 = arith.mulf %426, %404 : vector<2x128xf32>
    %436 = arith.mulf %420, %428 : vector<2x128xf32>
    %437 = arith.addf %435, %436 : vector<2x128xf32>
    %438 = math.tanh %437 : vector<2x128xf32>
    %439 = arith.mulf %434, %438 : vector<2x128xf32>
    %440 = vector.extract_strided_slice %439 {offsets = [0, 0], sizes = [2, 9], strides = [1, 1]} : vector<2x128xf32> to vector<2x9xf32>
    %c0_102 = arith.constant 0 : index
    %c4_103 = arith.constant 4 : index
    %c0_104 = arith.constant 0 : index
    %441 = vector.load %arg9[%c0_102, %c4_103, %c0_104] : memref<2x8x9xf32, #tpu.memory_space<vmem>>, vector<2x1x9xf32>
    %442 = vector.shape_cast %441 : vector<2x1x9xf32> to vector<2x9xf32>
    %443 = vector.shape_cast %440 : vector<2x9xf32> to vector<2x1x9xf32>
    tpu.vector_store %arg9[%c0_102, %c4_103, %c0_104], %443 {strides = array<i32>} : memref<2x8x9xf32, #tpu.memory_space<vmem>>, vector<2x1x9xf32>,
    %444 = vector.extract_strided_slice %276 {offsets = [0, 5, 0], sizes = [2, 1, 512], strides = [1, 1, 1]} : vector<2x8x512xf32> to vector<2x1x512xf32>
    %445 = vector.shape_cast %444 : vector<2x1x512xf32> to vector<2x512xf32>
    %cst_105 = arith.constant dense<0.000000e+00> : vector<2x512xf32>
    %446 = tpu.matmul %439, %269, %cst_105 {dimension_numbers = #tpu.dot_dimension_numbers<[1], [0], [0], [1], [0, 0, 1, 1], [], []>} : vector<2x128xf32>, vector<128x512xf32>, vector<2x512xf32> -> vector<2x512xf32>
    %447 = arith.addf %445, %446 : vector<2x512xf32>
    %448 = vector.extract_strided_slice %447 {offsets = [0, 0], sizes = [2, 128], strides = [1, 1]} : vector<2x512xf32> to vector<2x128xf32>
    %449 = arith.negf %448 : vector<2x128xf32>
    %450 = math.exp %449 : vector<2x128xf32>
    %cst_106 = arith.constant 1.000000e+00 : f32
    %451 = vector.broadcast %cst_106 : f32 to vector<2x128xf32>
    %452 = arith.addf %451, %450 : vector<2x128xf32>
    %453 = arith.divf %451, %452 : vector<2x128xf32>
    %454 = vector.extract_strided_slice %447 {offsets = [0, 128], sizes = [2, 128], strides = [1, 1]} : vector<2x512xf32> to vector<2x128xf32>
    %455 = arith.negf %454 : vector<2x128xf32>
    %456 = math.exp %455 : vector<2x128xf32>
    %cst_107 = arith.constant 1.000000e+00 : f32
    %457 = vector.broadcast %cst_107 : f32 to vector<2x128xf32>
    %458 = arith.addf %457, %456 : vector<2x128xf32>
    %459 = arith.divf %457, %458 : vector<2x128xf32>
    %460 = vector.extract_strided_slice %447 {offsets = [0, 256], sizes = [2, 128], strides = [1, 1]} : vector<2x512xf32> to vector<2x128xf32>
    %461 = math.tanh %460 : vector<2x128xf32>
    %462 = vector.extract_strided_slice %447 {offsets = [0, 384], sizes = [2, 128], strides = [1, 1]} : vector<2x512xf32> to vector<2x128xf32>
    %463 = arith.negf %462 : vector<2x128xf32>
    %464 = math.exp %463 : vector<2x128xf32>
    %cst_108 = arith.constant 1.000000e+00 : f32
    %465 = vector.broadcast %cst_108 : f32 to vector<2x128xf32>
    %466 = arith.addf %465, %464 : vector<2x128xf32>
    %467 = arith.divf %465, %466 : vector<2x128xf32>
    %468 = arith.mulf %459, %437 : vector<2x128xf32>
    %469 = arith.mulf %453, %461 : vector<2x128xf32>
    %470 = arith.addf %468, %469 : vector<2x128xf32>
    %471 = math.tanh %470 : vector<2x128xf32>
    %472 = arith.mulf %467, %471 : vector<2x128xf32>
    %473 = vector.extract_strided_slice %472 {offsets = [0, 0], sizes = [2, 9], strides = [1, 1]} : vector<2x128xf32> to vector<2x9xf32>
    %c0_109 = arith.constant 0 : index
    %c5_110 = arith.constant 5 : index
    %c0_111 = arith.constant 0 : index
    %474 = vector.load %arg9[%c0_109, %c5_110, %c0_111] : memref<2x8x9xf32, #tpu.memory_space<vmem>>, vector<2x1x9xf32>
    %475 = vector.shape_cast %474 : vector<2x1x9xf32> to vector<2x9xf32>
    %476 = vector.shape_cast %473 : vector<2x9xf32> to vector<2x1x9xf32>
    tpu.vector_store %arg9[%c0_109, %c5_110, %c0_111], %476 {strides = array<i32>} : memref<2x8x9xf32, #tpu.memory_space<vmem>>, vector<2x1x9xf32>,
    %477 = vector.extract_strided_slice %276 {offsets = [0, 6, 0], sizes = [2, 1, 512], strides = [1, 1, 1]} : vector<2x8x512xf32> to vector<2x1x512xf32>
    %478 = vector.shape_cast %477 : vector<2x1x512xf32> to vector<2x512xf32>
    %cst_112 = arith.constant dense<0.000000e+00> : vector<2x512xf32>
    %479 = tpu.matmul %472, %269, %cst_112 {dimension_numbers = #tpu.dot_dimension_numbers<[1], [0], [0], [1], [0, 0, 1, 1], [], []>} : vector<2x128xf32>, vector<128x512xf32>, vector<2x512xf32> -> vector<2x512xf32>
    %480 = arith.addf %478, %479 : vector<2x512xf32>
    %481 = vector.extract_strided_slice %480 {offsets = [0, 0], sizes = [2, 128], strides = [1, 1]} : vector<2x512xf32> to vector<2x128xf32>
    %482 = arith.negf %481 : vector<2x128xf32>
    %483 = math.exp %482 : vector<2x128xf32>
    %cst_113 = arith.constant 1.000000e+00 : f32
    %484 = vector.broadcast %cst_113 : f32 to vector<2x128xf32>
    %485 = arith.addf %484, %483 : vector<2x128xf32>
    %486 = arith.divf %484, %485 : vector<2x128xf32>
    %487 = vector.extract_strided_slice %480 {offsets = [0, 128], sizes = [2, 128], strides = [1, 1]} : vector<2x512xf32> to vector<2x128xf32>
    %488 = arith.negf %487 : vector<2x128xf32>
    %489 = math.exp %488 : vector<2x128xf32>
    %cst_114 = arith.constant 1.000000e+00 : f32
    %490 = vector.broadcast %cst_114 : f32 to vector<2x128xf32>
    %491 = arith.addf %490, %489 : vector<2x128xf32>
    %492 = arith.divf %490, %491 : vector<2x128xf32>
    %493 = vector.extract_strided_slice %480 {offsets = [0, 256], sizes = [2, 128], strides = [1, 1]} : vector<2x512xf32> to vector<2x128xf32>
    %494 = math.tanh %493 : vector<2x128xf32>
    %495 = vector.extract_strided_slice %480 {offsets = [0, 384], sizes = [2, 128], strides = [1, 1]} : vector<2x512xf32> to vector<2x128xf32>
    %496 = arith.negf %495 : vector<2x128xf32>
    %497 = math.exp %496 : vector<2x128xf32>
    %cst_115 = arith.constant 1.000000e+00 : f32
    %498 = vector.broadcast %cst_115 : f32 to vector<2x128xf32>
    %499 = arith.addf %498, %497 : vector<2x128xf32>
    %500 = arith.divf %498, %499 : vector<2x128xf32>
    %501 = arith.mulf %492, %470 : vector<2x128xf32>
    %502 = arith.mulf %486, %494 : vector<2x128xf32>
    %503 = arith.addf %501, %502 : vector<2x128xf32>
    %504 = math.tanh %503 : vector<2x128xf32>
    %505 = arith.mulf %500, %504 : vector<2x128xf32>
    %506 = vector.extract_strided_slice %505 {offsets = [0, 0], sizes = [2, 9], strides = [1, 1]} : vector<2x128xf32> to vector<2x9xf32>
    %c0_116 = arith.constant 0 : index
    %c6_117 = arith.constant 6 : index
    %c0_118 = arith.constant 0 : index
    %507 = vector.load %arg9[%c0_116, %c6_117, %c0_118] : memref<2x8x9xf32, #tpu.memory_space<vmem>>, vector<2x1x9xf32>
    %508 = vector.shape_cast %507 : vector<2x1x9xf32> to vector<2x9xf32>
    %509 = vector.shape_cast %506 : vector<2x9xf32> to vector<2x1x9xf32>
    tpu.vector_store %arg9[%c0_116, %c6_117, %c0_118], %509 {strides = array<i32>} : memref<2x8x9xf32, #tpu.memory_space<vmem>>, vector<2x1x9xf32>,
    %510 = vector.extract_strided_slice %276 {offsets = [0, 7, 0], sizes = [2, 1, 512], strides = [1, 1, 1]} : vector<2x8x512xf32> to vector<2x1x512xf32>
    %511 = vector.shape_cast %510 : vector<2x1x512xf32> to vector<2x512xf32>
    %cst_119 = arith.constant dense<0.000000e+00> : vector<2x512xf32>
    %512 = tpu.matmul %505, %269, %cst_119 {dimension_numbers = #tpu.dot_dimension_numbers<[1], [0], [0], [1], [0, 0, 1, 1], [], []>} : vector<2x128xf32>, vector<128x512xf32>, vector<2x512xf32> -> vector<2x512xf32>
    %513 = arith.addf %511, %512 : vector<2x512xf32>
    %514 = vector.extract_strided_slice %513 {offsets = [0, 0], sizes = [2, 128], strides = [1, 1]} : vector<2x512xf32> to vector<2x128xf32>
    %515 = arith.negf %514 : vector<2x128xf32>
    %516 = math.exp %515 : vector<2x128xf32>
    %cst_120 = arith.constant 1.000000e+00 : f32
    %517 = vector.broadcast %cst_120 : f32 to vector<2x128xf32>
    %518 = arith.addf %517, %516 : vector<2x128xf32>
    %519 = arith.divf %517, %518 : vector<2x128xf32>
    %520 = vector.extract_strided_slice %513 {offsets = [0, 128], sizes = [2, 128], strides = [1, 1]} : vector<2x512xf32> to vector<2x128xf32>
    %521 = arith.negf %520 : vector<2x128xf32>
    %522 = math.exp %521 : vector<2x128xf32>
    %cst_121 = arith.constant 1.000000e+00 : f32
    %523 = vector.broadcast %cst_121 : f32 to vector<2x128xf32>
    %524 = arith.addf %523, %522 : vector<2x128xf32>
    %525 = arith.divf %523, %524 : vector<2x128xf32>
    %526 = vector.extract_strided_slice %513 {offsets = [0, 256], sizes = [2, 128], strides = [1, 1]} : vector<2x512xf32> to vector<2x128xf32>
    %527 = math.tanh %526 : vector<2x128xf32>
    %528 = vector.extract_strided_slice %513 {offsets = [0, 384], sizes = [2, 128], strides = [1, 1]} : vector<2x512xf32> to vector<2x128xf32>
    %529 = arith.negf %528 : vector<2x128xf32>
    %530 = math.exp %529 : vector<2x128xf32>
    %cst_122 = arith.constant 1.000000e+00 : f32
    %531 = vector.broadcast %cst_122 : f32 to vector<2x128xf32>
    %532 = arith.addf %531, %530 : vector<2x128xf32>
    %533 = arith.divf %531, %532 : vector<2x128xf32>
    %534 = arith.mulf %525, %503 : vector<2x128xf32>
    %535 = arith.mulf %519, %527 : vector<2x128xf32>
    %536 = arith.addf %534, %535 : vector<2x128xf32>
    %537 = math.tanh %536 : vector<2x128xf32>
    %538 = arith.mulf %533, %537 : vector<2x128xf32>
    %539 = vector.extract_strided_slice %538 {offsets = [0, 0], sizes = [2, 9], strides = [1, 1]} : vector<2x128xf32> to vector<2x9xf32>
    %c0_123 = arith.constant 0 : index
    %c7_124 = arith.constant 7 : index
    %c0_125 = arith.constant 0 : index
    %540 = vector.load %arg9[%c0_123, %c7_124, %c0_125] : memref<2x8x9xf32, #tpu.memory_space<vmem>>, vector<2x1x9xf32>
    %541 = vector.shape_cast %540 : vector<2x1x9xf32> to vector<2x9xf32>
    %542 = vector.shape_cast %539 : vector<2x9xf32> to vector<2x1x9xf32>
    tpu.vector_store %arg9[%c0_123, %c7_124, %c0_125], %542 {strides = array<i32>} : memref<2x8x9xf32, #tpu.memory_space<vmem>>, vector<2x1x9xf32>,
    %c0_126 = arith.constant 0 : index
    %c0_127 = arith.constant 0 : index
    %c0_128 = arith.constant 0 : index
    %543 = vector.load %arg9[%c0_126, %c0_127, %c0_128] : memref<2x8x9xf32, #tpu.memory_space<vmem>>, vector<2x8x9xf32>
    %cst_129 = arith.constant dense<0xFF800000> : vector<2x8xf32>
    %544 = vector.multi_reduction <maximumf>, %543, %cst_129 [2] : vector<2x8x9xf32> to vector<2x8xf32>
    %545 = vector.shape_cast %544 : vector<2x8xf32> to vector<2x8x1xf32>
    %546 = vector.broadcast %545 : vector<2x8x1xf32> to vector<2x8x9xf32>
    %547 = arith.subf %543, %546 : vector<2x8x9xf32>
    %548 = math.exp %547 : vector<2x8x9xf32>
    %cst_130 = arith.constant dense<0.000000e+00> : vector<2x8xf32>
    %549 = vector.multi_reduction <add>, %548, %cst_130 [2] : vector<2x8x9xf32> to vector<2x8xf32>
    %550 = vector.shape_cast %549 : vector<2x8xf32> to vector<2x8x1xf32>
    %551 = vector.broadcast %550 : vector<2x8x1xf32> to vector<2x8x9xf32>
    %552 = arith.divf %548, %551 : vector<2x8x9xf32>
    "tpu.trace_start"() <{level = 10 : i32, message = "bth,btd->bhd"}> : () -> ()
    %cst_131 = arith.constant dense<0.000000e+00> : vector<2x9x32xf32>
    %553 = tpu.matmul %552, %0, %cst_131 {dimension_numbers = #tpu.dot_dimension_numbers<[1], [1], [2], [2], [0, 0, 0, 2, 1, 2], [0], [0]>} : vector<2x8x9xf32>, vector<2x8x32xf32>, vector<2x9x32xf32> -> vector<2x9x32xf32>
    "tpu.trace_stop"() : () -> ()
    %554 = vector.extract_strided_slice %553 {offsets = [0, 0, 0], sizes = [2, 8, 32], strides = [1, 1, 1]} : vector<2x9x32xf32> to vector<2x8x32xf32>
    %c0_132 = arith.constant 0 : index
    %c0_133 = arith.constant 0 : index
    %555 = vector.load %arg5[%c0_132, %c0_133] : memref<72x32xf32, #tpu.memory_space<vmem>>, vector<32x32xf32>
    %c32_134 = arith.constant 32 : index
    %c0_135 = arith.constant 0 : index
    %556 = vector.load %arg5[%c32_134, %c0_135] : memref<72x32xf32, #tpu.memory_space<vmem>>, vector<1x32xf32>
    %c40 = arith.constant 40 : index
    %c0_136 = arith.constant 0 : index
    %557 = vector.load %arg5[%c40, %c0_136] : memref<72x32xf32, #tpu.memory_space<vmem>>, vector<24x32xf32>
    %c64 = arith.constant 64 : index
    %c0_137 = arith.constant 0 : index
    %558 = vector.load %arg5[%c64, %c0_137] : memref<72x32xf32, #tpu.memory_space<vmem>>, vector<1x32xf32>
    %559 = vector.shape_cast %554 : vector<2x8x32xf32> to vector<16x32xf32>
    %cst_138 = arith.constant dense<0.000000e+00> : vector<16x32xf32>
    %560 = tpu.matmul %559, %555, %cst_138 {dimension_numbers = #tpu.dot_dimension_numbers<[1], [0], [0], [1], [0, 0, 1, 1], [], []>} : vector<16x32xf32>, vector<32x32xf32>, vector<16x32xf32> -> vector<16x32xf32>
    %561 = vector.broadcast %556 : vector<1x32xf32> to vector<16x32xf32>
    %562 = arith.addf %560, %561 : vector<16x32xf32>
    %563 = vector.shape_cast %562 : vector<16x32xf32> to vector<2x8x32xf32>
    %564 = arith.mulf %563, %563 : vector<2x8x32xf32>
    %cst_139 = arith.constant dense<0.000000e+00> : vector<2x8xf32>
    %565 = vector.multi_reduction <add>, %564, %cst_139 [2] : vector<2x8x32xf32> to vector<2x8xf32>
    %566 = vector.shape_cast %565 : vector<2x8xf32> to vector<2x8x1xf32>
    %567 = math.sqrt %566 : vector<2x8x1xf32>
    %cst_140 = arith.constant 9.99999997E-7 : f32
    %568 = vector.broadcast %cst_140 : f32 to vector<2x8x1xf32>
    %569 = arith.maximumf %567, %568 : vector<2x8x1xf32>
    %570 = vector.broadcast %569 : vector<2x8x1xf32> to vector<2x8x32xf32>
    %571 = arith.divf %563, %570 : vector<2x8x32xf32>
    %572 = vector.shape_cast %1 : vector<2x8x24xf32> to vector<16x24xf32>
    %cst_141 = arith.constant dense<0.000000e+00> : vector<16x32xf32>
    %573 = tpu.matmul %572, %557, %cst_141 {dimension_numbers = #tpu.dot_dimension_numbers<[1], [0], [0], [1], [0, 0, 1, 1], [], []>} : vector<16x24xf32>, vector<24x32xf32>, vector<16x32xf32> -> vector<16x32xf32>
    %574 = vector.broadcast %558 : vector<1x32xf32> to vector<16x32xf32>
    %575 = arith.addf %573, %574 : vector<16x32xf32>
    %576 = vector.shape_cast %575 : vector<16x32xf32> to vector<2x8x32xf32>
    %577 = arith.mulf %576, %576 : vector<2x8x32xf32>
    %cst_142 = arith.constant dense<0.000000e+00> : vector<2x8xf32>
    %578 = vector.multi_reduction <add>, %577, %cst_142 [2] : vector<2x8x32xf32> to vector<2x8xf32>
    %579 = vector.shape_cast %578 : vector<2x8xf32> to vector<2x8x1xf32>
    %580 = math.sqrt %579 : vector<2x8x1xf32>
    %cst_143 = arith.constant 9.99999997E-7 : f32
    %581 = vector.broadcast %cst_143 : f32 to vector<2x8x1xf32>
    %582 = arith.maximumf %580, %581 : vector<2x8x1xf32>
    %583 = vector.broadcast %582 : vector<2x8x1xf32> to vector<2x8x32xf32>
    %584 = arith.divf %576, %583 : vector<2x8x32xf32>
    "tpu.trace_start"() <{level = 10 : i32, message = "bts,bos->bto"}> : () -> ()
    %cst_144 = arith.constant dense<0.000000e+00> : vector<2x8x8xf32>
    %585 = tpu.matmul %584, %571, %cst_144 {dimension_numbers = #tpu.dot_dimension_numbers<[2], [2], [1], [1], [0, 0, 0, 1, 1, 1], [0], [0]>} : vector<2x8x32xf32>, vector<2x8x32xf32>, vector<2x8x8xf32> -> vector<2x8x8xf32>
    "tpu.trace_stop"() : () -> ()
    %cst_145 = arith.constant 14.2857141 : f32
    %586 = vector.broadcast %cst_145 : f32 to vector<2x8x8xf32>
    %587 = arith.mulf %586, %585 : vector<2x8x8xf32>
    %cst_146 = arith.constant dense<0xFF800000> : vector<2x8xf32>
    %588 = vector.multi_reduction <maximumf>, %587, %cst_146 [2] : vector<2x8x8xf32> to vector<2x8xf32>
    %589 = vector.shape_cast %588 : vector<2x8xf32> to vector<2x8x1xf32>
    %590 = vector.broadcast %589 : vector<2x8x1xf32> to vector<2x8x8xf32>
    %591 = arith.subf %587, %590 : vector<2x8x8xf32>
    %592 = math.exp %591 : vector<2x8x8xf32>
    %cst_147 = arith.constant dense<0.000000e+00> : vector<2x8xf32>
    %593 = vector.multi_reduction <add>, %592, %cst_147 [2] : vector<2x8x8xf32> to vector<2x8xf32>
    %594 = vector.shape_cast %593 : vector<2x8xf32> to vector<2x8x1xf32>
    %595 = vector.broadcast %594 : vector<2x8x1xf32> to vector<2x8x8xf32>
    %596 = arith.divf %592, %595 : vector<2x8x8xf32>
    %c0_148 = arith.constant 0 : index
    %c0_149 = arith.constant 0 : index
    %597 = vector.load %arg6[%c0_148, %c0_149] : memref<32x8xf32, #tpu.memory_space<vmem>>, vector<8x4xf32>
    %c8 = arith.constant 8 : index
    %c0_150 = arith.constant 0 : index
    %598 = vector.load %arg6[%c8, %c0_150] : memref<32x8xf32, #tpu.memory_space<vmem>>, vector<1x4xf32>
    %c16 = arith.constant 16 : index
    %c0_151 = arith.constant 0 : index
    %599 = vector.load %arg6[%c16, %c0_151] : memref<32x8xf32, #tpu.memory_space<vmem>>, vector<4x8xf32>
    %c24 = arith.constant 24 : index
    %c0_152 = arith.constant 0 : index
    %600 = vector.load %arg6[%c24, %c0_152] : memref<32x8xf32, #tpu.memory_space<vmem>>, vector<1x8xf32>
    %601 = vector.shape_cast %596 : vector<2x8x8xf32> to vector<16x8xf32>
    %cst_153 = arith.constant dense<0.000000e+00> : vector<16x4xf32>
    %602 = tpu.matmul %601, %597, %cst_153 {dimension_numbers = #tpu.dot_dimension_numbers<[1], [0], [0], [1], [0, 0, 1, 1], [], []>} : vector<16x8xf32>, vector<8x4xf32>, vector<16x4xf32> -> vector<16x4xf32>
    %603 = vector.broadcast %598 : vector<1x4xf32> to vector<16x4xf32>
    %604 = arith.addf %602, %603 : vector<16x4xf32>
    %605 = vector.shape_cast %604 : vector<16x4xf32> to vector<2x8x4xf32>
    %cst_154 = arith.constant 0.000000e+00 : f32
    %606 = vector.broadcast %cst_154 : f32 to vector<2x8x4xf32>
    %607 = arith.maximumf %605, %606 : vector<2x8x4xf32>
    %608 = vector.shape_cast %607 : vector<2x8x4xf32> to vector<16x4xf32>
    %cst_155 = arith.constant dense<0.000000e+00> : vector<16x8xf32>
    %609 = tpu.matmul %608, %599, %cst_155 {dimension_numbers = #tpu.dot_dimension_numbers<[1], [0], [0], [1], [0, 0, 1, 1], [], []>} : vector<16x4xf32>, vector<4x8xf32>, vector<16x8xf32> -> vector<16x8xf32>
    %610 = vector.broadcast %600 : vector<1x8xf32> to vector<16x8xf32>
    %611 = arith.addf %609, %610 : vector<16x8xf32>
    %612 = vector.shape_cast %611 : vector<16x8xf32> to vector<2x8x8xf32>
    %613 = arith.negf %612 : vector<2x8x8xf32>
    %614 = math.exp %613 : vector<2x8x8xf32>
    %cst_156 = arith.constant 1.000000e+00 : f32
    %615 = vector.broadcast %cst_156 : f32 to vector<2x8x8xf32>
    %616 = arith.addf %615, %614 : vector<2x8x8xf32>
    %617 = arith.divf %615, %616 : vector<2x8x8xf32>
    "tpu.trace_start"() <{level = 10 : i32, message = "bto,bod->btd"}> : () -> ()
    %cst_157 = arith.constant dense<0.000000e+00> : vector<2x8x32xf32>
    %618 = tpu.matmul %617, %554, %cst_157 {dimension_numbers = #tpu.dot_dimension_numbers<[2], [1], [1], [2], [0, 0, 0, 1, 1, 2], [0], [0]>} : vector<2x8x8xf32>, vector<2x8x32xf32>, vector<2x8x32xf32> -> vector<2x8x32xf32>
    "tpu.trace_stop"() : () -> ()
    %c0_158 = arith.constant 0 : index
    %c0_159 = arith.constant 0 : index
    %c0_160 = arith.constant 0 : index
    %619 = vector.load %arg7[%c0_158, %c0_159, %c0_160] : memref<2x8x32xf32, #tpu.memory_space<vmem>>, vector<2x8x32xf32>
    tpu.vector_store %arg7[%c0_158, %c0_159, %c0_160], %618 {strides = array<i32>} : memref<2x8x32xf32, #tpu.memory_space<vmem>>, vector<2x8x32xf32>,
    return
  }
  func.func @transform_0(%arg0: i32) -> (i32, i32, i32) {
    %c0_i32 = arith.constant 0 : i32
    %c0_i32_0 = arith.constant 0 : i32
    %c0_i32_1 = arith.constant 0 : i32
    return %arg0, %c0_i32, %c0_i32_0 : i32, i32, i32
  }
  func.func @transform_1(%arg0: i32) -> (i32, i32, i32) {
    %c0_i32 = arith.constant 0 : i32
    %c0_i32_0 = arith.constant 0 : i32
    %c0_i32_1 = arith.constant 0 : i32
    return %arg0, %c0_i32, %c0_i32_0 : i32, i32, i32
  }
  func.func @transform_2(%arg0: i32) -> (i32, i32) {
    %c0_i32 = arith.constant 0 : i32
    %c0_i32_0 = arith.constant 0 : i32
    %c0_i32_1 = arith.constant 0 : i32
    return %c0_i32, %c0_i32_0 : i32, i32
  }
  func.func @transform_3(%arg0: i32) -> (i32, i32) {
    %c0_i32 = arith.constant 0 : i32
    %c0_i32_0 = arith.constant 0 : i32
    %c0_i32_1 = arith.constant 0 : i32
    return %c0_i32, %c0_i32_0 : i32, i32
  }
  func.func @transform_4(%arg0: i32) -> (i32, i32) {
    %c0_i32 = arith.constant 0 : i32
    %c0_i32_0 = arith.constant 0 : i32
    %c0_i32_1 = arith.constant 0 : i32
    return %c0_i32, %c0_i32_0 : i32, i32
  }
  func.func @transform_5(%arg0: i32) -> (i32, i32) {
    %c0_i32 = arith.constant 0 : i32
    %c0_i32_0 = arith.constant 0 : i32
    %c0_i32_1 = arith.constant 0 : i32
    return %c0_i32, %c0_i32_0 : i32, i32
  }
  func.func @transform_6(%arg0: i32) -> (i32, i32, i32) {
    %c0_i32 = arith.constant 0 : i32
    %c0_i32_0 = arith.constant 0 : i32
    %c0_i32_1 = arith.constant 0 : i32
    return %arg0, %c0_i32, %c0_i32_0 : i32, i32, i32
  }
}

</mosaic_0001>

<bundles_post_ra>
// kernel: tpu_custom_call.1
= control target key start
LH: loop header
LB: loop body
LE: loop exit
PB: predicated region body
PF: predicated region fallthrough
CT: control target
= control target key end

     0   :  { %11 = vsyncpa [#allocation5], 0  ;;  %s8376_s0 = inlined_call_operand.vmem [shape: f32[2,8,32], index: 0, kind: input, shape index: {}]   ;;  %s8377_s1 = inlined_call_operand.vmem [shape: f32[2,8,24], index: 1, kind: input, shape index: {}]   ;;  %s8378_s2 = inlined_call_operand.hbm [shape: f32[161,512], index: 2, kind: input, shape index: {}]   ;;  %s8379_s3 = inlined_call_operand.hbm [shape: f32[257,512], index: 3, kind: input, shape index: {}]   ;;  %s8380_s4 = inlined_call_operand.vmem [shape: f32[72,32], index: 4, kind: input, shape index: {}]   ;;  %s8381_s5 = inlined_call_operand.vmem [shape: f32[32,8], index: 5, kind: input, shape index: {}]   ;;  %s8382_s6 = inlined_call_operand.hbm [shape: f32[2,8,32], index: 6, kind: output, shape index: {}]  }
   0x1   :  { %12 = vsyncpa [#allocation8], 0 }
   0x2   :  { %13 = vsyncpa [#allocation6], 0  ;;  %s6298_s21 = smov [#allocation4]  }
   0x3   :  { %s23_s22 = sshll.u32 %s6298_s21, 4  ;;  %s24_s22 = int_to_ptr.vmem [resolvable:$true] %s23_s22 }
   0x4   :  { %s6240_s23 = scalar_lea.vmem %s24_s22, 10752  ;;  %p6245_p1 = scmp.lt.s32.totalorder %s24_s22, %s24_s22 }
   0x5   :  { %p6241_p0 = scmp.ne.s32.totalorder %s24_s22, %s6240_s23  ;;  %p6246_p2 = scmp.lt.s32.totalorder %s6240_s23, %s6240_s23 }
   0x7   :  { %p6247_p3 = por %p6246_p2, %p6245_p1 }
   0x9   :  { %p6248_p4 = pnand %p6247_p3, %p6241_p0 }
   0xb   :  { %6251 = shalt.err (!%p6248_p4)
}
   0xc   :  { %s6299_s24 = smov 512   ;;  %s6300_s25 = smov 32  }
   0xd   :  { %29 = dma.hbm_to_vmem [thread:$0]  %s8378_s2, 10752, %s24_s22, [#allocation5], %s6299_s24, %s6299_s24, %s6300_s25  }
   0xe   :  { %s6301_s28 = smov [#allocation7]  }
   0xf   :  { %s35_s29 = sshll.u32 %s6301_s28, 4  ;;  %s36_s29 = int_to_ptr.vmem [resolvable:$true] %s35_s29 }
  0x10   :  { %s6260_s30 = scalar_lea.vmem %s36_s29, 16896  ;;  %p6265_p6 = scmp.lt.s32.totalorder %s36_s29, %s36_s29 }
  0x11   :  { %p6261_p5 = scmp.ne.s32.totalorder %s36_s29, %s6260_s30  ;;  %p6266_p7 = scmp.lt.s32.totalorder %s6260_s30, %s6260_s30 }
  0x13   :  { %p6267_p8 = por %p6266_p7, %p6265_p6 }
  0x15   :  { %p6268_p9 = pnand %p6267_p8, %p6261_p5 }
  0x17   :  { %6271 = shalt.err (!%p6268_p9)
}
  0x18   :  { %41 = dma.hbm_to_vmem [thread:$0]  %s8379_s3, 16896, %s36_s29, [#allocation8], %s6299_s24, %s6299_s24, %s6300_s25  }
  0x19   :  { %6292 = dma.done.wait [#allocation5], 10752  }
  0x1a   :  { %6293 = vsyncadd [#allocation5], 4294956544 }
  0x1b   :  { %6294 = dma.done.wait [#allocation8], 16896  }
  0x1c   :  { %6295 = vsyncadd [#allocation8], 4294950400  ;;  %v8385_v0 = vmov 0.0   ;;  %v69_v1 = vld [vmem:[#allocation4 + $0x68] sm:$0xff]  ;;  %v71_v2 = vld [vmem:[#allocation4 + $0x78] sm:$0xff]  ;;  %vm159_vm0 = vcmask 261120  }
  0x1d   :  { %230 = vmatprep.mubr.f32.mxu0 %v8385_v0  ;;  %307 = vmatprep.mubr.f32.mxu1 %v8385_v0  ;;  %v68_v3 = vld [vmem:[#allocation4 + $0x60] sm:$0xff]  ;;  %v70_v4 = vld [vmem:[#allocation4 + $0x70] sm:$0xff]  ;;  %v65_v5 = vld [vmem:[#allocation4 + $0x48] sm:$0xff]  ;;  %vm539_vm1 = vcmask 1041409   ;;  %vm2676_vm2 = vcmask 65536   ;;  %vm2904_vm3 = vcmask 66561  }
  0x1e   :  { %190 = vmatprep.subr.mxu0 %v69_v1  ;;  %267 = vmatprep.subr.mxu1 %v71_v2  ;;  %v67_v6 = vld [vmem:[#allocation4 + $0x58] sm:$0xff]  ;;  %v64_v7 = vld [vmem:[#allocation4 + $0x40] sm:$0xff]  ;;  %v66_v8 = vld [vmem:[#allocation4 + $0x50] sm:$0xff]  ;;  %vm3136_vm4 = vcmask 67586   ;;  %vm3369_vm5 = vcmask 68611   ;;  %vm3602_vm6 = vcmask 69636  }
  0x1f   :  { %191 = vmatpush1.msra.mxu0 %v68_v3  ;;  %268 = vmatpush1.msra.mxu1 %v70_v4  ;;  %v61_v9 = vld [vmem:[#allocation4 + $0x28] sm:$0xff]  ;;  %v63_v10 = vld [vmem:[#allocation4 + $0x38] sm:$0xff]  ;;  %v60_v11 = vld [vmem:[#allocation4 + $0x20] sm:$0xff]  ;;  %vm3835_vm7 = vcmask 70661   ;;  %vm4068_vm8 = vcmask 71686   ;;  %vm4301_vm9 = vcmask 72711  }
  0x20   :  { %192 = vmatprep.subr.mxu0 %v65_v5  ;;  %269 = vmatprep.subr.mxu1 %v67_v6  ;;  %v62_v12 = vld [vmem:[#allocation4 + $0x30] sm:$0xff]  ;;  %v57_v13 = vld [vmem:[#allocation4 + $0x8] sm:$0xff]  ;;  %v59_v14 = vld [vmem:[#allocation4 + $0x18] sm:$0xff]  ;;  %vm4306_vm10 = vcmask 72704   ;;  %vm4361_vm11 = vcmask 64512   ;;  %vm4680_vm12 = vcmask 195584  }
  0x21   :  { %193 = vmatpush1.msra.mxu0 %v64_v7  ;;  %270 = vmatpush1.msra.mxu1 %v66_v8  ;;  %v56_v15 = vld [vmem:[#allocation4] sm:$0xff]  ;;  %v58_v16 = vld [vmem:[#allocation4 + $0x10] sm:$0xff]  ;;  %v6353_v18 = vld [vmem:[#allocation4 + $0x268] sm:$0xff]  ;;  %vm6303_vm13 = vmmov 0  }
  0x22   :  { %194 = vmatprep.subr.mxu0 %v61_v9  ;;  %271 = vmatprep.subr.mxu1 %v63_v10  ;;  %v52_v17 = vld [vmem:[%s8376_s0] sm:$0xff]  ;;  %8637 = vst [vmem:[#allocation13_spill] sm:$0xff] %v6353_v18  ;;  %v6355_v19 = vld [vmem:[#allocation4 + $0x278] sm:$0xff]  ;;  %v6359_v21 = vld [vmem:[#allocation4 + $0x270] sm:$0xff] }
  0x23   :  { %195 = vmatpush1.msra.mxu0 %v60_v11  ;;  %272 = vmatpush1.msra.mxu1 %v62_v12  ;;  %8638 = vst [vmem:[#allocation14_spill] sm:$0xff] %v6355_v19  ;;  %v6357_v20 = vld [vmem:[#allocation4 + $0x260] sm:$0xff]  ;;  %v6363_v22 = vld [vmem:[#allocation4 + $0x248] sm:$0xff]  ;;  %v6365_v23 = vld [vmem:[#allocation4 + $0x258] sm:$0xff] }
  0x24   :  { %196 = vmatprep.subr.mxu0 %v57_v13  ;;  %273 = vmatprep.subr.mxu1 %v59_v14  ;;  %v6369_v24 = vld [vmem:[#allocation4 + $0x240] sm:$0xff]  ;;  %v6371_v25 = vld [vmem:[#allocation4 + $0x250] sm:$0xff]  ;;  %v6375_v26 = vld [vmem:[#allocation4 + $0x228] sm:$0xff] }
  0x25   :  { %197 = vmatpush1.msra.mxu0 %v56_v15  ;;  %274 = vmatpush1.msra.mxu1 %v58_v16  ;;  %v6377_v27 = vld [vmem:[#allocation4 + $0x238] sm:$0xff]  ;;  %v6381_v28 = vld [vmem:[#allocation4 + $0x220] sm:$0xff]  ;;  %v6383_v29 = vld [vmem:[#allocation4 + $0x230] sm:$0xff] }
  0x26   :  { %5325 = vmatmul.mubr.msk.f32.vlgmr.msra.gmra.mxu0 %vm159_vm0, %v52_v17  ;;  %320 = vmatprep.subr.mxu0 %v6353_v18  ;;  %v6387_v30 = vld [vmem:[#allocation4 + $0x208] sm:$0xff]  ;;  %v6389_v31 = vld [vmem:[#allocation4 + $0x218] sm:$0xff]  ;;  %v6393_v32 = vld [vmem:[#allocation4 + $0x200] sm:$0xff] }
  0x27   :  { %391 = vmatprep.subr.mxu1 %v6355_v19  ;;  %5327 = vmatmul.mubr.msk.f32.vlgmr.msra.gmra.mxu1 %vm159_vm0, %v52_v17  ;;  %v6395_v33 = vld [vmem:[#allocation4 + $0x210] sm:$0xff]  ;;  %v6399_v34 = vld [vmem:[#allocation4 + $0x1e8] sm:$0xff]  ;;  %v6401_v35 = vld [vmem:[#allocation4 + $0x1f8] sm:$0xff] }
  0x28   :  { %321 = vmatpush1.msra.mxu0 %v6357_v20  ;;  %392 = vmatpush1.msra.mxu1 %v6359_v21  ;;  %v6405_v36 = vld [vmem:[#allocation4 + $0x1e0] sm:$0xff]  ;;  %v6407_v37 = vld [vmem:[#allocation4 + $0x1f0] sm:$0xff]  ;;  %v6411_v38 = vld [vmem:[#allocation4 + $0x1c8] sm:$0xff] }
  0x29   :  { %322 = vmatprep.subr.mxu0 %v6363_v22  ;;  %393 = vmatprep.subr.mxu1 %v6365_v23  ;;  %v6413_v39 = vld [vmem:[#allocation4 + $0x1d8] sm:$0xff]  ;;  %v6417_v40 = vld [vmem:[#allocation4 + $0x1c0] sm:$0xff]  ;;  %v6419_v41 = vld [vmem:[#allocation4 + $0x1d0] sm:$0xff] }
  0x2a   :  { %323 = vmatpush1.msra.mxu0 %v6369_v24  ;;  %394 = vmatpush1.msra.mxu1 %v6371_v25  ;;  %v6423_v42 = vld [vmem:[#allocation4 + $0x1a8] sm:$0xff]  ;;  %v6425_v43 = vld [vmem:[#allocation4 + $0x1b8] sm:$0xff]  ;;  %v6429_v44 = vld [vmem:[#allocation4 + $0x1a0] sm:$0xff] }
  0x2b   :  { %324 = vmatprep.subr.mxu0 %v6375_v26  ;;  %395 = vmatprep.subr.mxu1 %v6377_v27  ;;  %v6431_v45 = vld [vmem:[#allocation4 + $0x1b0] sm:$0xff]  ;;  %v6435_v46 = vld [vmem:[#allocation4 + $0x188] sm:$0xff]  ;;  %v6437_v47 = vld [vmem:[#allocation4 + $0x198] sm:$0xff] }
  0x2c   :  { %325 = vmatpush1.msra.mxu0 %v6381_v28  ;;  %396 = vmatpush1.msra.mxu1 %v6383_v29  ;;  %v6441_v48 = vld [vmem:[#allocation4 + $0x180] sm:$0xff]  ;;  %v6443_v49 = vld [vmem:[#allocation4 + $0x190] sm:$0xff]  ;;  %v6447_v50 = vld [vmem:[#allocation4 + $0x168] sm:$0xff] }
  0x2d   :  { %326 = vmatprep.subr.mxu0 %v6387_v30  ;;  %397 = vmatprep.subr.mxu1 %v6389_v31  ;;  %v6449_v51 = vld [vmem:[#allocation4 + $0x178] sm:$0xff]  ;;  %v6453_v52 = vld [vmem:[#allocation4 + $0x160] sm:$0xff]  ;;  %v6455_v53 = vld [vmem:[#allocation4 + $0x170] sm:$0xff] }
  0x2e   :  { %327 = vmatpush1.msra.mxu0 %v6393_v32  ;;  %398 = vmatpush1.msra.mxu1 %v6395_v33  ;;  %v6459_v54 = vld [vmem:[#allocation4 + $0x148] sm:$0xff]  ;;  %v6461_v55 = vld [vmem:[#allocation4 + $0x158] sm:$0xff]  ;;  %v6465_v56 = vld [vmem:[#allocation4 + $0x140] sm:$0xff] }
  0x2f   :  { %328 = vmatprep.subr.mxu0 %v6399_v34  ;;  %399 = vmatprep.subr.mxu1 %v6401_v35  ;;  %v6467_v57 = vld [vmem:[#allocation4 + $0x150] sm:$0xff]  ;;  %v6471_v58 = vld [vmem:[#allocation4 + $0x128] sm:$0xff]  ;;  %v6473_v59 = vld [vmem:[#allocation4 + $0x138] sm:$0xff] }
  0x30   :  { %329 = vmatpush1.msra.mxu0 %v6405_v36  ;;  %400 = vmatpush1.msra.mxu1 %v6407_v37  ;;  %8639 = vst [vmem:[#allocation15_spill] sm:$0xff] %v6473_v59  ;;  %v6477_v60 = vld [vmem:[#allocation4 + $0x120] sm:$0xff]  ;;  %v6479_v61 = vld [vmem:[#allocation4 + $0x130] sm:$0xff]  ;;  %v6483_v62 = vld [vmem:[#allocation4 + $0x108] sm:$0xff] }
  0x31   :  { %330 = vmatprep.subr.mxu0 %v6411_v38  ;;  %401 = vmatprep.subr.mxu1 %v6413_v39  ;;  %8640 = vst [vmem:[#allocation16_spill] sm:$0xff] %v6477_v60  ;;  %8641 = vst [vmem:[#allocation17_spill] sm:$0xff] %v6479_v61  ;;  %v6485_v63 = vld [vmem:[#allocation4 + $0x118] sm:$0xff]  ;;  %v6489_v1 = vld [vmem:[#allocation4 + $0x100] sm:$0xff] }
  0x32   :  { %331 = vmatpush1.msra.mxu0 %v6417_v40  ;;  %402 = vmatpush1.msra.mxu1 %v6419_v41  ;;  %8642 = vst [vmem:[#allocation18_spill] sm:$0xff] %v6483_v62  ;;  %8643 = vst [vmem:[#allocation19_spill] sm:$0xff] %v6485_v63  ;;  %v6491_v2 = vld [vmem:[#allocation4 + $0x110] sm:$0xff]  ;;  %v6495_v3 = vld [vmem:[#allocation4 + $0xe8] sm:$0xff] }
  0x33   :  { %332 = vmatprep.subr.mxu0 %v6423_v42  ;;  %403 = vmatprep.subr.mxu1 %v6425_v43  ;;  %8644 = vst [vmem:[#allocation20_spill] sm:$0xff] %v6489_v1  ;;  %8645 = vst [vmem:[#allocation21_spill] sm:$0xff] %v6491_v2  ;;  %v6497_v4 = vld [vmem:[#allocation4 + $0xf8] sm:$0xff]  ;;  %v6501_v5 = vld [vmem:[#allocation4 + $0xe0] sm:$0xff] }
  0x34   :  { %333 = vmatpush1.msra.mxu0 %v6429_v44  ;;  %404 = vmatpush1.msra.mxu1 %v6431_v45  ;;  %8646 = vst [vmem:[#allocation22_spill] sm:$0xff] %v6495_v3  ;;  %8647 = vst [vmem:[#allocation23_spill] sm:$0xff] %v6497_v4  ;;  %v6505_v6 = vld [vmem:[#allocation4 + $0xf0] sm:$0xff]  ;;  %v53_v7 = vld [vmem:[%s8376_s0 + $0x8] sm:$0xff] }
  0x35   :  { %334 = vmatprep.subr.mxu0 %v6435_v46  ;;  %405 = vmatprep.subr.mxu1 %v6437_v47  ;;  %8648 = vst [vmem:[#allocation24_spill] sm:$0xff] %v6501_v5  ;;  %8649 = vst [vmem:[#allocation25_spill] sm:$0xff] %v6505_v6  ;;  %v6512_v8 = vld [vmem:[#allocation4 + $0xc8] sm:$0xff]  ;;  %v6514_v9 = vld [vmem:[#allocation4 + $0xd8] sm:$0xff] }
  0x36   :  { %335 = vmatpush1.msra.mxu0 %v6441_v48  ;;  %406 = vmatpush1.msra.mxu1 %v6443_v49  ;;  %8650 = vst [vmem:[#allocation26_spill] sm:$0xff] %v6512_v8  ;;  %8651 = vst [vmem:[#allocation27_spill] sm:$0xff] %v6514_v9  ;;  %v6518_v10 = vld [vmem:[#allocation4 + $0xc0] sm:$0xff]  ;;  %v6522_v11 = vld [vmem:[#allocation4 + $0xd0] sm:$0xff] }
  0x37   :  { %336 = vmatprep.subr.mxu0 %v6447_v50  ;;  %407 = vmatprep.subr.mxu1 %v6449_v51  ;;  %8652 = vst [vmem:[#allocation28_spill] sm:$0xff] %v6518_v10  ;;  %8653 = vst [vmem:[#allocation29_spill] sm:$0xff] %v6522_v11  ;;  %v6524_v12 = vld [vmem:[#allocation4 + $0xa8] sm:$0xff]  ;;  %v6528_v13 = vld [vmem:[#allocation4 + $0xb8] sm:$0xff] }
  0x38   :  { %337 = vmatpush1.msra.mxu0 %v6453_v52  ;;  %408 = vmatpush1.msra.mxu1 %v6455_v53  ;;  %8654 = vst [vmem:[#allocation30_spill] sm:$0xff] %v6524_v12  ;;  %8655 = vst [vmem:[#allocation31_spill] sm:$0xff] %v6528_v13  ;;  %v6532_v14 = vld [vmem:[#allocation4 + $0xa0] sm:$0xff]  ;;  %v6534_v15 = vld [vmem:[#allocation4 + $0xb0] sm:$0xff] }
  0x39   :  { %338 = vmatprep.subr.mxu0 %v6459_v54  ;;  %409 = vmatprep.subr.mxu1 %v6461_v55  ;;  %8656 = vst [vmem:[#allocation32_spill] sm:$0xff] %v6532_v14  ;;  %8657 = vst [vmem:[#allocation33_spill] sm:$0xff] %v6534_v15  ;;  %v6538_v16 = vld [vmem:[#allocation4 + $0x88] sm:$0xff]  ;;  %v6540_v17 = vld [vmem:[#allocation4 + $0x98] sm:$0xff] }
  0x3a   :  { %339 = vmatpush1.msra.mxu0 %v6465_v56  ;;  %410 = vmatpush1.msra.mxu1 %v6467_v57  ;;  %8658 = vst [vmem:[#allocation34_spill] sm:$0xff] %v6538_v16  ;;  %8659 = vst [vmem:[#allocation35_spill] sm:$0xff] %v6540_v17 }
  0x3b   :  { %340 = vmatprep.subr.mxu0 %v6471_v58  ;;  %411 = vmatprep.subr.mxu1 %v6473_v59 }
  0x3c   :  { %341 = vmatpush1.msra.mxu0 %v6477_v60  ;;  %412 = vmatpush1.msra.mxu1 %v6479_v61 }
  0x3d   :  { %342 = vmatprep.subr.mxu0 %v6483_v62  ;;  %413 = vmatprep.subr.mxu1 %v6485_v63 }
  0x3e   :  { %343 = vmatpush1.msra.mxu0 %v6489_v1  ;;  %414 = vmatpush1.msra.mxu1 %v6491_v2 }
  0x3f   :  { %344 = vmatprep.subr.mxu0 %v6495_v3  ;;  %415 = vmatprep.subr.mxu1 %v6497_v4 }
  0x40   :  { %236 = vmatprep.mubr.f32.mxu0 %v8385_v0  ;;  %345 = vmatpush1.msra.mxu0 %v6501_v5 }
  0x41   :  { %416 = vmatpush1.msra.mxu1 %v6505_v6  ;;  %5326 = vmatmul.mubr.msk.f32.gmra.mxu0 %vm159_vm0, %v53_v7 }
  0x42   :  { %346 = vmatprep.subr.mxu0 %v6512_v8  ;;  %417 = vmatprep.subr.mxu1 %v6514_v9  ;;  %v6544_v9 = vld [vmem:[#allocation4 + $0x80] sm:$0xff] }
  0x43   :  { %313 = vmatprep.mubr.f32.mxu1 %v8385_v0  ;;  %347 = vmatpush1.msra.mxu0 %v6518_v10  ;;  %8660 = vst [vmem:[#allocation36_spill] sm:$0xff] %v6544_v9  ;;  %v6548_v0 = vld [vmem:[#allocation4 + $0x90] sm:$0xff] }
  0x44   :  { %418 = vmatpush1.msra.mxu1 %v6522_v11  ;;  %348 = vmatprep.subr.mxu0 %v6524_v12  ;;  %8661 = vst [vmem:[#allocation37_spill] sm:$0xff] %v6548_v0  ;;  %v8662_v12 = vmov 0.0  }
  0x45   :  { %5328 = vmatmul.mubr.msk.f32.gmra.mxu1 %vm159_vm0, %v53_v7  ;;  %419 = vmatprep.subr.mxu1 %v6528_v13  ;;  %v8663_v7 = vld [vmem:[#allocation27_spill] sm:$0xff] }
  0x46   :  { %349 = vmatpush1.msra.mxu0 %v6532_v14  ;;  %420 = vmatpush1.msra.mxu1 %v6534_v15 }
  0x47   :  { %350 = vmatprep.subr.mxu0 %v6538_v16  ;;  %421 = vmatprep.subr.mxu1 %v6540_v17 }
  0x48   :  { %351 = vmatpush1.msra.mxu0 %v6544_v9  ;;  %384 = vmatprep.mubr.f32.mxu0 %v8662_v12 }
  0x49   :  { %422 = vmatpush1.msra.mxu1 %v6548_v0  ;;  %455 = vmatprep.mubr.f32.mxu1 %v8662_v12 }
  0x4a   :  { %385 = vmatmul.mubr.f32.vlgmr.msra.gmra.mxu0 %v8662_v12  ;;  %456 = vmatmul.mubr.f32.vlgmr.msra.gmra.mxu1 %v8662_v12 }
  0x4b   :  { %542 = vmatprep.subr.mxu0 %v6353_v18  ;;  %613 = vmatprep.subr.mxu1 %v6355_v19 }
  0x4c   :  { %543 = vmatpush1.msra.mxu0 %v6357_v20  ;;  %614 = vmatpush1.msra.mxu1 %v6359_v21 }
  0x4d   :  { %544 = vmatprep.subr.mxu0 %v6363_v22  ;;  %615 = vmatprep.subr.mxu1 %v6365_v23 }
  0x4e   :  { %545 = vmatpush1.msra.mxu0 %v6369_v24  ;;  %616 = vmatpush1.msra.mxu1 %v6371_v25 }
  0x4f   :  { %546 = vmatprep.subr.mxu0 %v6375_v26  ;;  %617 = vmatprep.subr.mxu1 %v6377_v27 }
  0x50   :  { %547 = vmatpush1.msra.mxu0 %v6381_v28  ;;  %618 = vmatpush1.msra.mxu1 %v6383_v29 }
  0x51   :  { %548 = vmatprep.subr.mxu0 %v6387_v30  ;;  %619 = vmatprep.subr.mxu1 %v6389_v31 }
  0x52   :  { %549 = vmatpush1.msra.mxu0 %v6393_v32  ;;  %620 = vmatpush1.msra.mxu1 %v6395_v33 }
  0x53   :  { %550 = vmatprep.subr.mxu0 %v6399_v34  ;;  %621 = vmatprep.subr.mxu1 %v6401_v35 }
  0x54   :  { %551 = vmatpush1.msra.mxu0 %v6405_v36  ;;  %622 = vmatpush1.msra.mxu1 %v6407_v37 }
  0x55   :  { %552 = vmatprep.subr.mxu0 %v6411_v38  ;;  %623 = vmatprep.subr.mxu1 %v6413_v39 }
  0x56   :  { %553 = vmatpush1.msra.mxu0 %v6417_v40  ;;  %624 = vmatpush1.msra.mxu1 %v6419_v41 }
  0x57   :  { %554 = vmatprep.subr.mxu0 %v6423_v42  ;;  %625 = vmatprep.subr.mxu1 %v6425_v43 }
  0x58   :  { %555 = vmatpush1.msra.mxu0 %v6429_v44  ;;  %626 = vmatpush1.msra.mxu1 %v6431_v45 }
  0x59   :  { %556 = vmatprep.subr.mxu0 %v6435_v46  ;;  %627 = vmatprep.subr.mxu1 %v6437_v47 }
  0x5a   :  { %557 = vmatpush1.msra.mxu0 %v6441_v48  ;;  %628 = vmatpush1.msra.mxu1 %v6443_v49 }
  0x5b   :  { %558 = vmatprep.subr.mxu0 %v6447_v50  ;;  %629 = vmatprep.subr.mxu1 %v6449_v51 }
  0x5c   :  { %559 = vmatpush1.msra.mxu0 %v6453_v52  ;;  %630 = vmatpush1.msra.mxu1 %v6455_v53 }
  0x5d   :  { %560 = vmatprep.subr.mxu0 %v6459_v54  ;;  %631 = vmatprep.subr.mxu1 %v6461_v55 }
  0x5e   :  { %561 = vmatpush1.msra.mxu0 %v6465_v56  ;;  %632 = vmatpush1.msra.mxu1 %v6467_v57 }
  0x5f   :  { %562 = vmatprep.subr.mxu0 %v6471_v58  ;;  %633 = vmatprep.subr.mxu1 %v6473_v59 }
  0x60   :  { %563 = vmatpush1.msra.mxu0 %v6477_v60  ;;  %634 = vmatpush1.msra.mxu1 %v6479_v61 }
  0x61   :  { %564 = vmatprep.subr.mxu0 %v6483_v62  ;;  %635 = vmatprep.subr.mxu1 %v6485_v63  ;;  %v8664_v63 = vld [vmem:[#allocation30_spill] sm:$0xff] }
  0x62   :  { %565 = vmatpush1.msra.mxu0 %v6489_v1  ;;  %636 = vmatpush1.msra.mxu1 %v6491_v2 }
  0x63   :  { %566 = vmatprep.subr.mxu0 %v6495_v3  ;;  %637 = vmatprep.subr.mxu1 %v6497_v4 }
  0x64   :  { %567 = vmatpush1.msra.mxu0 %v6501_v5  ;;  %638 = vmatpush1.msra.mxu1 %v6505_v6 }
  0x65   :  { %568 = vmatprep.subr.mxu0 %v6512_v8  ;;  %639 = vmatprep.subr.mxu1 %v8663_v7 }
  0x66   :  { %569 = vmatpush1.msra.mxu0 %v6518_v10  ;;  %640 = vmatpush1.msra.mxu1 %v6522_v11 }
  0x67   :  { %570 = vmatprep.subr.mxu0 %v8664_v63  ;;  %641 = vmatprep.subr.mxu1 %v6528_v13  ;;  %v139_v13 = vlaneseq }
  0x68   :  { %571 = vmatpush1.msra.mxu0 %v6532_v14  ;;  %642 = vmatpush1.msra.mxu1 %v6534_v15 }
  0x69   :  { %572 = vmatprep.subr.mxu0 %v6538_v16  ;;  %643 = vmatprep.subr.mxu1 %v6540_v17  ;;  %v6626_v14 = vshrl.u32 %v139_v13, 7  ;;  %v137_v17 = vld [vmem:[#allocation4 + $0x280] ss:$8 sm:$0xf] }
  0x6a   :  { %573 = vmatpush1.msra.mxu0 %v6544_v9  ;;  %606 = vmatprep.mubr.f32.mxu0 %v8662_v12 }
  0x6b   :  { %644 = vmatpush1.msra.mxu1 %v6548_v0  ;;  %677 = vmatprep.mubr.f32.mxu1 %v8662_v12  ;;  %8665 = vst [vmem:[#allocation38_spill] sm:$0xff] %v6626_v14  ;;  %v8428_v16 = vsub.s32 0, %v6626_v14  ;;  %v8433_v9 = vsub.s32 1, %v6626_v14  ;;  %v8440_v1 = vsub.s32 3, %v6626_v14 }
  0x6c   :  { %769 = vmatprep.subr.mxu0 %v6353_v18  ;;  %840 = vmatprep.subr.mxu1 %v6355_v19 }
  0x6d   :  { %v142_v0 = vrot.slane %v137_v17, %v8428_v16  ;;  %v146_v19 = vrot.slane %v137_v17, %v8433_v9 }
  0xe6   :  { %v232_v15 = vpop.f32.mrf.mxu0 }
  0xe7   :  { %v309_v63 = vpop.f32.mrf.mxu1  ;;  %v6634_v13 = vadd.f32 %v232_v15, %v142_v0 }
  0xe8   :  { %v234_v11 = vpop.f32.mrf.mxu0 }
  0xe9   :  { %v311_v10 = vpop.f32.mrf.mxu1  ;;  %8666 = vst [vmem:[#allocation39_spill] sm:$0xff] %v6634_v13  ;;  %v6639_v2 = vadd.f32 %v234_v11, %v146_v19 }
  0xeb   :  { %8668 = vst [vmem:[#allocation41_spill] sm:$0xff] %v6639_v2 }
 0x101   :  { %v238_v7 = vpop.f32.mrf.mxu0 }
 0x102   :  { %v6636_v5 = vadd.f32 %v238_v7, %v142_v0  ;;  %v8441_v0 = vsub.s32 2, %v6626_v14 }
 0x103   :  { %v240_v18 = vpop.f32.mrf.mxu0 }
 0x104   :  { %8667 = vst [vmem:[#allocation40_spill] sm:$0xff] %v6636_v5  ;;  %v6643_v60 = vadd.f32 %v240_v18, %v146_v19  ;;  %v150_v18 = vrot.slane %v137_v17, %v8441_v0 }
 0x105   :  { %v315_v12 = vpop.f32.mrf.mxu1 }
 0x106   :  { %8669 = vst [vmem:[#allocation42_spill] sm:$0xff] %v6643_v60 }
 0x107   :  { %v317_v8 = vpop.f32.mrf.mxu1 }
 0x10a   :  { %v386_v6 = vpop.f32.mrf.mxu0  ;;  %v457_v9 = vpop.f32.mrf.mxu1 }
 0x10b   :  { %v466_v4 = vrot.slane %v386_v6, 1  ;;  %v478_v3 = vadd.f32 %v386_v6, %v6634_v13  ;;  %v154_v6 = vrot.slane %v137_v17, %v8440_v1 }
 0x10c   :  { %v388_v62 = vpop.f32.mrf.mxu0 }
 0x10d   :  { %v482_v16 = vadd.f32 %v466_v4, %v6636_v5  ;;  %v5329_v61 = vmul.f32 -1.442695, %v478_v3  ;;  %v467_v15 = vrot.slane %v388_v62, 1  ;;  %v479_v59 = vadd.f32 %v388_v62, %v6639_v2  ;;  %v459_v3 = vpop.f32.mrf.mxu1 }
 0x10e   :  { %v6652_v19 = vadd.f32 %v317_v8, %v154_v6  ;;  %v469_v62 = vrot.slane %v459_v3, 1  ;;  %v6654_v2 = vadd.f32 %v311_v10, %v154_v6 }
 0x10f   :  { %5550 = vpow2.f32 %v5329_v61  ;;  %v5330_v7 = vmul.f32 -1.442695, %v482_v16  ;;  %v483_v11 = vadd.f32 %v467_v15, %v6643_v60  ;;  %v5331_v13 = vmul.f32 -1.442695, %v479_v59 }
 0x110   :  { %8670 = vst [vmem:[#allocation43_spill] sm:$0xff] %v6652_v19  ;;  %v481_v61 = vadd.f32 %v459_v3, %v6654_v2  ;;  %v6657_v16 = vadd.f32 %v309_v63, %v150_v18  ;;  %v485_v15 = vadd.f32 %v469_v62, %v6652_v19 }
 0x111   :  { %5552 = vpow2.f32 %v5330_v7  ;;  %v5332_v4 = vmul.f32 -1.442695, %v483_v11  ;;  %v6661_v7 = vadd.f32 %v315_v12, %v150_v18  ;;  %v468_v11 = vrot.slane %v457_v9, 1 }
 0x112   :  { %5554 = vpow2.f32 %v5331_v13  ;;  %8671 = vst [vmem:[#allocation44_spill] sm:$0xff] %v6657_v16  ;;  %v480_v59 = vadd.f32 %v457_v9, %v6657_v16  ;;  %v5333_v13 = vmul.f32 -1.442695, %v481_v61  ;;  %v5334_v1 = vmul.f32 -1.442695, %v485_v15 }
 0x113   :  { %5556 = vpow2.f32 %v5332_v4  ;;  %8672 = vst [vmem:[#allocation45_spill] sm:$0xff] %v6661_v7  ;;  %v484_v4 = vadd.f32 %v468_v11, %v6661_v7 }
 0x114   :  { %5558 = vtanh.f32 %v480_v59 }
 0x115   :  { %5560 = vpow2.f32 %v5333_v13 }
 0x116   :  { %5562 = vpow2.f32 %v5334_v1 }
 0x11c   :  { %v5551_v17 = vpop.eup %5550 }
 0x11d   :  { %v492_v8 = vadd.f32 1.0, %v5551_v17 }
 0x11e   :  { %v5553_v0 = vpop.eup %5552 }
 0x11f   :  { %v5555_v10 = vpop.eup %5554  ;;  %v493_v6 = vadd.f32 1.0, %v5553_v0  ;;  %5564 = vrcp.f32 %v492_v8 }
 0x120   :  { %v504_v63 = vadd.f32 1.0, %v5555_v10  ;;  %v5557_v3 = vpop.eup %5556 }
 0x121   :  { %5566 = vrcp.f32 %v493_v6  ;;  %v505_v62 = vadd.f32 1.0, %v5557_v3  ;;  %v5559_v9 = vpop.eup %5558 }
 0x122   :  { %5568 = vrcp.f32 %v504_v63  ;;  %v5561_v12 = vpop.eup %5560 }
 0x123   :  { %5570 = vtanh.f32 %v484_v4  ;;  %v5563_v18 = vpop.eup %5562  ;;  %v518_v13 = vadd.f32 1.0, %v5561_v12 }
 0x124   :  { %5572 = vrcp.f32 %v505_v62  ;;  %v519_v1 = vadd.f32 1.0, %v5563_v18 }
 0x125   :  { %5574 = vrcp.f32 %v518_v13  ;;  %v8676_v13 = vld [vmem:[#allocation18_spill] sm:$0xff] }
 0x12c   :  { %v5565_v61 = vpop.eup %5564 }
 0x12d   :  { %v526_v14 = vmul.f32 %v5565_v61, %v5559_v9  ;;  %v8673_v61 = vld [vmem:[#allocation15_spill] sm:$0xff] }
 0x12e   :  { %v5567_v15 = vpop.eup %5566 }
 0x12f   :  { %v5569_v59 = vpop.eup %5568 }
 0x130   :  { %v5571_v17 = vpop.eup %5570  ;;  %v524_v0 = vmul.f32 0.0, %v5569_v59  ;;  %v8675_v59 = vld [vmem:[#allocation17_spill] sm:$0xff] }
 0x131   :  { %v5573_v11 = vpop.eup %5572  ;;  %v527_v10 = vmul.f32 %v5571_v17, %v5567_v15  ;;  %v8674_v15 = vld [vmem:[#allocation16_spill] sm:$0xff]  ;;  %v8677_v17 = vld [vmem:[#allocation19_spill] sm:$0xff] }
 0x132   :  { %v525_v8 = vmul.f32 0.0, %v5573_v11  ;;  %v6664_v16 = vadd.f32 %v526_v14, %v524_v0  ;;  %v5575_v4 = vpop.eup %5574  ;;  %v8678_v0 = vld [vmem:[#allocation20_spill] sm:$0xff]  ;;  %v8679_v11 = vld [vmem:[#allocation21_spill] sm:$0xff] }
 0x134   :  { %v6666_v6 = vadd.f32 %v527_v10, %v525_v8  ;;  %5576 = vtanh.f32 %v6664_v16  ;;  %v8681_v8 = vld [vmem:[#allocation23_spill] sm:$0xff]  ;;  %v8682_v10 = vld [vmem:[#allocation24_spill] sm:$0xff] }
 0x135   :  { %5578 = vrcp.f32 %v519_v1  ;;  %v8680_v1 = vld [vmem:[#allocation22_spill] sm:$0xff] }
 0x136   :  { %5580 = vtanh.f32 %v6666_v6 }
 0x141   :  { %v5577_v63 = vpop.eup %5576 }
 0x142   :  { %v5579_v3 = vpop.eup %5578  ;;  %v532_v62 = vmul.f32 %v5577_v63, %v5575_v4  ;;  %v8683_v4 = vld [vmem:[#allocation25_spill] sm:$0xff]  ;;  %v8684_v63 = vld [vmem:[#allocation26_spill] sm:$0xff] }
 0x143   :  { %v5581_v12 = vpop.eup %5580 }
 0x144   :  { %v533_v9 = vmul.f32 %v5581_v12, %v5579_v3  ;;  %534 = vst [vmem:[#allocation2] sm:$0x1] %v532_v62  ;;  %v8685_v3 = vld [vmem:[#allocation27_spill] sm:$0xff]  ;;  %v8687_v12 = vld [vmem:[#allocation29_spill] sm:$0xff] }
 0x146   :  { %535 = vst [vmem:[#allocation2 + $0x8] sm:$0x1] %v533_v9  ;;  %v538_v18 = vrot.slane %v533_v9, 7  ;;  %v8688_v9 = vld [vmem:[#allocation30_spill] sm:$0xff] }
 0x148   :  { %v540_v14 = vsel %vm539_vm1, %v538_v18, %v532_v62  ;;  %v8686_v62 = vld [vmem:[#allocation28_spill] sm:$0xff]  ;;  %v8689_v18 = vld [vmem:[#allocation31_spill] sm:$0xff] }
 0x149   :  { %607 = vmatmul.mubr.f32.vlgmr.msra.gmra.mxu0 %v540_v14  ;;  %678 = vmatmul.mubr.f32.vlgmr.msra.gmra.mxu1 %v540_v14  ;;  %v8690_v14 = vld [vmem:[#allocation32_spill] sm:$0xff] }
 0x14a   :  { %770 = vmatpush1.msra.mxu0 %v6357_v20  ;;  %841 = vmatpush1.msra.mxu1 %v6359_v21 }
 0x14b   :  { %771 = vmatprep.subr.mxu0 %v6363_v22  ;;  %842 = vmatprep.subr.mxu1 %v6365_v23 }
 0x14c   :  { %772 = vmatpush1.msra.mxu0 %v6369_v24  ;;  %843 = vmatpush1.msra.mxu1 %v6371_v25 }
 0x14d   :  { %773 = vmatprep.subr.mxu0 %v6375_v26  ;;  %844 = vmatprep.subr.mxu1 %v6377_v27 }
 0x14e   :  { %774 = vmatpush1.msra.mxu0 %v6381_v28  ;;  %845 = vmatpush1.msra.mxu1 %v6383_v29 }
 0x14f   :  { %775 = vmatprep.subr.mxu0 %v6387_v30  ;;  %846 = vmatprep.subr.mxu1 %v6389_v31 }
 0x150   :  { %776 = vmatpush1.msra.mxu0 %v6393_v32  ;;  %847 = vmatpush1.msra.mxu1 %v6395_v33 }
 0x151   :  { %777 = vmatprep.subr.mxu0 %v6399_v34  ;;  %848 = vmatprep.subr.mxu1 %v6401_v35 }
 0x152   :  { %778 = vmatpush1.msra.mxu0 %v6405_v36  ;;  %849 = vmatpush1.msra.mxu1 %v6407_v37 }
 0x153   :  { %779 = vmatprep.subr.mxu0 %v6411_v38  ;;  %850 = vmatprep.subr.mxu1 %v6413_v39 }
 0x154   :  { %780 = vmatpush1.msra.mxu0 %v6417_v40  ;;  %851 = vmatpush1.msra.mxu1 %v6419_v41 }
 0x155   :  { %781 = vmatprep.subr.mxu0 %v6423_v42  ;;  %852 = vmatprep.subr.mxu1 %v6425_v43 }
 0x156   :  { %782 = vmatpush1.msra.mxu0 %v6429_v44  ;;  %853 = vmatpush1.msra.mxu1 %v6431_v45 }
 0x157   :  { %783 = vmatprep.subr.mxu0 %v6435_v46  ;;  %854 = vmatprep.subr.mxu1 %v6437_v47 }
 0x158   :  { %784 = vmatpush1.msra.mxu0 %v6441_v48  ;;  %855 = vmatpush1.msra.mxu1 %v6443_v49 }
 0x159   :  { %785 = vmatprep.subr.mxu0 %v6447_v50  ;;  %856 = vmatprep.subr.mxu1 %v6449_v51 }
 0x15a   :  { %786 = vmatpush1.msra.mxu0 %v6453_v52  ;;  %857 = vmatpush1.msra.mxu1 %v6455_v53 }
 0x15b   :  { %787 = vmatprep.subr.mxu0 %v6459_v54  ;;  %858 = vmatprep.subr.mxu1 %v6461_v55 }
 0x15c   :  { %788 = vmatpush1.msra.mxu0 %v6465_v56  ;;  %859 = vmatpush1.msra.mxu1 %v6467_v57 }
 0x15d   :  { %789 = vmatprep.subr.mxu0 %v6471_v58  ;;  %860 = vmatprep.subr.mxu1 %v8673_v61 }
 0x15e   :  { %790 = vmatpush1.msra.mxu0 %v8674_v15  ;;  %861 = vmatpush1.msra.mxu1 %v8675_v59 }
 0x15f   :  { %791 = vmatprep.subr.mxu0 %v8676_v13  ;;  %862 = vmatprep.subr.mxu1 %v8677_v17 }
 0x160   :  { %792 = vmatpush1.msra.mxu0 %v8678_v0  ;;  %863 = vmatpush1.msra.mxu1 %v8679_v11  ;;  %v8699_v11 = vld [vmem:[#allocation39_spill] sm:$0xff] }
 0x161   :  { %793 = vmatprep.subr.mxu0 %v8680_v1  ;;  %864 = vmatprep.subr.mxu1 %v8681_v8  ;;  %v8691_v1 = vld [vmem:[#allocation33_spill] sm:$0xff]  ;;  %v8692_v8 = vld [vmem:[#allocation34_spill] sm:$0xff] }
 0x162   :  { %794 = vmatpush1.msra.mxu0 %v8682_v10  ;;  %865 = vmatpush1.msra.mxu1 %v8683_v4  ;;  %v8693_v10 = vld [vmem:[#allocation35_spill] sm:$0xff]  ;;  %v8694_v4 = vld [vmem:[#allocation36_spill] sm:$0xff] }
 0x163   :  { %795 = vmatprep.subr.mxu0 %v8684_v63  ;;  %866 = vmatprep.subr.mxu1 %v8685_v3  ;;  %v8695_v63 = vmov 0.0   ;;  %v8696_v3 = vld [vmem:[#allocation37_spill] sm:$0xff] }
 0x164   :  { %796 = vmatpush1.msra.mxu0 %v8686_v62  ;;  %867 = vmatpush1.msra.mxu1 %v8687_v12  ;;  %v8697_v12 = vld [vmem:[#allocation13_spill] sm:$0xff] }
 0x165   :  { %797 = vmatprep.subr.mxu0 %v8688_v9  ;;  %868 = vmatprep.subr.mxu1 %v8689_v18  ;;  %v8698_v9 = vld [vmem:[#allocation14_spill] sm:$0xff] }
 0x166   :  { %798 = vmatpush1.msra.mxu0 %v8690_v14  ;;  %869 = vmatpush1.msra.mxu1 %v8691_v1 }
 0x167   :  { %799 = vmatprep.subr.mxu0 %v8692_v8  ;;  %870 = vmatprep.subr.mxu1 %v8693_v10 }
 0x168   :  { %800 = vmatpush1.msra.mxu0 %v8694_v4  ;;  %833 = vmatprep.mubr.f32.mxu0 %v8695_v63 }
 0x169   :  { %871 = vmatpush1.msra.mxu1 %v8696_v3  ;;  %904 = vmatprep.mubr.f32.mxu1 %v8695_v63  ;;  %v8700_v3 = vld [vmem:[#allocation41_spill] sm:$0xff] }
 0x16a   :  { %1001 = vmatprep.subr.mxu0 %v8697_v12  ;;  %1072 = vmatprep.subr.mxu1 %v8698_v9 }
 0x209   :  { %v608_v18 = vpop.f32.mrf.mxu0  ;;  %v679_v62 = vpop.f32.mrf.mxu1 }
 0x20a   :  { %v688_v14 = vrot.slane %v608_v18, 7  ;;  %v704_v1 = vadd.f32 %v608_v18, %v6636_v5 }
 0x20b   :  { %v610_v8 = vpop.f32.mrf.mxu0  ;;  %v681_v12 = vpop.f32.mrf.mxu1 }
 0x20c   :  { %v700_v10 = vadd.f32 %v688_v14, %v8699_v11  ;;  %v5336_v0 = vmul.f32 -1.442695, %v704_v1  ;;  %v689_v4 = vrot.slane %v610_v8, 7  ;;  %v705_v17 = vadd.f32 %v610_v8, %v6643_v60 }
 0x20d   :  { %v691_v15 = vrot.slane %v681_v12, 7  ;;  %v707_v18 = vadd.f32 %v681_v12, %v6652_v19  ;;  %v706_v1 = vadd.f32 %v679_v62, %v6661_v7  ;;  %v690_v11 = vrot.slane %v679_v62, 7 }
 0x20e   :  { %v5335_v13 = vmul.f32 -1.442695, %v700_v10  ;;  %5582 = vpow2.f32 %v5336_v0  ;;  %v701_v63 = vadd.f32 %v689_v4, %v8700_v3  ;;  %v5338_v59 = vmul.f32 -1.442695, %v705_v17 }
 0x20f   :  { %v703_v5 = vadd.f32 %v691_v15, %v6654_v2  ;;  %v5340_v14 = vmul.f32 -1.442695, %v707_v18 }
 0x210   :  { %5584 = vpow2.f32 %v5335_v13  ;;  %v5337_v9 = vmul.f32 -1.442695, %v701_v63  ;;  %v8701_v63 = vld [vmem:[#allocation44_spill] sm:$0xff] }
 0x211   :  { %5586 = vpow2.f32 %v5338_v59  ;;  %v5339_v8 = vmul.f32 -1.442695, %v703_v5  ;;  %v702_v59 = vadd.f32 %v690_v11, %v8701_v63  ;;  %v748_v11 = vrot.slane %v6664_v16, 7 }
 0x212   :  { %5588 = vpow2.f32 %v5337_v9 }
 0x213   :  { %5590 = vtanh.f32 %v706_v1 }
 0x214   :  { %5592 = vpow2.f32 %v5340_v14  ;;  %v749_v14 = vrot.slane %v6666_v6, 7 }
 0x215   :  { %5594 = vpow2.f32 %v5339_v8 }
 0x21b   :  { %v5583_v10 = vpop.eup %5582 }
 0x21c   :  { %v715_v0 = vadd.f32 1.0, %v5583_v10 }
 0x21d   :  { %v5585_v4 = vpop.eup %5584 }
 0x21e   :  { %v5587_v17 = vpop.eup %5586  ;;  %v714_v13 = vadd.f32 1.0, %v5585_v4  ;;  %5596 = vrcp.f32 %v715_v0 }
 0x21f   :  { %v727_v9 = vadd.f32 1.0, %v5587_v17  ;;  %v5589_v12 = vpop.eup %5588 }
 0x220   :  { %5598 = vrcp.f32 %v714_v13  ;;  %v726_v15 = vadd.f32 1.0, %v5589_v12  ;;  %v5591_v62 = vpop.eup %5590 }
 0x221   :  { %5600 = vrcp.f32 %v727_v9  ;;  %v5593_v5 = vpop.eup %5592 }
 0x222   :  { %5602 = vtanh.f32 %v702_v59  ;;  %v5595_v18 = vpop.eup %5594  ;;  %v741_v4 = vadd.f32 1.0, %v5593_v5 }
 0x223   :  { %5604 = vrcp.f32 %v726_v15  ;;  %v740_v13 = vadd.f32 1.0, %v5595_v18 }
 0x224   :  { %5606 = vrcp.f32 %v741_v4 }
 0x22b   :  { %v5597_v10 = vpop.eup %5596 }
 0x22c   :  { %v755_v8 = vmul.f32 %v5597_v10, %v5591_v62 }
 0x22d   :  { %v5599_v1 = vpop.eup %5598 }
 0x22e   :  { %v5601_v7 = vpop.eup %5600 }
 0x22f   :  { %v5603_v19 = vpop.eup %5602  ;;  %v753_v0 = vmul.f32 %v5601_v7, %v749_v14 }
 0x230   :  { %v5605_v17 = vpop.eup %5604  ;;  %v754_v12 = vmul.f32 %v5603_v19, %v5599_v1 }
 0x231   :  { %v752_v9 = vmul.f32 %v5605_v17, %v748_v11  ;;  %v6747_v59 = vadd.f32 %v755_v8, %v753_v0  ;;  %v5607_v6 = vpop.eup %5606  ;;  %v8729_v17 = vld [vmem:[#allocation43_spill] sm:$0xff] }
 0x233   :  { %v6749_v15 = vadd.f32 %v754_v12, %v752_v9  ;;  %5608 = vtanh.f32 %v6747_v59  ;;  %v8730_v12 = vld [vmem:[#allocation44_spill] sm:$0xff] }
 0x234   :  { %5610 = vrcp.f32 %v740_v13 }
 0x235   :  { %5612 = vtanh.f32 %v6749_v15 }
 0x240   :  { %v5609_v5 = vpop.eup %5608 }
 0x241   :  { %v5611_v63 = vpop.eup %5610  ;;  %v761_v16 = vmul.f32 %v5609_v5, %v5607_v6  ;;  %v8731_v6 = vld [vmem:[#allocation45_spill] sm:$0xff] }
 0x242   :  { %v5613_v62 = vpop.eup %5612 }
 0x243   :  { %v760_v7 = vmul.f32 %v5613_v62, %v5611_v63  ;;  %763 = vst [vmem:[#allocation2 + $0x8] sm:$0x2] %v761_v16 }
 0x245   :  { %762 = vst [vmem:[#allocation2] sm:$0x2] %v760_v7  ;;  %v766_v19 = vrot.slane %v760_v7, 1 }
 0x247   :  { %v767_v18 = vsel %vm539_vm1, %v761_v16, %v766_v19 }
 0x248   :  { %834 = vmatmul.mubr.f32.vlgmr.msra.gmra.mxu0 %v767_v18  ;;  %905 = vmatmul.mubr.f32.vlgmr.msra.gmra.mxu1 %v767_v18 }
 0x249   :  { %1002 = vmatpush1.msra.mxu0 %v6357_v20  ;;  %1073 = vmatpush1.msra.mxu1 %v6359_v21  ;;  %v8702_v20 = vld [vmem:[#allocation16_spill] sm:$0xff]  ;;  %v8703_v21 = vld [vmem:[#allocation17_spill] sm:$0xff] }
 0x24a   :  { %1003 = vmatprep.subr.mxu0 %v6363_v22  ;;  %1074 = vmatprep.subr.mxu1 %v6365_v23  ;;  %v8704_v22 = vld [vmem:[#allocation18_spill] sm:$0xff]  ;;  %v8705_v23 = vld [vmem:[#allocation19_spill] sm:$0xff] }
 0x24b   :  { %1004 = vmatpush1.msra.mxu0 %v6369_v24  ;;  %1075 = vmatpush1.msra.mxu1 %v6371_v25  ;;  %v8706_v24 = vld [vmem:[#allocation20_spill] sm:$0xff]  ;;  %v8707_v25 = vld [vmem:[#allocation21_spill] sm:$0xff] }
 0x24c   :  { %1005 = vmatprep.subr.mxu0 %v6375_v26  ;;  %1076 = vmatprep.subr.mxu1 %v6377_v27  ;;  %v8708_v26 = vld [vmem:[#allocation22_spill] sm:$0xff]  ;;  %v8709_v27 = vld [vmem:[#allocation23_spill] sm:$0xff] }
 0x24d   :  { %1006 = vmatpush1.msra.mxu0 %v6381_v28  ;;  %1077 = vmatpush1.msra.mxu1 %v6383_v29  ;;  %v8710_v28 = vld [vmem:[#allocation24_spill] sm:$0xff]  ;;  %v8711_v29 = vld [vmem:[#allocation25_spill] sm:$0xff] }
 0x24e   :  { %1007 = vmatprep.subr.mxu0 %v6387_v30  ;;  %1078 = vmatprep.subr.mxu1 %v6389_v31  ;;  %v8712_v30 = vld [vmem:[#allocation26_spill] sm:$0xff]  ;;  %v8713_v31 = vld [vmem:[#allocation27_spill] sm:$0xff] }
 0x24f   :  { %1008 = vmatpush1.msra.mxu0 %v6393_v32  ;;  %1079 = vmatpush1.msra.mxu1 %v6395_v33  ;;  %v8714_v32 = vld [vmem:[#allocation28_spill] sm:$0xff]  ;;  %v8715_v33 = vld [vmem:[#allocation29_spill] sm:$0xff] }
 0x250   :  { %1009 = vmatprep.subr.mxu0 %v6399_v34  ;;  %1080 = vmatprep.subr.mxu1 %v6401_v35  ;;  %v8716_v34 = vld [vmem:[#allocation30_spill] sm:$0xff]  ;;  %v8717_v35 = vld [vmem:[#allocation31_spill] sm:$0xff] }
 0x251   :  { %1010 = vmatpush1.msra.mxu0 %v6405_v36  ;;  %1081 = vmatpush1.msra.mxu1 %v6407_v37  ;;  %v8718_v36 = vld [vmem:[#allocation32_spill] sm:$0xff]  ;;  %v8719_v37 = vld [vmem:[#allocation33_spill] sm:$0xff] }
 0x252   :  { %1011 = vmatprep.subr.mxu0 %v6411_v38  ;;  %1082 = vmatprep.subr.mxu1 %v6413_v39  ;;  %v8720_v38 = vld [vmem:[#allocation34_spill] sm:$0xff]  ;;  %v8721_v39 = vld [vmem:[#allocation35_spill] sm:$0xff] }
 0x253   :  { %1012 = vmatpush1.msra.mxu0 %v6417_v40  ;;  %1083 = vmatpush1.msra.mxu1 %v6419_v41  ;;  %v8722_v40 = vld [vmem:[#allocation36_spill] sm:$0xff]  ;;  %v8723_v41 = vmov 0.0  }
 0x254   :  { %1013 = vmatprep.subr.mxu0 %v6423_v42  ;;  %1084 = vmatprep.subr.mxu1 %v6425_v43  ;;  %v8724_v42 = vld [vmem:[#allocation37_spill] sm:$0xff]  ;;  %v6818_v43 = vld [vmem:[#allocation4 + $0x268] sm:$0xff] }
 0x255   :  { %1014 = vmatpush1.msra.mxu0 %v6429_v44  ;;  %1085 = vmatpush1.msra.mxu1 %v6431_v45  ;;  %8725 = vst [vmem:[#allocation15_spill] sm:$0xff] %v6818_v43  ;;  %v6821_v44 = vld [vmem:[#allocation4 + $0x278] sm:$0xff] }
 0x256   :  { %1015 = vmatprep.subr.mxu0 %v6435_v46  ;;  %1086 = vmatprep.subr.mxu1 %v6437_v47  ;;  %8726 = vst [vmem:[#allocation13_spill] sm:$0xff] %v6821_v44 }
 0x257   :  { %1016 = vmatpush1.msra.mxu0 %v6441_v48  ;;  %1087 = vmatpush1.msra.mxu1 %v6443_v49  ;;  %v8727_v49 = vld [vmem:[#allocation39_spill] sm:$0xff] }
 0x258   :  { %1017 = vmatprep.subr.mxu0 %v6447_v50  ;;  %1088 = vmatprep.subr.mxu1 %v6449_v51  ;;  %v8728_v51 = vld [vmem:[#allocation40_spill] sm:$0xff] }
 0x259   :  { %1018 = vmatpush1.msra.mxu0 %v6453_v52  ;;  %1089 = vmatpush1.msra.mxu1 %v6455_v53 }
 0x25a   :  { %1019 = vmatprep.subr.mxu0 %v6459_v54  ;;  %1090 = vmatprep.subr.mxu1 %v6461_v55 }
 0x25b   :  { %1020 = vmatpush1.msra.mxu0 %v6465_v56  ;;  %1091 = vmatpush1.msra.mxu1 %v6467_v57 }
 0x25c   :  { %1021 = vmatprep.subr.mxu0 %v6471_v58  ;;  %1092 = vmatprep.subr.mxu1 %v8673_v61 }
 0x25d   :  { %1022 = vmatpush1.msra.mxu0 %v8702_v20  ;;  %1093 = vmatpush1.msra.mxu1 %v8703_v21 }
 0x25e   :  { %1023 = vmatprep.subr.mxu0 %v8704_v22  ;;  %1094 = vmatprep.subr.mxu1 %v8705_v23 }
 0x25f   :  { %1024 = vmatpush1.msra.mxu0 %v8706_v24  ;;  %1095 = vmatpush1.msra.mxu1 %v8707_v25 }
 0x260   :  { %1025 = vmatprep.subr.mxu0 %v8708_v26  ;;  %1096 = vmatprep.subr.mxu1 %v8709_v27 }
 0x261   :  { %1026 = vmatpush1.msra.mxu0 %v8710_v28  ;;  %1097 = vmatpush1.msra.mxu1 %v8711_v29 }
 0x262   :  { %1027 = vmatprep.subr.mxu0 %v8712_v30  ;;  %1098 = vmatprep.subr.mxu1 %v8713_v31  ;;  %v979_v31 = vrot.slane %v6749_v15, 7 }
 0x263   :  { %1028 = vmatpush1.msra.mxu0 %v8714_v32  ;;  %1099 = vmatpush1.msra.mxu1 %v8715_v33 }
 0x264   :  { %1029 = vmatprep.subr.mxu0 %v8716_v34  ;;  %1100 = vmatprep.subr.mxu1 %v8717_v35  ;;  %v980_v34 = vrot.slane %v6747_v59, 7 }
 0x265   :  { %1030 = vmatpush1.msra.mxu0 %v8718_v36  ;;  %1101 = vmatpush1.msra.mxu1 %v8719_v37 }
 0x266   :  { %1031 = vmatprep.subr.mxu0 %v8720_v38  ;;  %1102 = vmatprep.subr.mxu1 %v8721_v39 }
 0x267   :  { %1032 = vmatpush1.msra.mxu0 %v8722_v40  ;;  %1065 = vmatprep.mubr.f32.mxu0 %v8723_v41 }
 0x268   :  { %1103 = vmatpush1.msra.mxu1 %v8724_v42  ;;  %1136 = vmatprep.mubr.f32.mxu1 %v8723_v41 }
 0x269   :  { %1233 = vmatprep.subr.mxu0 %v6818_v43  ;;  %1304 = vmatprep.subr.mxu1 %v6821_v44 }
 0x308   :  { %v835_v45 = vpop.f32.mrf.mxu0  ;;  %v906_v53 = vpop.f32.mrf.mxu1 }
 0x309   :  { %v915_v46 = vrot.slane %v835_v45, 6  ;;  %v919_v47 = vrot.slane %v835_v45, 7  ;;  %v917_v11 = vrot.slane %v906_v53, 6  ;;  %v921_v8 = vrot.slane %v906_v53, 7 }
 0x30a   :  { %v837_v48 = vpop.f32.mrf.mxu0  ;;  %v908_v63 = vpop.f32.mrf.mxu1 }
 0x30b   :  { %v931_v50 = vadd.f32 %v915_v46, %v8727_v49  ;;  %v935_v52 = vadd.f32 %v919_v47, %v8728_v51  ;;  %v916_v54 = vrot.slane %v837_v48, 6  ;;  %v920_v55 = vrot.slane %v837_v48, 7 }
 0x30c   :  { %v918_v14 = vrot.slane %v908_v63, 6  ;;  %v922_v4 = vrot.slane %v908_v63, 7  ;;  %v933_v9 = vadd.f32 %v917_v11, %v8730_v12  ;;  %v937_v5 = vadd.f32 %v921_v8, %v8731_v6  ;;  %v6856_v63 = vld [vmem:[#allocation4 + $0x250] sm:$0xff]  ;;  %v6871_v11 = vld [vmem:[#allocation4 + $0x208] sm:$0xff]  ;;  %v6874_v8 = vld [vmem:[#allocation4 + $0x218] sm:$0xff] }
 0x30d   :  { %v5341_v56 = vmul.f32 -1.442695, %v931_v50  ;;  %v5342_v57 = vmul.f32 -1.442695, %v935_v52  ;;  %v932_v58 = vadd.f32 %v916_v54, %v8700_v3  ;;  %v936_v61 = vadd.f32 %v920_v55, %v6643_v60  ;;  %v6841_v55 = vld [vmem:[#allocation4 + $0x260] sm:$0xff] }
 0x30e   :  { %v934_v0 = vadd.f32 %v918_v14, %v6654_v2  ;;  %v938_v13 = vadd.f32 %v922_v4, %v8729_v17  ;;  %v6865_v14 = vld [vmem:[#allocation4 + $0x220] sm:$0xff]  ;;  %v6868_v4 = vld [vmem:[#allocation4 + $0x230] sm:$0xff] }
 0x30f   :  { %5614 = vpow2.f32 %v5341_v56  ;;  %v5343_v10 = vmul.f32 -1.442695, %v932_v58  ;;  %v5344_v1 = vmul.f32 -1.442695, %v936_v61  ;;  %v6844_v56 = vld [vmem:[#allocation4 + $0x270] sm:$0xff]  ;;  %v6850_v58 = vld [vmem:[#allocation4 + $0x258] sm:$0xff] }
 0x310   :  { %5616 = vpow2.f32 %v5342_v57  ;;  %v5345_v16 = vmul.f32 -1.442695, %v934_v0  ;;  %v5346_v62 = vmul.f32 -1.442695, %v938_v13  ;;  %v6847_v57 = vld [vmem:[#allocation4 + $0x248] sm:$0xff]  ;;  %v6853_v61 = vld [vmem:[#allocation4 + $0x240] sm:$0xff] }
 0x311   :  { %5618 = vpow2.f32 %v5343_v10  ;;  %v6859_v10 = vld [vmem:[#allocation4 + $0x228] sm:$0xff]  ;;  %v6877_v0 = vld [vmem:[#allocation4 + $0x200] sm:$0xff]  ;;  %v6880_v13 = vld [vmem:[#allocation4 + $0x210] sm:$0xff] }
 0x312   :  { %5620 = vpow2.f32 %v5344_v1  ;;  %v6862_v1 = vld [vmem:[#allocation4 + $0x238] sm:$0xff] }
 0x313   :  { %5622 = vtanh.f32 %v933_v9  ;;  %v6883_v9 = vld [vmem:[#allocation4 + $0x1e8] sm:$0xff] }
 0x314   :  { %5624 = vtanh.f32 %v937_v5  ;;  %v6886_v5 = vld [vmem:[#allocation4 + $0x1f8] sm:$0xff] }
 0x315   :  { %5626 = vpow2.f32 %v5345_v16  ;;  %v6889_v16 = vld [vmem:[#allocation4 + $0x1e0] sm:$0xff] }
 0x316   :  { %5628 = vpow2.f32 %v5346_v62  ;;  %v6892_v62 = vld [vmem:[#allocation4 + $0x1f0] sm:$0xff] }
 0x31c   :  { %v5615_v7 = vpop.eup %5614 }
 0x31d   :  { %v5617_v19 = vpop.eup %5616  ;;  %v945_v18 = vadd.f32 1.0, %v5615_v7  ;;  %v6895_v7 = vld [vmem:[#allocation4 + $0x1c8] sm:$0xff] }
 0x31e   :  { %v946_v20 = vadd.f32 1.0, %v5617_v19  ;;  %v5619_v21 = vpop.eup %5618  ;;  %v6898_v19 = vld [vmem:[#allocation4 + $0x1d8] sm:$0xff] }
 0x31f   :  { %v5621_v22 = vpop.eup %5620  ;;  %5630 = vrcp.f32 %v945_v18  ;;  %v957_v23 = vadd.f32 1.0, %v5619_v21  ;;  %v6901_v18 = vld [vmem:[#allocation4 + $0x1c0] sm:$0xff]  ;;  %v6907_v21 = vld [vmem:[#allocation4 + $0x1a8] sm:$0xff] }
 0x320   :  { %5632 = vrcp.f32 %v946_v20  ;;  %v958_v24 = vadd.f32 1.0, %v5621_v22  ;;  %v5623_v25 = vpop.eup %5622  ;;  %v6904_v20 = vld [vmem:[#allocation4 + $0x1d0] sm:$0xff]  ;;  %v6910_v22 = vld [vmem:[#allocation4 + $0x1b8] sm:$0xff] }
 0x321   :  { %5634 = vrcp.f32 %v957_v23  ;;  %v5625_v26 = vpop.eup %5624  ;;  %v6913_v23 = vld [vmem:[#allocation4 + $0x1a0] sm:$0xff] }
 0x322   :  { %5636 = vrcp.f32 %v958_v24  ;;  %v5627_v27 = vpop.eup %5626  ;;  %v6916_v24 = vld [vmem:[#allocation4 + $0x1b0] sm:$0xff] }
 0x323   :  { %v5629_v28 = vpop.eup %5628  ;;  %v971_v32 = vadd.f32 1.0, %v5627_v27  ;;  %v6925_v27 = vld [vmem:[#allocation4 + $0x180] sm:$0xff] }
 0x324   :  { %v972_v35 = vadd.f32 1.0, %v5629_v28  ;;  %v6928_v28 = vld [vmem:[#allocation4 + $0x190] sm:$0xff] }
 0x325   :  { %5638 = vrcp.f32 %v971_v32  ;;  %v6940_v32 = vld [vmem:[#allocation4 + $0x170] sm:$0xff] }
 0x326   :  { %5640 = vrcp.f32 %v972_v35  ;;  %v6949_v35 = vld [vmem:[#allocation4 + $0x140] sm:$0xff] }
 0x32c   :  { %v5631_v29 = vpop.eup %5630 }
 0x32d   :  { %v5633_v30 = vpop.eup %5632  ;;  %v985_v37 = vmul.f32 %v5631_v29, %v5623_v25  ;;  %v6919_v25 = vld [vmem:[#allocation4 + $0x188] sm:$0xff] }
 0x32e   :  { %v5635_v33 = vpop.eup %5634  ;;  %v986_v39 = vmul.f32 %v5633_v30, %v5625_v26  ;;  %v6922_v26 = vld [vmem:[#allocation4 + $0x198] sm:$0xff]  ;;  %v6931_v29 = vld [vmem:[#allocation4 + $0x168] sm:$0xff] }
 0x32f   :  { %v5637_v36 = vpop.eup %5636  ;;  %v983_v38 = vmul.f32 %v5635_v33, %v979_v31  ;;  %v6934_v30 = vld [vmem:[#allocation4 + $0x178] sm:$0xff]  ;;  %v6937_v31 = vld [vmem:[#allocation4 + $0x160] sm:$0xff]  ;;  %v6943_v33 = vld [vmem:[#allocation4 + $0x148] sm:$0xff] }
 0x330   :  { %v984_v40 = vmul.f32 %v5637_v36, %v980_v34  ;;  %v6946_v34 = vld [vmem:[#allocation4 + $0x158] sm:$0xff]  ;;  %v6952_v36 = vld [vmem:[#allocation4 + $0x150] sm:$0xff] }
 0x331   :  { %v6834_v42 = vadd.f32 %v985_v37, %v983_v38  ;;  %v6955_v37 = vld [vmem:[#allocation4 + $0x128] sm:$0xff]  ;;  %v6958_v38 = vld [vmem:[#allocation4 + $0x138] sm:$0xff] }
 0x332   :  { %v6836_v45 = vadd.f32 %v986_v39, %v984_v40  ;;  %v5639_v15 = vpop.eup %5638  ;;  %8732 = vst [vmem:[#allocation14_spill] sm:$0xff] %v6955_v37  ;;  %8733 = vst [vmem:[#allocation16_spill] sm:$0xff] %v6958_v38  ;;  %v6961_v39 = vld [vmem:[#allocation4 + $0x120] sm:$0xff]  ;;  %v6964_v40 = vld [vmem:[#allocation4 + $0x130] sm:$0xff] }
 0x333   :  { %5642 = vtanh.f32 %v6834_v42  ;;  %v5641_v46 = vpop.eup %5640  ;;  %8734 = vst [vmem:[#allocation17_spill] sm:$0xff] %v6961_v39  ;;  %8735 = vst [vmem:[#allocation18_spill] sm:$0xff] %v6964_v40 }
 0x334   :  { %5644 = vtanh.f32 %v6836_v45 }
 0x340   :  { %v5643_v47 = vpop.eup %5642 }
 0x341   :  { %v5645_v59 = vpop.eup %5644  ;;  %v991_v48 = vmul.f32 %v5643_v47, %v5639_v15  ;;  %v6967_v15 = vld [vmem:[#allocation4 + $0x108] sm:$0xff]  ;;  %v6973_v47 = vld [vmem:[#allocation4 + $0x100] sm:$0xff] }
 0x342   :  { %v992_v50 = vmul.f32 %v5645_v59, %v5641_v46  ;;  %8736 = vst [vmem:[#allocation19_spill] sm:$0xff] %v6967_v15  ;;  %v6970_v46 = vld [vmem:[#allocation4 + $0x118] sm:$0xff]  ;;  %8738 = vst [vmem:[#allocation21_spill] sm:$0xff] %v6973_v47  ;;  %v6976_v59 = vld [vmem:[#allocation4 + $0x110] sm:$0xff] }
 0x343   :  { %993 = vst [vmem:[#allocation2] sm:$0x4] %v991_v48  ;;  %v997_v52 = vrot.slane %v991_v48, 2  ;;  %8737 = vst [vmem:[#allocation20_spill] sm:$0xff] %v6970_v46  ;;  %v6979_v48 = vld [vmem:[#allocation4 + $0xe8] sm:$0xff] }
 0x344   :  { %994 = vst [vmem:[#allocation2 + $0x8] sm:$0x4] %v992_v50  ;;  %v998_v53 = vrot.slane %v992_v50, 1  ;;  %8739 = vst [vmem:[#allocation22_spill] sm:$0xff] %v6976_v59  ;;  %v6982_v50 = vld [vmem:[#allocation4 + $0xf8] sm:$0xff] }
 0x345   :  { %8740 = vst [vmem:[#allocation23_spill] sm:$0xff] %v6979_v48  ;;  %8741 = vst [vmem:[#allocation24_spill] sm:$0xff] %v6982_v50 }
 0x346   :  { %v999_v54 = vsel %vm539_vm1, %v998_v53, %v997_v52  ;;  %v6985_v52 = vld [vmem:[#allocation4 + $0xe0] sm:$0xff]  ;;  %v6988_v53 = vld [vmem:[#allocation4 + $0xf0] sm:$0xff] }
 0x347   :  { %1066 = vmatmul.mubr.f32.vlgmr.msra.gmra.mxu0 %v999_v54  ;;  %1137 = vmatmul.mubr.f32.vlgmr.msra.gmra.mxu1 %v999_v54  ;;  %8742 = vst [vmem:[#allocation25_spill] sm:$0xff] %v6985_v52  ;;  %8743 = vst [vmem:[#allocation26_spill] sm:$0xff] %v6988_v53  ;;  %v6991_v54 = vld [vmem:[#allocation4 + $0xc8] sm:$0xff] }
 0x348   :  { %1234 = vmatpush1.msra.mxu0 %v6841_v55  ;;  %1305 = vmatpush1.msra.mxu1 %v6844_v56  ;;  %8744 = vst [vmem:[#allocation27_spill] sm:$0xff] %v6991_v54 }
 0x349   :  { %1235 = vmatprep.subr.mxu0 %v6847_v57  ;;  %1306 = vmatprep.subr.mxu1 %v6850_v58 }
 0x34a   :  { %1236 = vmatpush1.msra.mxu0 %v6853_v61  ;;  %1307 = vmatpush1.msra.mxu1 %v6856_v63 }
 0x34b   :  { %1237 = vmatprep.subr.mxu0 %v6859_v10  ;;  %1308 = vmatprep.subr.mxu1 %v6862_v1 }
 0x34c   :  { %1238 = vmatpush1.msra.mxu0 %v6865_v14  ;;  %1309 = vmatpush1.msra.mxu1 %v6868_v4 }
 0x34d   :  { %1239 = vmatprep.subr.mxu0 %v6871_v11  ;;  %1310 = vmatprep.subr.mxu1 %v6874_v8 }
 0x34e   :  { %1240 = vmatpush1.msra.mxu0 %v6877_v0  ;;  %1311 = vmatpush1.msra.mxu1 %v6880_v13 }
 0x34f   :  { %1241 = vmatprep.subr.mxu0 %v6883_v9  ;;  %1312 = vmatprep.subr.mxu1 %v6886_v5 }
 0x350   :  { %1242 = vmatpush1.msra.mxu0 %v6889_v16  ;;  %1313 = vmatpush1.msra.mxu1 %v6892_v62 }
 0x351   :  { %1243 = vmatprep.subr.mxu0 %v6895_v7  ;;  %1314 = vmatprep.subr.mxu1 %v6898_v19 }
 0x352   :  { %1244 = vmatpush1.msra.mxu0 %v6901_v18  ;;  %1315 = vmatpush1.msra.mxu1 %v6904_v20 }
 0x353   :  { %1245 = vmatprep.subr.mxu0 %v6907_v21  ;;  %1316 = vmatprep.subr.mxu1 %v6910_v22 }
 0x354   :  { %1246 = vmatpush1.msra.mxu0 %v6913_v23  ;;  %1317 = vmatpush1.msra.mxu1 %v6916_v24 }
 0x355   :  { %1247 = vmatprep.subr.mxu0 %v6919_v25  ;;  %1318 = vmatprep.subr.mxu1 %v6922_v26 }
 0x356   :  { %1248 = vmatpush1.msra.mxu0 %v6925_v27  ;;  %1319 = vmatpush1.msra.mxu1 %v6928_v28 }
 0x357   :  { %1249 = vmatprep.subr.mxu0 %v6931_v29  ;;  %1320 = vmatprep.subr.mxu1 %v6934_v30 }
 0x358   :  { %1250 = vmatpush1.msra.mxu0 %v6937_v31  ;;  %1321 = vmatpush1.msra.mxu1 %v6940_v32 }
 0x359   :  { %1251 = vmatprep.subr.mxu0 %v6943_v33  ;;  %1322 = vmatprep.subr.mxu1 %v6946_v34 }
 0x35a   :  { %1252 = vmatpush1.msra.mxu0 %v6949_v35  ;;  %1323 = vmatpush1.msra.mxu1 %v6952_v36 }
 0x35b   :  { %1253 = vmatprep.subr.mxu0 %v6955_v37  ;;  %1324 = vmatprep.subr.mxu1 %v6958_v38 }
 0x35c   :  { %1254 = vmatpush1.msra.mxu0 %v6961_v39  ;;  %1325 = vmatpush1.msra.mxu1 %v6964_v40 }
 0x35d   :  { %1255 = vmatprep.subr.mxu0 %v6967_v15  ;;  %1326 = vmatprep.subr.mxu1 %v6970_v46 }
 0x35e   :  { %1256 = vmatpush1.msra.mxu0 %v6973_v47  ;;  %1327 = vmatpush1.msra.mxu1 %v6976_v59  ;;  %v6994_v59 = vld [vmem:[#allocation4 + $0xd8] sm:$0xff] }
 0x35f   :  { %1257 = vmatprep.subr.mxu0 %v6979_v48  ;;  %1328 = vmatprep.subr.mxu1 %v6982_v50  ;;  %8745 = vst [vmem:[#allocation28_spill] sm:$0xff] %v6994_v59  ;;  %v6997_v48 = vld [vmem:[#allocation4 + $0xc0] sm:$0xff]  ;;  %v7000_v50 = vld [vmem:[#allocation4 + $0xd0] sm:$0xff] }
 0x360   :  { %1258 = vmatpush1.msra.mxu0 %v6985_v52  ;;  %1329 = vmatpush1.msra.mxu1 %v6988_v53  ;;  %8746 = vst [vmem:[#allocation29_spill] sm:$0xff] %v6997_v48  ;;  %8747 = vst [vmem:[#allocation30_spill] sm:$0xff] %v7000_v50  ;;  %v7003_v52 = vld [vmem:[#allocation4 + $0xa8] sm:$0xff]  ;;  %v7006_v53 = vld [vmem:[#allocation4 + $0xb8] sm:$0xff] }
 0x361   :  { %1259 = vmatprep.subr.mxu0 %v6991_v54  ;;  %1330 = vmatprep.subr.mxu1 %v6994_v59  ;;  %8748 = vst [vmem:[#allocation31_spill] sm:$0xff] %v7003_v52  ;;  %8749 = vst [vmem:[#allocation32_spill] sm:$0xff] %v7006_v53  ;;  %v7009_v54 = vld [vmem:[#allocation4 + $0xa0] sm:$0xff]  ;;  %v7012_v59 = vld [vmem:[#allocation4 + $0xb0] sm:$0xff] }
 0x362   :  { %1260 = vmatpush1.msra.mxu0 %v6997_v48  ;;  %1331 = vmatpush1.msra.mxu1 %v7000_v50  ;;  %8750 = vst [vmem:[#allocation33_spill] sm:$0xff] %v7009_v54  ;;  %8751 = vst [vmem:[#allocation34_spill] sm:$0xff] %v7012_v59  ;;  %v7015_v48 = vld [vmem:[#allocation4 + $0x88] sm:$0xff]  ;;  %v7018_v50 = vld [vmem:[#allocation4 + $0x98] sm:$0xff] }
 0x363   :  { %1261 = vmatprep.subr.mxu0 %v7003_v52  ;;  %1332 = vmatprep.subr.mxu1 %v7006_v53  ;;  %8752 = vst [vmem:[#allocation35_spill] sm:$0xff] %v7015_v48  ;;  %8753 = vst [vmem:[#allocation36_spill] sm:$0xff] %v7018_v50  ;;  %v7021_v52 = vld [vmem:[#allocation4 + $0x80] sm:$0xff]  ;;  %v7025_v53 = vld [vmem:[#allocation4 + $0x90] sm:$0xff] }
 0x364   :  { %1262 = vmatpush1.msra.mxu0 %v7009_v54  ;;  %1333 = vmatpush1.msra.mxu1 %v7012_v59  ;;  %8754 = vst [vmem:[#allocation37_spill] sm:$0xff] %v7021_v52  ;;  %8755 = vst [vmem:[#allocation43_spill] sm:$0xff] %v7025_v53 }
 0x365   :  { %1263 = vmatprep.subr.mxu0 %v7015_v48  ;;  %1334 = vmatprep.subr.mxu1 %v7018_v50 }
 0x366   :  { %1264 = vmatpush1.msra.mxu0 %v7021_v52  ;;  %1297 = vmatprep.mubr.f32.mxu0 %v8723_v41 }
 0x367   :  { %1335 = vmatpush1.msra.mxu1 %v7025_v53  ;;  %1368 = vmatprep.mubr.f32.mxu1 %v8723_v41 }
 0x368   :  { %1465 = vmatprep.subr.mxu0 %v6818_v43  ;;  %1536 = vmatprep.subr.mxu1 %v6821_v44 }
 0x407   :  { %v1067_v48 = vpop.f32.mrf.mxu0  ;;  %v1138_v46 = vpop.f32.mrf.mxu1 }
 0x408   :  { %v1147_v59 = vrot.slane %v1067_v48, 5  ;;  %v1151_v54 = vrot.slane %v1067_v48, 6 }
 0x409   :  { %v1069_v50 = vpop.f32.mrf.mxu0  ;;  %v1140_v43 = vpop.f32.mrf.mxu1 }
 0x40a   :  { %v1163_v47 = vadd.f32 %v1147_v59, %v8727_v49  ;;  %v1167_v52 = vadd.f32 %v1151_v54, %v8728_v51  ;;  %v1148_v15 = vrot.slane %v1069_v50, 5  ;;  %v1152_v40 = vrot.slane %v1069_v50, 6 }
 0x40b   :  { %v1150_v48 = vrot.slane %v1140_v43, 5  ;;  %v1154_v59 = vrot.slane %v1140_v43, 6  ;;  %v1149_v49 = vrot.slane %v1138_v46, 5  ;;  %v1153_v54 = vrot.slane %v1138_v46, 6 }
 0x40c   :  { %v5347_v39 = vmul.f32 -1.442695, %v1163_v47  ;;  %v5348_v38 = vmul.f32 -1.442695, %v1167_v52  ;;  %v1164_v53 = vadd.f32 %v1148_v15, %v8700_v3  ;;  %v1168_v41 = vadd.f32 %v1152_v40, %v6643_v60 }
 0x40d   :  { %v1166_v51 = vadd.f32 %v1150_v48, %v6654_v2  ;;  %v1170_v47 = vadd.f32 %v1154_v59, %v8729_v17  ;;  %v1165_v50 = vadd.f32 %v1149_v49, %v8730_v12  ;;  %v1169_v15 = vadd.f32 %v1153_v54, %v8731_v6 }
 0x40e   :  { %5646 = vpow2.f32 %v5347_v39  ;;  %v5349_v44 = vmul.f32 -1.442695, %v1164_v53  ;;  %v5350_v37 = vmul.f32 -1.442695, %v1168_v41 }
 0x40f   :  { %5648 = vpow2.f32 %v5348_v38  ;;  %v5351_v40 = vmul.f32 -1.442695, %v1166_v51  ;;  %v5352_v39 = vmul.f32 -1.442695, %v1170_v47 }
 0x410   :  { %5650 = vpow2.f32 %v5349_v44 }
 0x411   :  { %5652 = vpow2.f32 %v5350_v37 }
 0x412   :  { %5654 = vtanh.f32 %v1165_v50  ;;  %v1211_v50 = vrot.slane %v6834_v42, 7 }
 0x413   :  { %5656 = vtanh.f32 %v1169_v15 }
 0x414   :  { %5658 = vpow2.f32 %v5351_v40  ;;  %v1212_v40 = vrot.slane %v6836_v45, 7 }
 0x415   :  { %5660 = vpow2.f32 %v5352_v39 }
 0x41b   :  { %v5647_v52 = vpop.eup %5646 }
 0x41c   :  { %v5649_v38 = vpop.eup %5648  ;;  %v1177_v41 = vadd.f32 1.0, %v5647_v52 }
 0x41d   :  { %v1178_v44 = vadd.f32 1.0, %v5649_v38  ;;  %v5651_v43 = vpop.eup %5650 }
 0x41e   :  { %v5653_v37 = vpop.eup %5652  ;;  %5662 = vrcp.f32 %v1177_v41  ;;  %v1189_v46 = vadd.f32 1.0, %v5651_v43 }
 0x41f   :  { %5664 = vrcp.f32 %v1178_v44  ;;  %v1190_v53 = vadd.f32 1.0, %v5653_v37  ;;  %v5655_v49 = vpop.eup %5654 }
 0x420   :  { %5666 = vrcp.f32 %v1189_v46  ;;  %v5657_v48 = vpop.eup %5656 }
 0x421   :  { %5668 = vrcp.f32 %v1190_v53  ;;  %v5659_v51 = vpop.eup %5658 }
 0x422   :  { %v5661_v59 = vpop.eup %5660  ;;  %v1203_v15 = vadd.f32 1.0, %v5659_v51 }
 0x423   :  { %v1204_v39 = vadd.f32 1.0, %v5661_v59 }
 0x424   :  { %5670 = vrcp.f32 %v1203_v15  ;;  %v8760_v15 = vld [vmem:[#allocation19_spill] sm:$0xff] }
 0x425   :  { %5672 = vrcp.f32 %v1204_v39  ;;  %v8763_v39 = vld [vmem:[#allocation22_spill] sm:$0xff] }
 0x42b   :  { %v5663_v54 = vpop.eup %5662 }
 0x42c   :  { %v5665_v47 = vpop.eup %5664  ;;  %v1217_v41 = vmul.f32 %v5663_v54, %v5655_v49 }
 0x42d   :  { %v5667_v52 = vpop.eup %5666  ;;  %v1218_v44 = vmul.f32 %v5665_v47, %v5657_v48  ;;  %v8758_v47 = vld [vmem:[#allocation17_spill] sm:$0xff] }
 0x42e   :  { %v5669_v38 = vpop.eup %5668  ;;  %v1215_v43 = vmul.f32 %v5667_v52, %v1211_v50  ;;  %v8759_v50 = vld [vmem:[#allocation18_spill] sm:$0xff]  ;;  %v8761_v52 = vld [vmem:[#allocation20_spill] sm:$0xff] }
 0x42f   :  { %v1216_v37 = vmul.f32 %v5669_v38, %v1212_v40  ;;  %v8762_v40 = vld [vmem:[#allocation21_spill] sm:$0xff]  ;;  %v8764_v38 = vld [vmem:[#allocation23_spill] sm:$0xff] }
 0x430   :  { %v7041_v46 = vadd.f32 %v1217_v41, %v1215_v43  ;;  %v8765_v41 = vld [vmem:[#allocation24_spill] sm:$0xff]  ;;  %v8766_v43 = vld [vmem:[#allocation25_spill] sm:$0xff] }
 0x431   :  { %v7043_v53 = vadd.f32 %v1218_v44, %v1216_v37  ;;  %v5671_v42 = vpop.eup %5670  ;;  %v8767_v44 = vld [vmem:[#allocation26_spill] sm:$0xff]  ;;  %v8768_v37 = vld [vmem:[#allocation27_spill] sm:$0xff] }
 0x432   :  { %5674 = vtanh.f32 %v7041_v46  ;;  %v5673_v51 = vpop.eup %5672 }
 0x433   :  { %5676 = vtanh.f32 %v7043_v53 }
 0x43f   :  { %v5675_v6 = vpop.eup %5674 }
 0x440   :  { %v5677_v45 = vpop.eup %5676  ;;  %v1223_v59 = vmul.f32 %v5675_v6, %v5671_v42  ;;  %v8757_v6 = vld [vmem:[#allocation16_spill] sm:$0xff] }
 0x441   :  { %v1224_v12 = vmul.f32 %v5677_v45, %v5673_v51  ;;  %v8769_v42 = vld [vmem:[#allocation28_spill] sm:$0xff]  ;;  %v8770_v51 = vld [vmem:[#allocation29_spill] sm:$0xff]  ;;  %v8771_v45 = vld [vmem:[#allocation30_spill] sm:$0xff] }
 0x442   :  { %1225 = vst [vmem:[#allocation2] sm:$0x8] %v1223_v59  ;;  %v1229_v49 = vrot.slane %v1223_v59, 3  ;;  %v8772_v59 = vld [vmem:[#allocation31_spill] sm:$0xff] }
 0x443   :  { %1226 = vst [vmem:[#allocation2 + $0x8] sm:$0x8] %v1224_v12  ;;  %v1230_v48 = vrot.slane %v1224_v12, 2  ;;  %v8756_v12 = vld [vmem:[#allocation14_spill] sm:$0xff] }
 0x445   :  { %v1231_v54 = vsel %vm539_vm1, %v1230_v48, %v1229_v49  ;;  %v8773_v49 = vld [vmem:[#allocation32_spill] sm:$0xff]  ;;  %v8774_v48 = vld [vmem:[#allocation33_spill] sm:$0xff] }
 0x446   :  { %1298 = vmatmul.mubr.f32.vlgmr.msra.gmra.mxu0 %v1231_v54  ;;  %1369 = vmatmul.mubr.f32.vlgmr.msra.gmra.mxu1 %v1231_v54  ;;  %v8775_v54 = vld [vmem:[#allocation34_spill] sm:$0xff] }
 0x447   :  { %1466 = vmatpush1.msra.mxu0 %v6841_v55  ;;  %1537 = vmatpush1.msra.mxu1 %v6844_v56 }
 0x448   :  { %1467 = vmatprep.subr.mxu0 %v6847_v57  ;;  %1538 = vmatprep.subr.mxu1 %v6850_v58 }
 0x449   :  { %1468 = vmatpush1.msra.mxu0 %v6853_v61  ;;  %1539 = vmatpush1.msra.mxu1 %v6856_v63 }
 0x44a   :  { %1469 = vmatprep.subr.mxu0 %v6859_v10  ;;  %1540 = vmatprep.subr.mxu1 %v6862_v1 }
 0x44b   :  { %1470 = vmatpush1.msra.mxu0 %v6865_v14  ;;  %1541 = vmatpush1.msra.mxu1 %v6868_v4 }
 0x44c   :  { %1471 = vmatprep.subr.mxu0 %v6871_v11  ;;  %1542 = vmatprep.subr.mxu1 %v6874_v8 }
 0x44d   :  { %1472 = vmatpush1.msra.mxu0 %v6877_v0  ;;  %1543 = vmatpush1.msra.mxu1 %v6880_v13 }
 0x44e   :  { %1473 = vmatprep.subr.mxu0 %v6883_v9  ;;  %1544 = vmatprep.subr.mxu1 %v6886_v5 }
 0x44f   :  { %1474 = vmatpush1.msra.mxu0 %v6889_v16  ;;  %1545 = vmatpush1.msra.mxu1 %v6892_v62 }
 0x450   :  { %1475 = vmatprep.subr.mxu0 %v6895_v7  ;;  %1546 = vmatprep.subr.mxu1 %v6898_v19 }
 0x451   :  { %1476 = vmatpush1.msra.mxu0 %v6901_v18  ;;  %1547 = vmatpush1.msra.mxu1 %v6904_v20 }
 0x452   :  { %1477 = vmatprep.subr.mxu0 %v6907_v21  ;;  %1548 = vmatprep.subr.mxu1 %v6910_v22 }
 0x453   :  { %1478 = vmatpush1.msra.mxu0 %v6913_v23  ;;  %1549 = vmatpush1.msra.mxu1 %v6916_v24 }
 0x454   :  { %1479 = vmatprep.subr.mxu0 %v6919_v25  ;;  %1550 = vmatprep.subr.mxu1 %v6922_v26 }
 0x455   :  { %1480 = vmatpush1.msra.mxu0 %v6925_v27  ;;  %1551 = vmatpush1.msra.mxu1 %v6928_v28 }
 0x456   :  { %1481 = vmatprep.subr.mxu0 %v6931_v29  ;;  %1552 = vmatprep.subr.mxu1 %v6934_v30 }
 0x457   :  { %1482 = vmatpush1.msra.mxu0 %v6937_v31  ;;  %1553 = vmatpush1.msra.mxu1 %v6940_v32 }
 0x458   :  { %1483 = vmatprep.subr.mxu0 %v6943_v33  ;;  %1554 = vmatprep.subr.mxu1 %v6946_v34 }
 0x459   :  { %1484 = vmatpush1.msra.mxu0 %v6949_v35  ;;  %1555 = vmatpush1.msra.mxu1 %v6952_v36 }
 0x45a   :  { %1485 = vmatprep.subr.mxu0 %v8756_v12  ;;  %1556 = vmatprep.subr.mxu1 %v8757_v6 }
 0x45b   :  { %1486 = vmatpush1.msra.mxu0 %v8758_v47  ;;  %1557 = vmatpush1.msra.mxu1 %v8759_v50 }
 0x45c   :  { %1487 = vmatprep.subr.mxu0 %v8760_v15  ;;  %1558 = vmatprep.subr.mxu1 %v8761_v52 }
 0x45d   :  { %1488 = vmatpush1.msra.mxu0 %v8762_v40  ;;  %1559 = vmatpush1.msra.mxu1 %v8763_v39  ;;  %v8784_v39 = vld [vmem:[#allocation40_spill] sm:$0xff] }
 0x45e   :  { %1489 = vmatprep.subr.mxu0 %v8764_v38  ;;  %1560 = vmatprep.subr.mxu1 %v8765_v41  ;;  %v8776_v41 = vld [vmem:[#allocation35_spill] sm:$0xff] }
 0x45f   :  { %1490 = vmatpush1.msra.mxu0 %v8766_v43  ;;  %1561 = vmatpush1.msra.mxu1 %v8767_v44  ;;  %v8777_v43 = vld [vmem:[#allocation36_spill] sm:$0xff]  ;;  %v8778_v44 = vld [vmem:[#allocation37_spill] sm:$0xff]  ;;  %v8783_v38 = vld [vmem:[#allocation39_spill] sm:$0xff] }
 0x460   :  { %1491 = vmatprep.subr.mxu0 %v8768_v37  ;;  %1562 = vmatprep.subr.mxu1 %v8769_v42  ;;  %v8779_v37 = vmov 0.0   ;;  %v8780_v42 = vld [vmem:[#allocation43_spill] sm:$0xff] }
 0x461   :  { %1492 = vmatpush1.msra.mxu0 %v8770_v51  ;;  %1563 = vmatpush1.msra.mxu1 %v8771_v45  ;;  %v8781_v45 = vld [vmem:[#allocation15_spill] sm:$0xff] }
 0x462   :  { %1493 = vmatprep.subr.mxu0 %v8772_v59  ;;  %1564 = vmatprep.subr.mxu1 %v8773_v49  ;;  %v8782_v59 = vld [vmem:[#allocation13_spill] sm:$0xff] }
 0x463   :  { %1494 = vmatpush1.msra.mxu0 %v8774_v48  ;;  %1565 = vmatpush1.msra.mxu1 %v8775_v54 }
 0x464   :  { %1495 = vmatprep.subr.mxu0 %v8776_v41  ;;  %1566 = vmatprep.subr.mxu1 %v8777_v43 }
 0x465   :  { %1496 = vmatpush1.msra.mxu0 %v8778_v44  ;;  %1529 = vmatprep.mubr.f32.mxu0 %v8779_v37 }
 0x466   :  { %1567 = vmatpush1.msra.mxu1 %v8780_v42  ;;  %1600 = vmatprep.mubr.f32.mxu1 %v8779_v37 }
 0x467   :  { %1697 = vmatprep.subr.mxu0 %v8781_v45  ;;  %1768 = vmatprep.subr.mxu1 %v8782_v59 }
 0x506   :  { %v1299_v49 = vpop.f32.mrf.mxu0  ;;  %v1370_v40 = vpop.f32.mrf.mxu1 }
 0x507   :  { %v1379_v48 = vrot.slane %v1299_v49, 4  ;;  %v1383_v51 = vrot.slane %v1299_v49, 5 }
 0x508   :  { %v1301_v54 = vpop.f32.mrf.mxu0  ;;  %v1372_v45 = vpop.f32.mrf.mxu1 }
 0x509   :  { %v1395_v41 = vadd.f32 %v1379_v48, %v8783_v38  ;;  %v1399_v43 = vadd.f32 %v1383_v51, %v8784_v39  ;;  %v1380_v44 = vrot.slane %v1301_v54, 4  ;;  %v1384_v52 = vrot.slane %v1301_v54, 5 }
 0x50a   :  { %v1382_v49 = vrot.slane %v1372_v45, 4  ;;  %v1386_v48 = vrot.slane %v1372_v45, 5  ;;  %v1381_v38 = vrot.slane %v1370_v40, 4  ;;  %v1385_v51 = vrot.slane %v1370_v40, 5 }
 0x50b   :  { %v5353_v15 = vmul.f32 -1.442695, %v1395_v41  ;;  %v5354_v50 = vmul.f32 -1.442695, %v1399_v43  ;;  %v1396_v42 = vadd.f32 %v1380_v44, %v8700_v3  ;;  %v1400_v37 = vadd.f32 %v1384_v52, %v6643_v60  ;;  %v8785_v43 = vld [vmem:[#allocation44_spill] sm:$0xff]  ;;  %v8786_v44 = vld [vmem:[#allocation45_spill] sm:$0xff] }
 0x50c   :  { %v1398_v39 = vadd.f32 %v1382_v49, %v6654_v2  ;;  %v1402_v41 = vadd.f32 %v1386_v48, %v8729_v17  ;;  %v1397_v54 = vadd.f32 %v1381_v38, %v8785_v43  ;;  %v1401_v3 = vadd.f32 %v1385_v51, %v8786_v44 }
 0x50d   :  { %5678 = vpow2.f32 %v5353_v15  ;;  %v5355_v59 = vmul.f32 -1.442695, %v1396_v42  ;;  %v5356_v47 = vmul.f32 -1.442695, %v1400_v37 }
 0x50e   :  { %5680 = vpow2.f32 %v5354_v50  ;;  %v5357_v52 = vmul.f32 -1.442695, %v1398_v39  ;;  %v5358_v15 = vmul.f32 -1.442695, %v1402_v41 }
 0x50f   :  { %5682 = vpow2.f32 %v5355_v59 }
 0x510   :  { %5684 = vpow2.f32 %v5356_v47 }
 0x511   :  { %5686 = vtanh.f32 %v1397_v54 }
 0x512   :  { %5688 = vtanh.f32 %v1401_v3 }
 0x513   :  { %5690 = vpow2.f32 %v5357_v52  ;;  %v1444_v52 = vrot.slane %v7043_v53, 7 }
 0x514   :  { %5692 = vpow2.f32 %v5358_v15 }
 0x51a   :  { %v5679_v60 = vpop.eup %5678 }
 0x51b   :  { %v5681_v50 = vpop.eup %5680  ;;  %v1409_v37 = vadd.f32 1.0, %v5679_v60  ;;  %v1443_v60 = vrot.slane %v7041_v46, 7 }
 0x51c   :  { %v1410_v42 = vadd.f32 1.0, %v5681_v50  ;;  %v5683_v47 = vpop.eup %5682 }
 0x51d   :  { %v5685_v40 = vpop.eup %5684  ;;  %5694 = vrcp.f32 %v1409_v37  ;;  %v1421_v45 = vadd.f32 1.0, %v5683_v47 }
 0x51e   :  { %5696 = vrcp.f32 %v1410_v42  ;;  %v1422_v59 = vadd.f32 1.0, %v5685_v40  ;;  %v5687_v38 = vpop.eup %5686 }
 0x51f   :  { %5698 = vrcp.f32 %v1421_v45  ;;  %v5689_v49 = vpop.eup %5688 }
 0x520   :  { %5700 = vrcp.f32 %v1422_v59  ;;  %v5691_v39 = vpop.eup %5690 }
 0x521   :  { %v5693_v48 = vpop.eup %5692  ;;  %v1435_v3 = vadd.f32 1.0, %v5691_v39 }
 0x522   :  { %v1436_v15 = vadd.f32 1.0, %v5693_v48 }
 0x523   :  { %5702 = vrcp.f32 %v1435_v3  ;;  %v8791_v3 = vld [vmem:[#allocation21_spill] sm:$0xff] }
 0x524   :  { %5704 = vrcp.f32 %v1436_v15  ;;  %v8794_v15 = vld [vmem:[#allocation24_spill] sm:$0xff] }
 0x52a   :  { %v5695_v51 = vpop.eup %5694 }
 0x52b   :  { %v5697_v41 = vpop.eup %5696  ;;  %v1449_v37 = vmul.f32 %v5695_v51, %v5687_v38 }
 0x52c   :  { %v5699_v54 = vpop.eup %5698  ;;  %v1450_v42 = vmul.f32 %v5697_v41, %v5689_v49  ;;  %v8789_v41 = vld [vmem:[#allocation19_spill] sm:$0xff] }
 0x52d   :  { %v5701_v50 = vpop.eup %5700  ;;  %v1447_v47 = vmul.f32 %v5699_v54, %v1443_v60  ;;  %v8790_v60 = vld [vmem:[#allocation20_spill] sm:$0xff]  ;;  %v8792_v54 = vld [vmem:[#allocation22_spill] sm:$0xff] }
 0x52e   :  { %v1448_v40 = vmul.f32 %v5701_v50, %v1444_v52  ;;  %v8793_v52 = vld [vmem:[#allocation23_spill] sm:$0xff]  ;;  %v8795_v50 = vld [vmem:[#allocation25_spill] sm:$0xff] }
 0x52f   :  { %v7124_v45 = vadd.f32 %v1449_v37, %v1447_v47  ;;  %v8796_v37 = vld [vmem:[#allocation26_spill] sm:$0xff]  ;;  %v8797_v47 = vld [vmem:[#allocation27_spill] sm:$0xff] }
 0x530   :  { %v7126_v59 = vadd.f32 %v1450_v42, %v1448_v40  ;;  %v5703_v46 = vpop.eup %5702  ;;  %v8798_v42 = vld [vmem:[#allocation28_spill] sm:$0xff]  ;;  %v8799_v40 = vld [vmem:[#allocation29_spill] sm:$0xff] }
 0x531   :  { %5706 = vtanh.f32 %v7124_v45  ;;  %v5705_v39 = vpop.eup %5704 }
 0x532   :  { %5708 = vtanh.f32 %v7126_v59 }
 0x53e   :  { %v5707_v44 = vpop.eup %5706 }
 0x53f   :  { %v5709_v53 = vpop.eup %5708  ;;  %v1455_v48 = vmul.f32 %v5707_v44, %v5703_v46  ;;  %v8788_v44 = vld [vmem:[#allocation18_spill] sm:$0xff] }
 0x540   :  { %v1456_v43 = vmul.f32 %v5709_v53, %v5705_v39  ;;  %v8800_v46 = vld [vmem:[#allocation30_spill] sm:$0xff]  ;;  %v8801_v39 = vld [vmem:[#allocation31_spill] sm:$0xff]  ;;  %v8802_v53 = vld [vmem:[#allocation32_spill] sm:$0xff] }
 0x541   :  { %1457 = vst [vmem:[#allocation2] sm:$0x10] %v1455_v48  ;;  %v1461_v38 = vrot.slane %v1455_v48, 4  ;;  %v8803_v48 = vld [vmem:[#allocation33_spill] sm:$0xff] }
 0x542   :  { %1458 = vst [vmem:[#allocation2 + $0x8] sm:$0x10] %v1456_v43  ;;  %v1462_v49 = vrot.slane %v1456_v43, 3  ;;  %v8787_v43 = vld [vmem:[#allocation17_spill] sm:$0xff] }
 0x544   :  { %v1463_v51 = vsel %vm539_vm1, %v1462_v49, %v1461_v38  ;;  %v8804_v38 = vld [vmem:[#allocation34_spill] sm:$0xff]  ;;  %v8805_v49 = vld [vmem:[#allocation35_spill] sm:$0xff] }
 0x545   :  { %1530 = vmatmul.mubr.f32.vlgmr.msra.gmra.mxu0 %v1463_v51  ;;  %1601 = vmatmul.mubr.f32.vlgmr.msra.gmra.mxu1 %v1463_v51  ;;  %v8806_v51 = vld [vmem:[#allocation36_spill] sm:$0xff] }
 0x546   :  { %1698 = vmatpush1.msra.mxu0 %v6841_v55  ;;  %1769 = vmatpush1.msra.mxu1 %v6844_v56 }
 0x547   :  { %1699 = vmatprep.subr.mxu0 %v6847_v57  ;;  %1770 = vmatprep.subr.mxu1 %v6850_v58 }
 0x548   :  { %1700 = vmatpush1.msra.mxu0 %v6853_v61  ;;  %1771 = vmatpush1.msra.mxu1 %v6856_v63 }
 0x549   :  { %1701 = vmatprep.subr.mxu0 %v6859_v10  ;;  %1772 = vmatprep.subr.mxu1 %v6862_v1 }
 0x54a   :  { %1702 = vmatpush1.msra.mxu0 %v6865_v14  ;;  %1773 = vmatpush1.msra.mxu1 %v6868_v4 }
 0x54b   :  { %1703 = vmatprep.subr.mxu0 %v6871_v11  ;;  %1774 = vmatprep.subr.mxu1 %v6874_v8 }
 0x54c   :  { %1704 = vmatpush1.msra.mxu0 %v6877_v0  ;;  %1775 = vmatpush1.msra.mxu1 %v6880_v13 }
 0x54d   :  { %1705 = vmatprep.subr.mxu0 %v6883_v9  ;;  %1776 = vmatprep.subr.mxu1 %v6886_v5 }
 0x54e   :  { %1706 = vmatpush1.msra.mxu0 %v6889_v16  ;;  %1777 = vmatpush1.msra.mxu1 %v6892_v62 }
 0x54f   :  { %1707 = vmatprep.subr.mxu0 %v6895_v7  ;;  %1778 = vmatprep.subr.mxu1 %v6898_v19 }
 0x550   :  { %1708 = vmatpush1.msra.mxu0 %v6901_v18  ;;  %1779 = vmatpush1.msra.mxu1 %v6904_v20 }
 0x551   :  { %1709 = vmatprep.subr.mxu0 %v6907_v21  ;;  %1780 = vmatprep.subr.mxu1 %v6910_v22 }
 0x552   :  { %1710 = vmatpush1.msra.mxu0 %v6913_v23  ;;  %1781 = vmatpush1.msra.mxu1 %v6916_v24 }
 0x553   :  { %1711 = vmatprep.subr.mxu0 %v6919_v25  ;;  %1782 = vmatprep.subr.mxu1 %v6922_v26 }
 0x554   :  { %1712 = vmatpush1.msra.mxu0 %v6925_v27  ;;  %1783 = vmatpush1.msra.mxu1 %v6928_v28 }
 0x555   :  { %1713 = vmatprep.subr.mxu0 %v6931_v29  ;;  %1784 = vmatprep.subr.mxu1 %v6934_v30 }
 0x556   :  { %1714 = vmatpush1.msra.mxu0 %v6937_v31  ;;  %1785 = vmatpush1.msra.mxu1 %v6940_v32 }
 0x557   :  { %1715 = vmatprep.subr.mxu0 %v6943_v33  ;;  %1786 = vmatprep.subr.mxu1 %v6946_v34 }
 0x558   :  { %1716 = vmatpush1.msra.mxu0 %v6949_v35  ;;  %1787 = vmatpush1.msra.mxu1 %v6952_v36 }
 0x559   :  { %1717 = vmatprep.subr.mxu0 %v8756_v12  ;;  %1788 = vmatprep.subr.mxu1 %v8757_v6 }
 0x55a   :  { %1718 = vmatpush1.msra.mxu0 %v8787_v43  ;;  %1789 = vmatpush1.msra.mxu1 %v8788_v44 }
 0x55b   :  { %1719 = vmatprep.subr.mxu0 %v8789_v41  ;;  %1790 = vmatprep.subr.mxu1 %v8790_v60 }
 0x55c   :  { %1720 = vmatpush1.msra.mxu0 %v8791_v3  ;;  %1791 = vmatpush1.msra.mxu1 %v8792_v54 }
 0x55d   :  { %1721 = vmatprep.subr.mxu0 %v8793_v52  ;;  %1792 = vmatprep.subr.mxu1 %v8794_v15  ;;  %v8813_v15 = vld [vmem:[#allocation40_spill] sm:$0xff] }
 0x55e   :  { %1722 = vmatpush1.msra.mxu0 %v8795_v50  ;;  %1793 = vmatpush1.msra.mxu1 %v8796_v37  ;;  %v8807_v37 = vld [vmem:[#allocation37_spill] sm:$0xff]  ;;  %v8812_v50 = vld [vmem:[#allocation39_spill] sm:$0xff] }
 0x55f   :  { %1723 = vmatprep.subr.mxu0 %v8797_v47  ;;  %1794 = vmatprep.subr.mxu1 %v8798_v42  ;;  %v8808_v47 = vmov 0.0   ;;  %v8809_v42 = vld [vmem:[#allocation43_spill] sm:$0xff] }
 0x560   :  { %1724 = vmatpush1.msra.mxu0 %v8799_v40  ;;  %1795 = vmatpush1.msra.mxu1 %v8800_v46  ;;  %v8810_v46 = vld [vmem:[#allocation15_spill] sm:$0xff] }
 0x561   :  { %1725 = vmatprep.subr.mxu0 %v8801_v39  ;;  %1796 = vmatprep.subr.mxu1 %v8802_v53  ;;  %v8811_v39 = vld [vmem:[#allocation13_spill] sm:$0xff] }
 0x562   :  { %1726 = vmatpush1.msra.mxu0 %v8803_v48  ;;  %1797 = vmatpush1.msra.mxu1 %v8804_v38 }
 0x563   :  { %1727 = vmatprep.subr.mxu0 %v8805_v49  ;;  %1798 = vmatprep.subr.mxu1 %v8806_v51 }
 0x564   :  { %1728 = vmatpush1.msra.mxu0 %v8807_v37  ;;  %1761 = vmatprep.mubr.f32.mxu0 %v8808_v47 }
 0x565   :  { %1799 = vmatpush1.msra.mxu1 %v8809_v42  ;;  %1832 = vmatprep.mubr.f32.mxu1 %v8808_v47  ;;  %v8814_v42 = vld [vmem:[#allocation41_spill] sm:$0xff]  ;;  %v8815_v47 = vld [vmem:[#allocation42_spill] sm:$0xff] }
 0x566   :  { %1929 = vmatprep.subr.mxu0 %v8810_v46  ;;  %2000 = vmatprep.subr.mxu1 %v8811_v39 }
 0x605   :  { %v1531_v53 = vpop.f32.mrf.mxu0  ;;  %v1602_v52 = vpop.f32.mrf.mxu1 }
 0x606   :  { %v1611_v48 = vrot.slane %v1531_v53, 3  ;;  %v1615_v40 = vrot.slane %v1531_v53, 4 }
 0x607   :  { %v1533_v38 = vpop.f32.mrf.mxu0  ;;  %v1604_v46 = vpop.f32.mrf.mxu1 }
 0x608   :  { %v1627_v49 = vadd.f32 %v1611_v48, %v8812_v50  ;;  %v1631_v51 = vadd.f32 %v1615_v40, %v8813_v15  ;;  %v1612_v37 = vrot.slane %v1533_v38, 3  ;;  %v1616_v54 = vrot.slane %v1533_v38, 4 }
 0x609   :  { %v1614_v53 = vrot.slane %v1604_v46, 3  ;;  %v1618_v48 = vrot.slane %v1604_v46, 4  ;;  %v1613_v50 = vrot.slane %v1602_v52, 3  ;;  %v1617_v40 = vrot.slane %v1602_v52, 4 }
 0x60a   :  { %v5359_v3 = vmul.f32 -1.442695, %v1627_v49  ;;  %v5360_v60 = vmul.f32 -1.442695, %v1631_v51  ;;  %v1628_v41 = vadd.f32 %v1612_v37, %v8814_v42  ;;  %v1632_v44 = vadd.f32 %v1616_v54, %v8815_v47  ;;  %v8816_v49 = vld [vmem:[#allocation44_spill] sm:$0xff]  ;;  %v8817_v37 = vld [vmem:[#allocation45_spill] sm:$0xff] }
 0x60b   :  { %v1630_v15 = vadd.f32 %v1614_v53, %v6654_v2  ;;  %v1634_v38 = vadd.f32 %v1618_v48, %v8729_v17  ;;  %v1629_v51 = vadd.f32 %v1613_v50, %v8816_v49  ;;  %v1633_v42 = vadd.f32 %v1617_v40, %v8817_v37 }
 0x60c   :  { %5710 = vpow2.f32 %v5359_v3  ;;  %v5361_v39 = vmul.f32 -1.442695, %v1628_v41  ;;  %v5362_v43 = vmul.f32 -1.442695, %v1632_v44 }
 0x60d   :  { %5712 = vpow2.f32 %v5360_v60  ;;  %v5363_v54 = vmul.f32 -1.442695, %v1630_v15  ;;  %v5364_v3 = vmul.f32 -1.442695, %v1634_v38 }
 0x60e   :  { %5714 = vpow2.f32 %v5361_v39 }
 0x60f   :  { %5716 = vpow2.f32 %v5362_v43 }
 0x610   :  { %5718 = vtanh.f32 %v1629_v51 }
 0x611   :  { %5720 = vtanh.f32 %v1633_v42 }
 0x612   :  { %5722 = vpow2.f32 %v5363_v54  ;;  %v1676_v54 = vrot.slane %v7126_v59, 7 }
 0x613   :  { %5724 = vpow2.f32 %v5364_v3 }
 0x619   :  { %v5711_v47 = vpop.eup %5710 }
 0x61a   :  { %v5713_v41 = vpop.eup %5712  ;;  %v1641_v44 = vadd.f32 1.0, %v5711_v47  ;;  %v1675_v47 = vrot.slane %v7124_v45, 7 }
 0x61b   :  { %v1642_v60 = vadd.f32 1.0, %v5713_v41  ;;  %v5715_v43 = vpop.eup %5714 }
 0x61c   :  { %v5717_v52 = vpop.eup %5716  ;;  %5726 = vrcp.f32 %v1641_v44  ;;  %v1653_v46 = vadd.f32 1.0, %v5715_v43 }
 0x61d   :  { %5728 = vrcp.f32 %v1642_v60  ;;  %v1654_v39 = vadd.f32 1.0, %v5717_v52  ;;  %v5719_v50 = vpop.eup %5718 }
 0x61e   :  { %5730 = vrcp.f32 %v1653_v46  ;;  %v5721_v53 = vpop.eup %5720 }
 0x61f   :  { %5732 = vrcp.f32 %v1654_v39  ;;  %v5723_v15 = vpop.eup %5722 }
 0x620   :  { %v5725_v48 = vpop.eup %5724  ;;  %v1667_v42 = vadd.f32 1.0, %v5723_v15 }
 0x621   :  { %v1668_v3 = vadd.f32 1.0, %v5725_v48 }
 0x622   :  { %5734 = vrcp.f32 %v1667_v42 }
 0x623   :  { %5736 = vrcp.f32 %v1668_v3 }
 0x629   :  { %v5727_v40 = vpop.eup %5726 }
 0x62a   :  { %v5729_v38 = vpop.eup %5728  ;;  %v1681_v44 = vmul.f32 %v5727_v40, %v5719_v50 }
 0x62b   :  { %v5731_v51 = vpop.eup %5730  ;;  %v1682_v60 = vmul.f32 %v5729_v38, %v5721_v53 }
 0x62c   :  { %v5733_v41 = vpop.eup %5732  ;;  %v1679_v43 = vmul.f32 %v5731_v51, %v1675_v47 }
 0x62d   :  { %v1680_v52 = vmul.f32 %v5733_v41, %v1676_v54 }
 0x62e   :  { %v7207_v46 = vadd.f32 %v1681_v44, %v1679_v43  ;;  %v8845_v44 = vld [vmem:[#allocation44_spill] sm:$0xff] }
 0x62f   :  { %v7209_v39 = vadd.f32 %v1682_v60, %v1680_v52  ;;  %v5735_v45 = vpop.eup %5734  ;;  %v8846_v60 = vld [vmem:[#allocation45_spill] sm:$0xff] }
 0x630   :  { %5738 = vtanh.f32 %v7207_v46  ;;  %v5737_v15 = vpop.eup %5736 }
 0x631   :  { %5740 = vtanh.f32 %v7209_v39 }
 0x63d   :  { %v5739_v37 = vpop.eup %5738 }
 0x63e   :  { %v5741_v59 = vpop.eup %5740  ;;  %v1687_v48 = vmul.f32 %v5739_v37, %v5735_v45 }
 0x63f   :  { %v1688_v49 = vmul.f32 %v5741_v59, %v5737_v15 }
 0x640   :  { %1689 = vst [vmem:[#allocation2] sm:$0x20] %v1687_v48  ;;  %v1693_v50 = vrot.slane %v1687_v48, 5 }
 0x641   :  { %1690 = vst [vmem:[#allocation2 + $0x8] sm:$0x20] %v1688_v49  ;;  %v1694_v53 = vrot.slane %v1688_v49, 4 }
 0x643   :  { %v1695_v40 = vsel %vm539_vm1, %v1694_v53, %v1693_v50 }
 0x644   :  { %1762 = vmatmul.mubr.f32.vlgmr.msra.gmra.mxu0 %v1695_v40  ;;  %1833 = vmatmul.mubr.f32.vlgmr.msra.gmra.mxu1 %v1695_v40 }
 0x645   :  { %1930 = vmatpush1.msra.mxu0 %v6841_v55  ;;  %2001 = vmatpush1.msra.mxu1 %v6844_v56  ;;  %v8818_v55 = vld [vmem:[#allocation17_spill] sm:$0xff]  ;;  %v8819_v56 = vld [vmem:[#allocation18_spill] sm:$0xff] }
 0x646   :  { %1931 = vmatprep.subr.mxu0 %v6847_v57  ;;  %2002 = vmatprep.subr.mxu1 %v6850_v58  ;;  %v8820_v57 = vld [vmem:[#allocation19_spill] sm:$0xff]  ;;  %v8821_v58 = vld [vmem:[#allocation20_spill] sm:$0xff] }
 0x647   :  { %1932 = vmatpush1.msra.mxu0 %v6853_v61  ;;  %2003 = vmatpush1.msra.mxu1 %v6856_v63  ;;  %v8822_v61 = vld [vmem:[#allocation21_spill] sm:$0xff]  ;;  %v8823_v63 = vld [vmem:[#allocation22_spill] sm:$0xff] }
 0x648   :  { %1933 = vmatprep.subr.mxu0 %v6859_v10  ;;  %2004 = vmatprep.subr.mxu1 %v6862_v1  ;;  %v8824_v10 = vld [vmem:[#allocation23_spill] sm:$0xff]  ;;  %v8825_v1 = vld [vmem:[#allocation24_spill] sm:$0xff] }
 0x649   :  { %1934 = vmatpush1.msra.mxu0 %v6865_v14  ;;  %2005 = vmatpush1.msra.mxu1 %v6868_v4  ;;  %v8826_v14 = vld [vmem:[#allocation25_spill] sm:$0xff]  ;;  %v8827_v4 = vld [vmem:[#allocation26_spill] sm:$0xff] }
 0x64a   :  { %1935 = vmatprep.subr.mxu0 %v6871_v11  ;;  %2006 = vmatprep.subr.mxu1 %v6874_v8  ;;  %v8828_v11 = vld [vmem:[#allocation27_spill] sm:$0xff]  ;;  %v8829_v8 = vld [vmem:[#allocation28_spill] sm:$0xff] }
 0x64b   :  { %1936 = vmatpush1.msra.mxu0 %v6877_v0  ;;  %2007 = vmatpush1.msra.mxu1 %v6880_v13  ;;  %v8830_v0 = vld [vmem:[#allocation29_spill] sm:$0xff]  ;;  %v8831_v13 = vld [vmem:[#allocation30_spill] sm:$0xff] }
 0x64c   :  { %1937 = vmatprep.subr.mxu0 %v6883_v9  ;;  %2008 = vmatprep.subr.mxu1 %v6886_v5  ;;  %v8832_v9 = vld [vmem:[#allocation31_spill] sm:$0xff]  ;;  %v8833_v5 = vld [vmem:[#allocation32_spill] sm:$0xff] }
 0x64d   :  { %1938 = vmatpush1.msra.mxu0 %v6889_v16  ;;  %2009 = vmatpush1.msra.mxu1 %v6892_v62  ;;  %v8834_v16 = vld [vmem:[#allocation33_spill] sm:$0xff]  ;;  %v8835_v62 = vld [vmem:[#allocation34_spill] sm:$0xff] }
 0x64e   :  { %1939 = vmatprep.subr.mxu0 %v6895_v7  ;;  %2010 = vmatprep.subr.mxu1 %v6898_v19  ;;  %v8836_v7 = vld [vmem:[#allocation35_spill] sm:$0xff]  ;;  %v8837_v19 = vld [vmem:[#allocation36_spill] sm:$0xff] }
 0x64f   :  { %1940 = vmatpush1.msra.mxu0 %v6901_v18  ;;  %2011 = vmatpush1.msra.mxu1 %v6904_v20  ;;  %v8838_v18 = vld [vmem:[#allocation37_spill] sm:$0xff]  ;;  %v8839_v20 = vmov 0.0  }
 0x650   :  { %1941 = vmatprep.subr.mxu0 %v6907_v21  ;;  %2012 = vmatprep.subr.mxu1 %v6910_v22  ;;  %v8840_v21 = vld [vmem:[#allocation43_spill] sm:$0xff] }
 0x651   :  { %1942 = vmatpush1.msra.mxu0 %v6913_v23  ;;  %2013 = vmatpush1.msra.mxu1 %v6916_v24 }
 0x652   :  { %1943 = vmatprep.subr.mxu0 %v6919_v25  ;;  %2014 = vmatprep.subr.mxu1 %v6922_v26  ;;  %v8841_v26 = vld [vmem:[#allocation39_spill] sm:$0xff] }
 0x653   :  { %1944 = vmatpush1.msra.mxu0 %v6925_v27  ;;  %2015 = vmatpush1.msra.mxu1 %v6928_v28  ;;  %v8842_v28 = vld [vmem:[#allocation40_spill] sm:$0xff] }
 0x654   :  { %1945 = vmatprep.subr.mxu0 %v6931_v29  ;;  %2016 = vmatprep.subr.mxu1 %v6934_v30 }
 0x655   :  { %1946 = vmatpush1.msra.mxu0 %v6937_v31  ;;  %2017 = vmatpush1.msra.mxu1 %v6940_v32 }
 0x656   :  { %1947 = vmatprep.subr.mxu0 %v6943_v33  ;;  %2018 = vmatprep.subr.mxu1 %v6946_v34 }
 0x657   :  { %1948 = vmatpush1.msra.mxu0 %v6949_v35  ;;  %2019 = vmatpush1.msra.mxu1 %v6952_v36  ;;  %v8843_v35 = vld [vmem:[#allocation41_spill] sm:$0xff] }
 0x658   :  { %1949 = vmatprep.subr.mxu0 %v8756_v12  ;;  %2020 = vmatprep.subr.mxu1 %v8757_v6  ;;  %v8844_v12 = vld [vmem:[#allocation42_spill] sm:$0xff] }
 0x659   :  { %1950 = vmatpush1.msra.mxu0 %v8818_v55  ;;  %2021 = vmatpush1.msra.mxu1 %v8819_v56 }
 0x65a   :  { %1951 = vmatprep.subr.mxu0 %v8820_v57  ;;  %2022 = vmatprep.subr.mxu1 %v8821_v58 }
 0x65b   :  { %1952 = vmatpush1.msra.mxu0 %v8822_v61  ;;  %2023 = vmatpush1.msra.mxu1 %v8823_v63 }
 0x65c   :  { %1953 = vmatprep.subr.mxu0 %v8824_v10  ;;  %2024 = vmatprep.subr.mxu1 %v8825_v1 }
 0x65d   :  { %1954 = vmatpush1.msra.mxu0 %v8826_v14  ;;  %2025 = vmatpush1.msra.mxu1 %v8827_v4  ;;  %v1907_v4 = vrot.slane %v7207_v46, 7 }
 0x65e   :  { %1955 = vmatprep.subr.mxu0 %v8828_v11  ;;  %2026 = vmatprep.subr.mxu1 %v8829_v8 }
 0x65f   :  { %1956 = vmatpush1.msra.mxu0 %v8830_v0  ;;  %2027 = vmatpush1.msra.mxu1 %v8831_v13  ;;  %v1908_v0 = vrot.slane %v7209_v39, 7 }
 0x660   :  { %1957 = vmatprep.subr.mxu0 %v8832_v9  ;;  %2028 = vmatprep.subr.mxu1 %v8833_v5 }
 0x661   :  { %1958 = vmatpush1.msra.mxu0 %v8834_v16  ;;  %2029 = vmatpush1.msra.mxu1 %v8835_v62 }
 0x662   :  { %1959 = vmatprep.subr.mxu0 %v8836_v7  ;;  %2030 = vmatprep.subr.mxu1 %v8837_v19 }
 0x663   :  { %1960 = vmatpush1.msra.mxu0 %v8838_v18  ;;  %1993 = vmatprep.mubr.f32.mxu0 %v8839_v20 }
 0x664   :  { %2031 = vmatpush1.msra.mxu1 %v8840_v21  ;;  %2064 = vmatprep.mubr.f32.mxu1 %v8839_v20 }
 0x704   :  { %v1763_v22 = vpop.f32.mrf.mxu0  ;;  %v1834_v30 = vpop.f32.mrf.mxu1 }
 0x705   :  { %v1843_v23 = vrot.slane %v1763_v22, 2  ;;  %v1847_v24 = vrot.slane %v1763_v22, 3  ;;  %v1845_v51 = vrot.slane %v1834_v30, 2  ;;  %v1849_v54 = vrot.slane %v1834_v30, 3  ;;  %v2216_v30 = vld [vmem:[#allocation7 + $0x1e8] sm:$0xff] }
 0x706   :  { %v1765_v25 = vpop.f32.mrf.mxu0  ;;  %v1836_v49 = vpop.f32.mrf.mxu1  ;;  %2308 = vmatprep.subr.mxu0 %v2216_v30  ;;  %v2166_v30 = vld [vmem:[#allocation7 + $0x58] sm:$0xff] }
 0x707   :  { %v1859_v27 = vadd.f32 %v1843_v23, %v8841_v26  ;;  %v1863_v29 = vadd.f32 %v1847_v24, %v8842_v28  ;;  %v1844_v31 = vrot.slane %v1765_v25, 2  ;;  %v1848_v32 = vrot.slane %v1765_v25, 3 }
 0x708   :  { %v1846_v47 = vrot.slane %v1836_v49, 2  ;;  %v1850_v42 = vrot.slane %v1836_v49, 3  ;;  %v1861_v43 = vadd.f32 %v1845_v51, %v8845_v44  ;;  %v1865_v52 = vadd.f32 %v1849_v54, %v8846_v60  ;;  %v2213_v49 = vld [vmem:[#allocation7 + $0x1d0] sm:$0xff]  ;;  %v2204_v51 = vld [vmem:[#allocation7 + $0x188] sm:$0xff]  ;;  %v2206_v54 = vld [vmem:[#allocation7 + $0x198] sm:$0xff] }
 0x709   :  { %v5365_v33 = vmul.f32 -1.442695, %v1859_v27  ;;  %v5366_v34 = vmul.f32 -1.442695, %v1863_v29  ;;  %v1860_v36 = vadd.f32 %v1844_v31, %v8843_v35  ;;  %v1864_v6 = vadd.f32 %v1848_v32, %v8844_v12  ;;  %v2218_v31 = vld [vmem:[#allocation7 + $0x1f8] sm:$0xff]  ;;  %v2215_v32 = vld [vmem:[#allocation7 + $0x1e0] sm:$0xff] }
 0x70a   :  { %v1862_v3 = vadd.f32 %v1846_v47, %v6654_v2  ;;  %v1866_v41 = vadd.f32 %v1850_v42, %v8729_v17  ;;  %2385 = vmatprep.subr.mxu1 %v2218_v31  ;;  %v2207_v47 = vld [vmem:[#allocation7 + $0x1a0] sm:$0xff]  ;;  %v2209_v42 = vld [vmem:[#allocation7 + $0x1b0] sm:$0xff] }
 0x70b   :  { %5742 = vpow2.f32 %v5365_v33  ;;  %v5367_v37 = vmul.f32 -1.442695, %v1860_v36  ;;  %v5368_v38 = vmul.f32 -1.442695, %v1864_v6  ;;  %v2217_v33 = vld [vmem:[#allocation7 + $0x1f0] sm:$0xff]  ;;  %v2214_v36 = vld [vmem:[#allocation7 + $0x1d8] sm:$0xff] }
 0x70c   :  { %5744 = vpow2.f32 %v5366_v34  ;;  %v5369_v45 = vmul.f32 -1.442695, %v1862_v3  ;;  %v5370_v15 = vmul.f32 -1.442695, %v1866_v41  ;;  %v2212_v34 = vld [vmem:[#allocation7 + $0x1c8] sm:$0xff]  ;;  %v2211_v6 = vld [vmem:[#allocation7 + $0x1c0] sm:$0xff] }
 0x70d   :  { %5746 = vpow2.f32 %v5367_v37  ;;  %v2208_v37 = vld [vmem:[#allocation7 + $0x1a8] sm:$0xff]  ;;  %v2203_v3 = vld [vmem:[#allocation7 + $0x180] sm:$0xff]  ;;  %v2205_v41 = vld [vmem:[#allocation7 + $0x190] sm:$0xff] }
 0x70e   :  { %5748 = vpow2.f32 %v5368_v38  ;;  %v2210_v38 = vld [vmem:[#allocation7 + $0x1b8] sm:$0xff]  ;;  %v2163_v31 = vld [vmem:[#allocation7 + $0x40] sm:$0xff] }
 0x70f   :  { %5750 = vtanh.f32 %v1861_v43  ;;  %v2200_v43 = vld [vmem:[#allocation7 + $0x168] sm:$0xff] }
 0x710   :  { %5752 = vtanh.f32 %v1865_v52  ;;  %v2202_v52 = vld [vmem:[#allocation7 + $0x178] sm:$0xff] }
 0x711   :  { %5754 = vpow2.f32 %v5369_v45  ;;  %v2199_v45 = vld [vmem:[#allocation7 + $0x160] sm:$0xff] }
 0x712   :  { %5756 = vpow2.f32 %v5370_v15  ;;  %v2201_v15 = vld [vmem:[#allocation7 + $0x170] sm:$0xff] }
 0x718   :  { %v5743_v59 = vpop.eup %5742 }
 0x719   :  { %v5745_v48 = vpop.eup %5744  ;;  %v1873_v50 = vadd.f32 1.0, %v5743_v59  ;;  %v2196_v59 = vld [vmem:[#allocation7 + $0x148] sm:$0xff] }
 0x71a   :  { %v1874_v53 = vadd.f32 1.0, %v5745_v48  ;;  %v5747_v40 = vpop.eup %5746  ;;  %v2198_v48 = vld [vmem:[#allocation7 + $0x158] sm:$0xff] }
 0x71b   :  { %v5749_v55 = vpop.eup %5748  ;;  %5758 = vrcp.f32 %v1873_v50  ;;  %v1885_v56 = vadd.f32 1.0, %v5747_v40  ;;  %v2195_v50 = vld [vmem:[#allocation7 + $0x140] sm:$0xff]  ;;  %v2192_v40 = vld [vmem:[#allocation7 + $0x128] sm:$0xff] }
 0x71c   :  { %5760 = vrcp.f32 %v1874_v53  ;;  %v1886_v57 = vadd.f32 1.0, %v5749_v55  ;;  %v5751_v58 = vpop.eup %5750  ;;  %v2197_v53 = vld [vmem:[#allocation7 + $0x150] sm:$0xff]  ;;  %v2194_v55 = vld [vmem:[#allocation7 + $0x138] sm:$0xff] }
 0x71d   :  { %5762 = vrcp.f32 %v1885_v56  ;;  %v5753_v61 = vpop.eup %5752  ;;  %v2191_v56 = vld [vmem:[#allocation7 + $0x120] sm:$0xff] }
 0x71e   :  { %5764 = vrcp.f32 %v1886_v57  ;;  %v5755_v63 = vpop.eup %5754  ;;  %v2193_v57 = vld [vmem:[#allocation7 + $0x130] sm:$0xff] }
 0x71f   :  { %v5757_v10 = vpop.eup %5756  ;;  %v1899_v11 = vadd.f32 1.0, %v5755_v63  ;;  %v2187_v63 = vld [vmem:[#allocation7 + $0x100] sm:$0xff] }
 0x720   :  { %v1900_v13 = vadd.f32 1.0, %v5757_v10  ;;  %v2189_v10 = vld [vmem:[#allocation7 + $0x110] sm:$0xff] }
 0x721   :  { %5766 = vrcp.f32 %v1899_v11  ;;  %v2185_v11 = vld [vmem:[#allocation7 + $0xf0] sm:$0xff] }
 0x722   :  { %5768 = vrcp.f32 %v1900_v13  ;;  %v2179_v13 = vld [vmem:[#allocation7 + $0xc0] sm:$0xff] }
 0x728   :  { %v5759_v1 = vpop.eup %5758 }
 0x729   :  { %v5761_v14 = vpop.eup %5760  ;;  %v1913_v5 = vmul.f32 %v5759_v1, %v5751_v58  ;;  %v2188_v58 = vld [vmem:[#allocation7 + $0x108] sm:$0xff] }
 0x72a   :  { %v5763_v8 = vpop.eup %5762  ;;  %v1914_v62 = vmul.f32 %v5761_v14, %v5753_v61  ;;  %v2190_v61 = vld [vmem:[#allocation7 + $0x118] sm:$0xff]  ;;  %v2184_v1 = vld [vmem:[#allocation7 + $0xe8] sm:$0xff] }
 0x72b   :  { %v5765_v9 = vpop.eup %5764  ;;  %v1911_v16 = vmul.f32 %v5763_v8, %v1907_v4  ;;  %v2186_v14 = vld [vmem:[#allocation7 + $0xf8] sm:$0xff]  ;;  %v2183_v4 = vld [vmem:[#allocation7 + $0xe0] sm:$0xff]  ;;  %v2180_v8 = vld [vmem:[#allocation7 + $0xc8] sm:$0xff] }
 0x72c   :  { %v1912_v7 = vmul.f32 %v5765_v9, %v1908_v0  ;;  %v2182_v0 = vld [vmem:[#allocation7 + $0xd8] sm:$0xff]  ;;  %v2181_v9 = vld [vmem:[#allocation7 + $0xd0] sm:$0xff] }
 0x72d   :  { %v7288_v19 = vadd.f32 %v1913_v5, %v1911_v16  ;;  %v2176_v5 = vld [vmem:[#allocation7 + $0xa8] sm:$0xff]  ;;  %v2178_v16 = vld [vmem:[#allocation7 + $0xb8] sm:$0xff] }
 0x72e   :  { %v7290_v18 = vadd.f32 %v1914_v62, %v1912_v7  ;;  %v5767_v46 = vpop.eup %5766  ;;  %v2175_v62 = vld [vmem:[#allocation7 + $0xa0] sm:$0xff]  ;;  %v2177_v7 = vld [vmem:[#allocation7 + $0xb0] sm:$0xff] }
 0x72f   :  { %5770 = vtanh.f32 %v7288_v19  ;;  %v5769_v21 = vpop.eup %5768 }
 0x730   :  { %5772 = vtanh.f32 %v7290_v18 }
 0x73c   :  { %v5771_v22 = vpop.eup %5770 }
 0x73d   :  { %v5773_v39 = vpop.eup %5772  ;;  %v1919_v23 = vmul.f32 %v5771_v22, %v5767_v46  ;;  %v2172_v46 = vld [vmem:[#allocation7 + $0x88] sm:$0xff]  ;;  %v2171_v22 = vld [vmem:[#allocation7 + $0x80] sm:$0xff] }
 0x73e   :  { %v1920_v24 = vmul.f32 %v5773_v39, %v5769_v21  ;;  %v2174_v21 = vld [vmem:[#allocation7 + $0x98] sm:$0xff]  ;;  %v2173_v39 = vld [vmem:[#allocation7 + $0x90] sm:$0xff] }
 0x73f   :  { %1921 = vst [vmem:[#allocation2] sm:$0x40] %v1919_v23  ;;  %v1925_v25 = vrot.slane %v1919_v23, 6  ;;  %v2168_v23 = vld [vmem:[#allocation7 + $0x68] sm:$0xff] }
 0x740   :  { %1922 = vst [vmem:[#allocation2 + $0x8] sm:$0x40] %v1920_v24  ;;  %v1926_v27 = vrot.slane %v1920_v24, 5  ;;  %v2170_v24 = vld [vmem:[#allocation7 + $0x78] sm:$0xff] }
 0x742   :  { %v1927_v29 = vsel %vm539_vm1, %v1926_v27, %v1925_v25  ;;  %v2167_v25 = vld [vmem:[#allocation7 + $0x60] sm:$0xff]  ;;  %v2169_v27 = vld [vmem:[#allocation7 + $0x70] sm:$0xff] }
 0x743   :  { %1994 = vmatmul.mubr.f32.vlgmr.msra.gmra.mxu0 %v1927_v29  ;;  %2065 = vmatmul.mubr.f32.vlgmr.msra.gmra.mxu1 %v1927_v29  ;;  %v2164_v29 = vld [vmem:[#allocation7 + $0x48] sm:$0xff] }
 0x744   :  { %2372 = vmatprep.mubr.f32.mxu0 %v8839_v20  ;;  %2449 = vmatprep.mubr.f32.mxu1 %v8839_v20 }
 0x745   :  { %2309 = vmatpush1.msra.mxu0 %v2215_v32  ;;  %2386 = vmatpush1.msra.mxu1 %v2217_v33  ;;  %v2165_v32 = vld [vmem:[#allocation7 + $0x50] sm:$0xff]  ;;  %v2160_v33 = vld [vmem:[#allocation7 + $0x28] sm:$0xff] }
 0x746   :  { %2310 = vmatprep.subr.mxu0 %v2212_v34  ;;  %2387 = vmatprep.subr.mxu1 %v2214_v36  ;;  %v2162_v34 = vld [vmem:[#allocation7 + $0x38] sm:$0xff]  ;;  %v2159_v36 = vld [vmem:[#allocation7 + $0x20] sm:$0xff] }
 0x747   :  { %2311 = vmatpush1.msra.mxu0 %v2211_v6  ;;  %2388 = vmatpush1.msra.mxu1 %v2213_v49  ;;  %v2161_v6 = vld [vmem:[#allocation7 + $0x30] sm:$0xff]  ;;  %v2156_v49 = vld [vmem:[#allocation7 + $0x8] sm:$0xff] }
 0x748   :  { %2312 = vmatprep.subr.mxu0 %v2208_v37  ;;  %2389 = vmatprep.subr.mxu1 %v2210_v38  ;;  %v2158_v37 = vld [vmem:[#allocation7 + $0x18] sm:$0xff]  ;;  %v2155_v38 = vld [vmem:[#allocation7] sm:$0xff] }
 0x749   :  { %2313 = vmatpush1.msra.mxu0 %v2207_v47  ;;  %2390 = vmatpush1.msra.mxu1 %v2209_v42  ;;  %v2157_v47 = vld [vmem:[#allocation7 + $0x10] sm:$0xff]  ;;  %v7297_v42 = vld [vmem:[#allocation7 + $0x3e8] sm:$0xff] }
 0x74a   :  { %2314 = vmatprep.subr.mxu0 %v2204_v51  ;;  %2391 = vmatprep.subr.mxu1 %v2206_v54  ;;  %8847 = vst [vmem:[#allocation14_spill] sm:$0xff] %v7297_v42  ;;  %v7299_v51 = vld [vmem:[#allocation7 + $0x3f8] sm:$0xff] }
 0x74b   :  { %2315 = vmatpush1.msra.mxu0 %v2203_v3  ;;  %2392 = vmatpush1.msra.mxu1 %v2205_v41  ;;  %8848 = vst [vmem:[#allocation16_spill] sm:$0xff] %v7299_v51 }
 0x74c   :  { %2316 = vmatprep.subr.mxu0 %v2200_v43  ;;  %2393 = vmatprep.subr.mxu1 %v2202_v52 }
 0x74d   :  { %2317 = vmatpush1.msra.mxu0 %v2199_v45  ;;  %2394 = vmatpush1.msra.mxu1 %v2201_v15 }
 0x74e   :  { %2318 = vmatprep.subr.mxu0 %v2196_v59  ;;  %2395 = vmatprep.subr.mxu1 %v2198_v48 }
 0x74f   :  { %2319 = vmatpush1.msra.mxu0 %v2195_v50  ;;  %2396 = vmatpush1.msra.mxu1 %v2197_v53 }
 0x750   :  { %2320 = vmatprep.subr.mxu0 %v2192_v40  ;;  %2397 = vmatprep.subr.mxu1 %v2194_v55 }
 0x751   :  { %2321 = vmatpush1.msra.mxu0 %v2191_v56  ;;  %2398 = vmatpush1.msra.mxu1 %v2193_v57 }
 0x752   :  { %2322 = vmatprep.subr.mxu0 %v2188_v58  ;;  %2399 = vmatprep.subr.mxu1 %v2190_v61 }
 0x753   :  { %2323 = vmatpush1.msra.mxu0 %v2187_v63  ;;  %2400 = vmatpush1.msra.mxu1 %v2189_v10 }
 0x754   :  { %2324 = vmatprep.subr.mxu0 %v2184_v1  ;;  %2401 = vmatprep.subr.mxu1 %v2186_v14 }
 0x755   :  { %2325 = vmatpush1.msra.mxu0 %v2183_v4  ;;  %2402 = vmatpush1.msra.mxu1 %v2185_v11 }
 0x756   :  { %2326 = vmatprep.subr.mxu0 %v2180_v8  ;;  %2403 = vmatprep.subr.mxu1 %v2182_v0 }
 0x757   :  { %2327 = vmatpush1.msra.mxu0 %v2179_v13  ;;  %2404 = vmatpush1.msra.mxu1 %v2181_v9 }
 0x758   :  { %2328 = vmatprep.subr.mxu0 %v2176_v5  ;;  %2405 = vmatprep.subr.mxu1 %v2178_v16 }
 0x759   :  { %2329 = vmatpush1.msra.mxu0 %v2175_v62  ;;  %2406 = vmatpush1.msra.mxu1 %v2177_v7 }
 0x75a   :  { %2330 = vmatprep.subr.mxu0 %v2172_v46  ;;  %2407 = vmatprep.subr.mxu1 %v2174_v21  ;;  %v2139_v21 = vrot.slane %v7288_v19, 7 }
 0x75b   :  { %2331 = vmatpush1.msra.mxu0 %v2171_v22  ;;  %2408 = vmatpush1.msra.mxu1 %v2173_v39 }
 0x75c   :  { %2332 = vmatprep.subr.mxu0 %v2168_v23  ;;  %2409 = vmatprep.subr.mxu1 %v2170_v24  ;;  %v2140_v23 = vrot.slane %v7290_v18, 7  ;;  %v7313_v18 = vld [vmem:[#allocation7 + $0x3e0] sm:$0xff] }
 0x75d   :  { %2333 = vmatpush1.msra.mxu0 %v2167_v25  ;;  %2410 = vmatpush1.msra.mxu1 %v2169_v27 }
 0x75e   :  { %2334 = vmatprep.subr.mxu0 %v2164_v29  ;;  %2411 = vmatprep.subr.mxu1 %v2166_v30 }
 0x75f   :  { %2335 = vmatpush1.msra.mxu0 %v2163_v31  ;;  %2412 = vmatpush1.msra.mxu1 %v2165_v32 }
 0x760   :  { %2336 = vmatprep.subr.mxu0 %v2160_v33  ;;  %2413 = vmatprep.subr.mxu1 %v2162_v34 }
 0x761   :  { %2337 = vmatpush1.msra.mxu0 %v2159_v36  ;;  %2414 = vmatpush1.msra.mxu1 %v2161_v6 }
 0x762   :  { %2338 = vmatprep.subr.mxu0 %v2156_v49  ;;  %2415 = vmatprep.subr.mxu1 %v2158_v37 }
 0x763   :  { %2339 = vmatpush1.msra.mxu0 %v2155_v38  ;;  %2416 = vmatpush1.msra.mxu1 %v2157_v47  ;;  %v7315_v38 = vld [vmem:[#allocation7 + $0x3f0] sm:$0xff] }
 0x764   :  { %2462 = vmatprep.subr.mxu0 %v7297_v42  ;;  %2533 = vmatprep.subr.mxu1 %v7299_v51 }
 0x803   :  { %v1995_v54 = vpop.f32.mrf.mxu0  ;;  %v2066_v15 = vpop.f32.mrf.mxu1 }
 0x804   :  { %v2075_v3 = vrot.slane %v1995_v54, 1  ;;  %v2079_v41 = vrot.slane %v1995_v54, 2  ;;  %v2077_v63 = vrot.slane %v2066_v15, 1  ;;  %v7317_v54 = vld [vmem:[#allocation7 + $0x3c8] sm:$0xff] }
 0x805   :  { %v1997_v43 = vpop.f32.mrf.mxu0  ;;  %v2068_v56 = vpop.f32.mrf.mxu1 }
 0x806   :  { %v2091_v52 = vadd.f32 %v2075_v3, %v8841_v26  ;;  %v2095_v45 = vadd.f32 %v2079_v41, %v8842_v28  ;;  %v2076_v59 = vrot.slane %v1997_v43, 1  ;;  %v2080_v48 = vrot.slane %v1997_v43, 2  ;;  %v7319_v3 = vld [vmem:[#allocation7 + $0x3d8] sm:$0xff]  ;;  %v7321_v41 = vld [vmem:[#allocation7 + $0x3c0] sm:$0xff]  ;;  %v7323_v43 = vld [vmem:[#allocation7 + $0x3d0] sm:$0xff] }
 0x807   :  { %v2078_v61 = vrot.slane %v2068_v56, 1  ;;  %v2082_v26 = vrot.slane %v2068_v56, 2  ;;  %v2081_v28 = vrot.slane %v2066_v15, 2  ;;  %v2093_v14 = vadd.f32 %v2077_v63, %v8845_v44  ;;  %v7337_v15 = vld [vmem:[#allocation7 + $0x3a0] sm:$0xff]  ;;  %v7353_v56 = vld [vmem:[#allocation7 + $0x368] sm:$0xff]  ;;  %v7367_v63 = vld [vmem:[#allocation7 + $0x358] sm:$0xff] }
 0x808   :  { %v5371_v50 = vmul.f32 -1.442695, %v2091_v52  ;;  %v5372_v53 = vmul.f32 -1.442695, %v2095_v45  ;;  %v2092_v40 = vadd.f32 %v2076_v59, %v8843_v35  ;;  %v2096_v55 = vadd.f32 %v2080_v48, %v8844_v12  ;;  %v7329_v52 = vld [vmem:[#allocation7 + $0x3a8] sm:$0xff]  ;;  %v7331_v45 = vld [vmem:[#allocation7 + $0x3b8] sm:$0xff] }
 0x809   :  { %v2094_v10 = vadd.f32 %v2078_v61, %v6654_v2  ;;  %v2098_v1 = vadd.f32 %v2082_v26, %v8729_v17  ;;  %v2097_v35 = vadd.f32 %v2081_v28, %v8846_v60  ;;  %v7339_v59 = vld [vmem:[#allocation7 + $0x3b0] sm:$0xff]  ;;  %v7365_v26 = vld [vmem:[#allocation7 + $0x348] sm:$0xff]  ;;  %v7371_v28 = vld [vmem:[#allocation7 + $0x340] sm:$0xff] }
 0x80a   :  { %5774 = vpow2.f32 %v5371_v50  ;;  %v5373_v57 = vmul.f32 -1.442695, %v2092_v40  ;;  %v5374_v58 = vmul.f32 -1.442695, %v2096_v55  ;;  %v7343_v50 = vld [vmem:[#allocation7 + $0x388] sm:$0xff]  ;;  %v7347_v40 = vld [vmem:[#allocation7 + $0x380] sm:$0xff] }
 0x80b   :  { %5776 = vpow2.f32 %v5372_v53  ;;  %v5375_v12 = vmul.f32 -1.442695, %v2094_v10  ;;  %v5376_v4 = vmul.f32 -1.442695, %v2098_v1  ;;  %v7345_v53 = vld [vmem:[#allocation7 + $0x398] sm:$0xff]  ;;  %v7349_v55 = vld [vmem:[#allocation7 + $0x390] sm:$0xff] }
 0x80c   :  { %5778 = vpow2.f32 %v5373_v57  ;;  %v7355_v57 = vld [vmem:[#allocation7 + $0x378] sm:$0xff]  ;;  %v7361_v61 = vld [vmem:[#allocation7 + $0x370] sm:$0xff]  ;;  %v7377_v1 = vld [vmem:[#allocation7 + $0x328] sm:$0xff] }
 0x80d   :  { %5780 = vpow2.f32 %v5374_v58  ;;  %v7359_v58 = vld [vmem:[#allocation7 + $0x360] sm:$0xff]  ;;  %v7373_v10 = vld [vmem:[#allocation7 + $0x350] sm:$0xff] }
 0x80e   :  { %5782 = vtanh.f32 %v2093_v14  ;;  %v7379_v14 = vld [vmem:[#allocation7 + $0x338] sm:$0xff] }
 0x80f   :  { %5784 = vtanh.f32 %v2097_v35  ;;  %v7383_v35 = vld [vmem:[#allocation7 + $0x320] sm:$0xff] }
 0x810   :  { %5786 = vpow2.f32 %v5375_v12  ;;  %v7385_v12 = vld [vmem:[#allocation7 + $0x330] sm:$0xff] }
 0x811   :  { %5788 = vpow2.f32 %v5376_v4  ;;  %v7389_v4 = vld [vmem:[#allocation7 + $0x308] sm:$0xff] }
 0x817   :  { %v5775_v11 = vpop.eup %5774 }
 0x818   :  { %v5777_v8 = vpop.eup %5776  ;;  %v2105_v0 = vadd.f32 1.0, %v5775_v11  ;;  %v7391_v11 = vld [vmem:[#allocation7 + $0x318] sm:$0xff] }
 0x819   :  { %v2106_v13 = vadd.f32 1.0, %v5777_v8  ;;  %v5779_v9 = vpop.eup %5778  ;;  %v7395_v8 = vld [vmem:[#allocation7 + $0x300] sm:$0xff] }
 0x81a   :  { %v5781_v5 = vpop.eup %5780  ;;  %5790 = vrcp.f32 %v2105_v0  ;;  %v2117_v2 = vadd.f32 1.0, %v5779_v9  ;;  %v7397_v0 = vld [vmem:[#allocation7 + $0x310] sm:$0xff]  ;;  %v7403_v9 = vld [vmem:[#allocation7 + $0x2f8] sm:$0xff] }
 0x81b   :  { %5792 = vrcp.f32 %v2106_v13  ;;  %v2118_v17 = vadd.f32 1.0, %v5781_v5  ;;  %v5783_v44 = vpop.eup %5782  ;;  %v7401_v13 = vld [vmem:[#allocation7 + $0x2e8] sm:$0xff]  ;;  %v7407_v5 = vld [vmem:[#allocation7 + $0x2e0] sm:$0xff] }
 0x81c   :  { %5794 = vrcp.f32 %v2117_v2  ;;  %v5785_v60 = vpop.eup %5784  ;;  %v7409_v2 = vld [vmem:[#allocation7 + $0x2f0] sm:$0xff] }
 0x81d   :  { %5796 = vrcp.f32 %v2118_v17  ;;  %v5787_v16 = vpop.eup %5786  ;;  %v7413_v17 = vld [vmem:[#allocation7 + $0x2c8] sm:$0xff] }
 0x81e   :  { %v5789_v62 = vpop.eup %5788  ;;  %v2131_v22 = vadd.f32 1.0, %v5787_v16  ;;  %v7421_v16 = vld [vmem:[#allocation7 + $0x2d0] sm:$0xff] }
 0x81f   :  { %v2132_v24 = vadd.f32 1.0, %v5789_v62  ;;  %v7425_v62 = vld [vmem:[#allocation7 + $0x2a8] sm:$0xff] }
 0x820   :  { %5798 = vrcp.f32 %v2131_v22  ;;  %8849 = vst [vmem:[#allocation15_spill] sm:$0xff] %v7425_v62  ;;  %v7437_v22 = vld [vmem:[#allocation7 + $0x288] sm:$0xff] }
 0x821   :  { %5800 = vrcp.f32 %v2132_v24  ;;  %8853 = vst [vmem:[#allocation19_spill] sm:$0xff] %v7437_v22  ;;  %v7445_v24 = vld [vmem:[#allocation7 + $0x290] sm:$0xff] }
 0x822   :  { %8856 = vst [vmem:[#allocation22_spill] sm:$0xff] %v7445_v24 }
 0x827   :  { %v5791_v7 = vpop.eup %5790 }
 0x828   :  { %v5793_v46 = vpop.eup %5792  ;;  %v2145_v27 = vmul.f32 %v5791_v7, %v5783_v44  ;;  %v7415_v44 = vld [vmem:[#allocation7 + $0x2d8] sm:$0xff] }
 0x829   :  { %v5795_v39 = vpop.eup %5794  ;;  %v2146_v30 = vmul.f32 %v5793_v46, %v5785_v60  ;;  %v7419_v60 = vld [vmem:[#allocation7 + $0x2c0] sm:$0xff]  ;;  %v7427_v7 = vld [vmem:[#allocation7 + $0x2b8] sm:$0xff] }
 0x82a   :  { %v5797_v25 = vpop.eup %5796  ;;  %v2143_v29 = vmul.f32 %v5795_v39, %v2139_v21  ;;  %8850 = vst [vmem:[#allocation13_spill] sm:$0xff] %v7427_v7  ;;  %v7431_v46 = vld [vmem:[#allocation7 + $0x2a0] sm:$0xff]  ;;  %v7433_v21 = vld [vmem:[#allocation7 + $0x2b0] sm:$0xff]  ;;  %v7439_v39 = vld [vmem:[#allocation7 + $0x298] sm:$0xff] }
 0x82b   :  { %v2144_v31 = vmul.f32 %v5797_v25, %v2140_v23  ;;  %8851 = vst [vmem:[#allocation17_spill] sm:$0xff] %v7431_v46  ;;  %8852 = vst [vmem:[#allocation18_spill] sm:$0xff] %v7433_v21  ;;  %v7443_v23 = vld [vmem:[#allocation7 + $0x280] sm:$0xff]  ;;  %v7449_v25 = vld [vmem:[#allocation7 + $0x268] sm:$0xff] }
 0x82c   :  { %v2147_v32 = vadd.f32 %v2145_v27, %v2143_v29  ;;  %8854 = vst [vmem:[#allocation20_spill] sm:$0xff] %v7439_v39  ;;  %8855 = vst [vmem:[#allocation21_spill] sm:$0xff] %v7443_v23  ;;  %v7451_v27 = vld [vmem:[#allocation7 + $0x278] sm:$0xff]  ;;  %v7455_v29 = vld [vmem:[#allocation7 + $0x260] sm:$0xff] }
 0x82d   :  { %v2148_v33 = vadd.f32 %v2146_v30, %v2144_v31  ;;  %v5799_v34 = vpop.eup %5798  ;;  %8857 = vst [vmem:[#allocation23_spill] sm:$0xff] %v7449_v25  ;;  %8858 = vst [vmem:[#allocation24_spill] sm:$0xff] %v7451_v27  ;;  %v7457_v30 = vld [vmem:[#allocation7 + $0x270] sm:$0xff]  ;;  %v7461_v31 = vld [vmem:[#allocation7 + $0x248] sm:$0xff] }
 0x82e   :  { %5802 = vtanh.f32 %v2147_v32  ;;  %v5801_v36 = vpop.eup %5800  ;;  %8859 = vst [vmem:[#allocation25_spill] sm:$0xff] %v7455_v29  ;;  %8860 = vst [vmem:[#allocation26_spill] sm:$0xff] %v7457_v30  ;;  %v7463_v32 = vld [vmem:[#allocation7 + $0x258] sm:$0xff] }
 0x82f   :  { %5804 = vtanh.f32 %v2148_v33  ;;  %8861 = vst [vmem:[#allocation27_spill] sm:$0xff] %v7461_v31  ;;  %8862 = vst [vmem:[#allocation28_spill] sm:$0xff] %v7463_v32  ;;  %v7467_v33 = vld [vmem:[#allocation7 + $0x240] sm:$0xff] }
 0x830   :  { %8863 = vst [vmem:[#allocation29_spill] sm:$0xff] %v7467_v33 }
 0x83b   :  { %v5803_v6 = vpop.eup %5802 }
 0x83c   :  { %v5805_v19 = vpop.eup %5804  ;;  %v2151_v49 = vmul.f32 %v5803_v6, %v5799_v34  ;;  %v7469_v34 = vld [vmem:[#allocation7 + $0x250] sm:$0xff]  ;;  %v7475_v6 = vld [vmem:[#allocation7 + $0x238] sm:$0xff] }
 0x83d   :  { %v2152_v37 = vmul.f32 %v5805_v19, %v5801_v36  ;;  %8864 = vst [vmem:[#allocation30_spill] sm:$0xff] %v7469_v34  ;;  %v7473_v36 = vld [vmem:[#allocation7 + $0x228] sm:$0xff]  ;;  %8866 = vst [vmem:[#allocation32_spill] sm:$0xff] %v7475_v6  ;;  %v7479_v19 = vld [vmem:[#allocation7 + $0x220] sm:$0xff] }
 0x83e   :  { %2153 = vst [vmem:[#allocation2] sm:$0x80] %v2151_v49  ;;  %8865 = vst [vmem:[#allocation31_spill] sm:$0xff] %v7473_v36  ;;  %v7481_v49 = vld [vmem:[#allocation7 + $0x230] sm:$0xff] }
 0x83f   :  { %2154 = vst [vmem:[#allocation2 + $0x8] sm:$0x80] %v2152_v37  ;;  %8867 = vst [vmem:[#allocation33_spill] sm:$0xff] %v7479_v19  ;;  %v7485_v37 = vld [vmem:[#allocation7 + $0x208] sm:$0xff] }
 0x840   :  { %8868 = vst [vmem:[#allocation34_spill] sm:$0xff] %v7481_v49  ;;  %8869 = vst [vmem:[#allocation35_spill] sm:$0xff] %v7485_v37 }
 0x845   :  { %v2285_v47 = vld [vmem:[#allocation2] sm:$0xff] }
 0x846   :  { %2373 = vmatmul.mubr.f32.vlgmr.msra.gmra.mxu0 %v2285_v47  ;;  %2450 = vmatmul.mubr.f32.vlgmr.msra.gmra.mxu1 %v2285_v47  ;;  %v2286_v48 = vld [vmem:[#allocation2 + $0x8] sm:$0xff]  ;;  %v7487_v47 = vld [vmem:[#allocation7 + $0x218] sm:$0xff] }
 0x847   :  { %2463 = vmatpush1.msra.mxu0 %v7313_v18  ;;  %2534 = vmatpush1.msra.mxu1 %v7315_v38  ;;  %8870 = vst [vmem:[#allocation36_spill] sm:$0xff] %v7487_v47 }
 0x848   :  { %2464 = vmatprep.subr.mxu0 %v7317_v54  ;;  %2535 = vmatprep.subr.mxu1 %v7319_v3 }
 0x849   :  { %2465 = vmatpush1.msra.mxu0 %v7321_v41  ;;  %2536 = vmatpush1.msra.mxu1 %v7323_v43 }
 0x84a   :  { %2378 = vmatprep.mubr.f32.mxu0 %v8839_v20  ;;  %2455 = vmatprep.mubr.f32.mxu1 %v8839_v20 }
 0x84b   :  { %2466 = vmatprep.subr.mxu0 %v7329_v52  ;;  %2537 = vmatprep.subr.mxu1 %v7331_v45 }
 0x84c   :  { %2379 = vmatmul.mubr.f32.gmra.mxu0 %v2286_v48  ;;  %2456 = vmatmul.mubr.f32.gmra.mxu1 %v2286_v48  ;;  %v7491_v48 = vld [vmem:[#allocation7 + $0x200] sm:$0xff] }
 0x84d   :  { %2467 = vmatpush1.msra.mxu0 %v7337_v15  ;;  %2538 = vmatpush1.msra.mxu1 %v7339_v59  ;;  %8871 = vst [vmem:[#allocation37_spill] sm:$0xff] %v7491_v48 }
 0x84e   :  { %2468 = vmatprep.subr.mxu0 %v7343_v50  ;;  %2539 = vmatprep.subr.mxu1 %v7345_v53 }
 0x84f   :  { %2469 = vmatpush1.msra.mxu0 %v7347_v40  ;;  %2540 = vmatpush1.msra.mxu1 %v7349_v55 }
 0x850   :  { %2470 = vmatprep.subr.mxu0 %v7353_v56  ;;  %2541 = vmatprep.subr.mxu1 %v7355_v57 }
 0x851   :  { %2471 = vmatpush1.msra.mxu0 %v7359_v58  ;;  %2542 = vmatpush1.msra.mxu1 %v7361_v61 }
 0x852   :  { %2472 = vmatprep.subr.mxu0 %v7365_v26  ;;  %2543 = vmatprep.subr.mxu1 %v7367_v63 }
 0x853   :  { %2473 = vmatpush1.msra.mxu0 %v7371_v28  ;;  %2544 = vmatpush1.msra.mxu1 %v7373_v10 }
 0x854   :  { %2474 = vmatprep.subr.mxu0 %v7377_v1  ;;  %2545 = vmatprep.subr.mxu1 %v7379_v14 }
 0x855   :  { %2475 = vmatpush1.msra.mxu0 %v7383_v35  ;;  %2546 = vmatpush1.msra.mxu1 %v7385_v12 }
 0x856   :  { %2476 = vmatprep.subr.mxu0 %v7389_v4  ;;  %2547 = vmatprep.subr.mxu1 %v7391_v11 }
 0x857   :  { %2477 = vmatpush1.msra.mxu0 %v7395_v8  ;;  %2548 = vmatpush1.msra.mxu1 %v7397_v0 }
 0x858   :  { %2478 = vmatprep.subr.mxu0 %v7401_v13  ;;  %2549 = vmatprep.subr.mxu1 %v7403_v9 }
 0x859   :  { %2479 = vmatpush1.msra.mxu0 %v7407_v5  ;;  %2550 = vmatpush1.msra.mxu1 %v7409_v2 }
 0x85a   :  { %2480 = vmatprep.subr.mxu0 %v7413_v17  ;;  %2551 = vmatprep.subr.mxu1 %v7415_v44 }
 0x85b   :  { %2481 = vmatpush1.msra.mxu0 %v7419_v60  ;;  %2552 = vmatpush1.msra.mxu1 %v7421_v16 }
 0x85c   :  { %2482 = vmatprep.subr.mxu0 %v7425_v62  ;;  %2553 = vmatprep.subr.mxu1 %v7427_v7 }
 0x85d   :  { %2483 = vmatpush1.msra.mxu0 %v7431_v46  ;;  %2554 = vmatpush1.msra.mxu1 %v7433_v21 }
 0x85e   :  { %2484 = vmatprep.subr.mxu0 %v7437_v22  ;;  %2555 = vmatprep.subr.mxu1 %v7439_v39 }
 0x85f   :  { %2485 = vmatpush1.msra.mxu0 %v7443_v23  ;;  %2556 = vmatpush1.msra.mxu1 %v7445_v24 }
 0x860   :  { %2486 = vmatprep.subr.mxu0 %v7449_v25  ;;  %2557 = vmatprep.subr.mxu1 %v7451_v27 }
 0x861   :  { %2487 = vmatpush1.msra.mxu0 %v7455_v29  ;;  %2558 = vmatpush1.msra.mxu1 %v7457_v30 }
 0x862   :  { %2488 = vmatprep.subr.mxu0 %v7461_v31  ;;  %2559 = vmatprep.subr.mxu1 %v7463_v32  ;;  %v7495_v32 = vld [vmem:[#allocation7 + $0x210] sm:$0xff] }
 0x863   :  { %2489 = vmatpush1.msra.mxu0 %v7467_v33  ;;  %2560 = vmatpush1.msra.mxu1 %v7469_v34  ;;  %8872 = vst [vmem:[#allocation43_spill] sm:$0xff] %v7495_v32 }
 0x864   :  { %2490 = vmatprep.subr.mxu0 %v7473_v36  ;;  %2561 = vmatprep.subr.mxu1 %v7475_v6 }
 0x865   :  { %2491 = vmatpush1.msra.mxu0 %v7479_v19  ;;  %2562 = vmatpush1.msra.mxu1 %v7481_v49 }
 0x866   :  { %2492 = vmatprep.subr.mxu0 %v7485_v37  ;;  %2563 = vmatprep.subr.mxu1 %v7487_v47 }
 0x867   :  { %2493 = vmatpush1.msra.mxu0 %v7491_v48  ;;  %2526 = vmatprep.mubr.f32.mxu0 %v8839_v20 }
 0x868   :  { %2564 = vmatpush1.msra.mxu1 %v7495_v32  ;;  %2597 = vmatprep.mubr.f32.mxu1 %v8839_v20 }
 0x869   :  { %2527 = vmatmul.mubr.f32.vlgmr.msra.gmra.mxu0 %v8839_v20  ;;  %2598 = vmatmul.mubr.f32.vlgmr.msra.gmra.mxu1 %v8839_v20 }
 0x86a   :  { %2684 = vmatprep.subr.mxu0 %v7297_v42  ;;  %2755 = vmatprep.subr.mxu1 %v7299_v51 }
 0x86b   :  { %2685 = vmatpush1.msra.mxu0 %v7313_v18  ;;  %2756 = vmatpush1.msra.mxu1 %v7315_v38 }
 0x86c   :  { %2686 = vmatprep.subr.mxu0 %v7317_v54  ;;  %2757 = vmatprep.subr.mxu1 %v7319_v3 }
 0x86d   :  { %2687 = vmatpush1.msra.mxu0 %v7321_v41  ;;  %2758 = vmatpush1.msra.mxu1 %v7323_v43 }
 0x86e   :  { %2688 = vmatprep.subr.mxu0 %v7329_v52  ;;  %2759 = vmatprep.subr.mxu1 %v7331_v45 }
 0x86f   :  { %2689 = vmatpush1.msra.mxu0 %v7337_v15  ;;  %2760 = vmatpush1.msra.mxu1 %v7339_v59 }
 0x870   :  { %2690 = vmatprep.subr.mxu0 %v7343_v50  ;;  %2761 = vmatprep.subr.mxu1 %v7345_v53 }
 0x871   :  { %2691 = vmatpush1.msra.mxu0 %v7347_v40  ;;  %2762 = vmatpush1.msra.mxu1 %v7349_v55 }
 0x872   :  { %2692 = vmatprep.subr.mxu0 %v7353_v56  ;;  %2763 = vmatprep.subr.mxu1 %v7355_v57 }
 0x873   :  { %2693 = vmatpush1.msra.mxu0 %v7359_v58  ;;  %2764 = vmatpush1.msra.mxu1 %v7361_v61 }
 0x874   :  { %2694 = vmatprep.subr.mxu0 %v7365_v26  ;;  %2765 = vmatprep.subr.mxu1 %v7367_v63 }
 0x875   :  { %2695 = vmatpush1.msra.mxu0 %v7371_v28  ;;  %2766 = vmatpush1.msra.mxu1 %v7373_v10 }
 0x876   :  { %2696 = vmatprep.subr.mxu0 %v7377_v1  ;;  %2767 = vmatprep.subr.mxu1 %v7379_v14 }
 0x877   :  { %2697 = vmatpush1.msra.mxu0 %v7383_v35  ;;  %2768 = vmatpush1.msra.mxu1 %v7385_v12 }
 0x878   :  { %2698 = vmatprep.subr.mxu0 %v7389_v4  ;;  %2769 = vmatprep.subr.mxu1 %v7391_v11 }
 0x879   :  { %2699 = vmatpush1.msra.mxu0 %v7395_v8  ;;  %2770 = vmatpush1.msra.mxu1 %v7397_v0 }
 0x87a   :  { %2700 = vmatprep.subr.mxu0 %v7401_v13  ;;  %2771 = vmatprep.subr.mxu1 %v7403_v9 }
 0x87b   :  { %2701 = vmatpush1.msra.mxu0 %v7407_v5  ;;  %2772 = vmatpush1.msra.mxu1 %v7409_v2 }
 0x87c   :  { %2702 = vmatprep.subr.mxu0 %v7413_v17  ;;  %2773 = vmatprep.subr.mxu1 %v7415_v44 }
 0x87d   :  { %2703 = vmatpush1.msra.mxu0 %v7419_v60  ;;  %2774 = vmatpush1.msra.mxu1 %v7421_v16 }
 0x87e   :  { %2704 = vmatprep.subr.mxu0 %v7425_v62  ;;  %2775 = vmatprep.subr.mxu1 %v7427_v7 }
 0x87f   :  { %2705 = vmatpush1.msra.mxu0 %v7431_v46  ;;  %2776 = vmatpush1.msra.mxu1 %v7433_v21  ;;  %v8873_v46 = vld [vmem:[#allocation28_spill] sm:$0xff] }
 0x880   :  { %2706 = vmatprep.subr.mxu0 %v7437_v22  ;;  %2777 = vmatprep.subr.mxu1 %v7439_v39 }
 0x881   :  { %2707 = vmatpush1.msra.mxu0 %v7443_v23  ;;  %2778 = vmatpush1.msra.mxu1 %v7445_v24 }
 0x882   :  { %2708 = vmatprep.subr.mxu0 %v7449_v25  ;;  %2779 = vmatprep.subr.mxu1 %v7451_v27 }
 0x883   :  { %2709 = vmatpush1.msra.mxu0 %v7455_v29  ;;  %2780 = vmatpush1.msra.mxu1 %v7457_v30 }
 0x884   :  { %2710 = vmatprep.subr.mxu0 %v7461_v31  ;;  %2781 = vmatprep.subr.mxu1 %v8873_v46 }
 0x885   :  { %2711 = vmatpush1.msra.mxu0 %v7467_v33  ;;  %2782 = vmatpush1.msra.mxu1 %v7469_v34  ;;  %v8874_v33 = vld [vmem:[#allocation38_spill] sm:$0xff] }
 0x886   :  { %2712 = vmatprep.subr.mxu0 %v7473_v36  ;;  %2783 = vmatprep.subr.mxu1 %v7475_v6  ;;  %v8876_v31 = vsub.s32 1, %v8874_v33 }
 0x887   :  { %2713 = vmatpush1.msra.mxu0 %v7479_v19  ;;  %2784 = vmatpush1.msra.mxu1 %v7481_v49  ;;  %v2284_v49 = vld [vmem:[#allocation7 + $0x400] ss:$8 sm:$0xf] }
 0x888   :  { %2714 = vmatprep.subr.mxu0 %v7485_v37  ;;  %2785 = vmatprep.subr.mxu1 %v7487_v47  ;;  %v8875_v47 = vsub.s32 0, %v8874_v33  ;;  %v2295_v30 = vrot.slane %v2284_v49, %v8876_v31 }
 0x889   :  { %2715 = vmatpush1.msra.mxu0 %v7491_v48  ;;  %2748 = vmatprep.mubr.f32.mxu0 %v8839_v20 }
 0x88a   :  { %2786 = vmatpush1.msra.mxu1 %v7495_v32  ;;  %2819 = vmatprep.mubr.f32.mxu1 %v8839_v20  ;;  %v2291_v46 = vrot.slane %v2284_v49, %v8875_v47 }
 0x88b   :  { %2912 = vmatprep.subr.mxu0 %v7297_v42  ;;  %2983 = vmatprep.subr.mxu1 %v7299_v51 }
 0x906   :  { %v2374_v6 = vpop.f32.mrf.mxu0  ;;  %v2451_v19 = vpop.f32.mrf.mxu1 }
 0x907   :  { %v7577_v29 = vadd.f32 %v2374_v6, %v2291_v46 }
 0x908   :  { %v2376_v36 = vpop.f32.mrf.mxu0  ;;  %v2453_v34 = vpop.f32.mrf.mxu1 }
 0x909   :  { %8877 = vst [vmem:[#allocation39_spill] sm:$0xff] %v7577_v29  ;;  %v7582_v24 = vadd.f32 %v2376_v36, %v2295_v30 }
 0x90c   :  { %v2380_v37 = vpop.f32.mrf.mxu0  ;;  %v2457_v48 = vpop.f32.mrf.mxu1 }
 0x90d   :  { %v7579_v27 = vadd.f32 %v2380_v37, %v2291_v46  ;;  %v8880_v46 = vsub.s32 3, %v8874_v33 }
 0x90e   :  { %v2382_v32 = vpop.f32.mrf.mxu0  ;;  %v2459_v20 = vpop.f32.mrf.mxu1 }
 0x90f   :  { %8878 = vst [vmem:[#allocation40_spill] sm:$0xff] %v7579_v27  ;;  %v7585_v21 = vadd.f32 %v2382_v32, %v2295_v30  ;;  %v2303_v37 = vrot.slane %v2284_v49, %v8880_v46 }
 0x911   :  { %8879 = vst [vmem:[#allocation41_spill] sm:$0xff] %v7585_v21  ;;  %v7593_v32 = vadd.f32 %v2453_v34, %v2303_v37 }
 0x929   :  { %v2528_v42 = vpop.f32.mrf.mxu0  ;;  %v2599_v23 = vpop.f32.mrf.mxu1 }
 0x92a   :  { %v2608_v51 = vrot.slane %v2528_v42, 1  ;;  %v2620_v25 = vadd.f32 %v2528_v42, %v7577_v29  ;;  %v2610_v46 = vrot.slane %v2599_v23, 1 }
 0x92b   :  { %v2530_v39 = vpop.f32.mrf.mxu0  ;;  %v2601_v36 = vpop.f32.mrf.mxu1 }
 0x92c   :  { %v2624_v47 = vadd.f32 %v2608_v51, %v7579_v27  ;;  %v5377_v22 = vmul.f32 -1.442695, %v2620_v25  ;;  %v2609_v31 = vrot.slane %v2530_v39, 1  ;;  %v2621_v6 = vadd.f32 %v2530_v39, %v7582_v24 }
 0x92d   :  { %v8881_v51 = vsub.s32 2, %v8874_v33  ;;  %v2611_v30 = vrot.slane %v2601_v36, 1  ;;  %v7595_v39 = vadd.f32 %v2459_v20, %v2303_v37 }
 0x92e   :  { %5806 = vpow2.f32 %v5377_v22  ;;  %v5378_v7 = vmul.f32 -1.442695, %v2624_v47  ;;  %v2625_v62 = vadd.f32 %v2609_v31, %v7585_v21  ;;  %v5379_v42 = vmul.f32 -1.442695, %v2621_v6 }
 0x92f   :  { %v2299_v25 = vrot.slane %v2284_v49, %v8881_v51  ;;  %8882 = vst [vmem:[#allocation42_spill] sm:$0xff] %v7595_v39  ;;  %v2623_v22 = vadd.f32 %v2601_v36, %v7593_v32  ;;  %v2627_v31 = vadd.f32 %v2611_v30, %v7595_v39 }
 0x930   :  { %5808 = vpow2.f32 %v5378_v7  ;;  %v5380_v29 = vmul.f32 -1.442695, %v2625_v62 }
 0x931   :  { %5810 = vpow2.f32 %v5379_v42  ;;  %v7598_v47 = vadd.f32 %v2451_v19, %v2299_v25  ;;  %v5381_v7 = vmul.f32 -1.442695, %v2623_v22  ;;  %v5382_v62 = vmul.f32 -1.442695, %v2627_v31 }
 0x932   :  { %5812 = vpow2.f32 %v5380_v29  ;;  %v7602_v33 = vadd.f32 %v2457_v48, %v2299_v25 }
 0x933   :  { %8883 = vst [vmem:[#allocation44_spill] sm:$0xff] %v7598_v47  ;;  %v2622_v6 = vadd.f32 %v2599_v23, %v7598_v47 }
 0x934   :  { %8884 = vst [vmem:[#allocation45_spill] sm:$0xff] %v7602_v33  ;;  %v2626_v37 = vadd.f32 %v2610_v46, %v7602_v33 }
 0x935   :  { %5814 = vtanh.f32 %v2622_v6 }
 0x936   :  { %5816 = vpow2.f32 %v5381_v7 }
 0x937   :  { %5818 = vpow2.f32 %v5382_v62 }
 0x93b   :  { %v5807_v42 = vpop.eup %5806 }
 0x93c   :  { %v2634_v49 = vadd.f32 1.0, %v5807_v42 }
 0x93d   :  { %v5809_v34 = vpop.eup %5808 }
 0x93e   :  { %v5811_v20 = vpop.eup %5810  ;;  %v2635_v29 = vadd.f32 1.0, %v5809_v34  ;;  %5820 = vrcp.f32 %v2634_v49 }
 0x93f   :  { %v2646_v19 = vadd.f32 1.0, %v5811_v20  ;;  %v5813_v36 = vpop.eup %5812 }
 0x940   :  { %5822 = vrcp.f32 %v2635_v29  ;;  %v2647_v51 = vadd.f32 1.0, %v5813_v36 }
 0x941   :  { %5824 = vrcp.f32 %v2646_v19 }
 0x942   :  { %5826 = vtanh.f32 %v2626_v37  ;;  %v5815_v23 = vpop.eup %5814 }
 0x943   :  { %5828 = vrcp.f32 %v2647_v51  ;;  %v5817_v48 = vpop.eup %5816 }
 0x944   :  { %v5819_v25 = vpop.eup %5818  ;;  %v2660_v6 = vadd.f32 1.0, %v5817_v48 }
 0x945   :  { %v2661_v62 = vadd.f32 1.0, %v5819_v25 }
 0x946   :  { %5830 = vrcp.f32 %v2660_v6  ;;  %v8887_v6 = vld [vmem:[#allocation17_spill] sm:$0xff] }
 0x94b   :  { %v5821_v30 = vpop.eup %5820 }
 0x94c   :  { %v2668_v34 = vmul.f32 %v5821_v30, %v5815_v23 }
 0x94d   :  { %v5823_v22 = vpop.eup %5822 }
 0x94e   :  { %v5825_v31 = vpop.eup %5824 }
 0x94f   :  { %v5827_v7 = vpop.eup %5826  ;;  %v2666_v42 = vmul.f32 0.0, %v5825_v31  ;;  %v8886_v31 = vld [vmem:[#allocation13_spill] sm:$0xff] }
 0x950   :  { %v5829_v46 = vpop.eup %5828  ;;  %v2669_v20 = vmul.f32 %v5827_v7, %v5823_v22  ;;  %v8885_v22 = vld [vmem:[#allocation15_spill] sm:$0xff]  ;;  %v8888_v7 = vld [vmem:[#allocation18_spill] sm:$0xff] }
 0x951   :  { %v2667_v49 = vmul.f32 0.0, %v5829_v46  ;;  %v7605_v47 = vadd.f32 %v2668_v34, %v2666_v42  ;;  %v8889_v42 = vld [vmem:[#allocation19_spill] sm:$0xff]  ;;  %v8890_v34 = vld [vmem:[#allocation20_spill] sm:$0xff]  ;;  %v8891_v46 = vld [vmem:[#allocation21_spill] sm:$0xff] }
 0x953   :  { %v7607_v29 = vadd.f32 %v2669_v20, %v2667_v49  ;;  %5832 = vtanh.f32 %v7605_v47  ;;  %v5831_v37 = vpop.eup %5830  ;;  %v8893_v49 = vld [vmem:[#allocation23_spill] sm:$0xff]  ;;  %v8894_v20 = vld [vmem:[#allocation24_spill] sm:$0xff] }
 0x954   :  { %5834 = vrcp.f32 %v2661_v62  ;;  %v8892_v62 = vld [vmem:[#allocation22_spill] sm:$0xff] }
 0x955   :  { %5836 = vtanh.f32 %v7607_v29 }
 0x960   :  { %v5833_v19 = vpop.eup %5832 }
 0x961   :  { %v5835_v36 = vpop.eup %5834  ;;  %v2674_v51 = vmul.f32 %v5833_v19, %v5831_v37  ;;  %v8895_v37 = vld [vmem:[#allocation25_spill] sm:$0xff]  ;;  %v8896_v19 = vld [vmem:[#allocation26_spill] sm:$0xff] }
 0x962   :  { %v5837_v23 = vpop.eup %5836 }
 0x963   :  { %v2675_v48 = vmul.f32 %v5837_v23, %v5835_v36  ;;  %2677 = vst.msk [vmem:[#allocation3] sm:$0x1] %vm2676_vm2, %v2674_v51  ;;  %v8897_v36 = vld [vmem:[#allocation27_spill] sm:$0xff]  ;;  %v8899_v23 = vld [vmem:[#allocation29_spill] sm:$0xff] }
 0x965   :  { %2678 = vst.msk [vmem:[#allocation3 + $0x8] sm:$0x1] %vm2676_vm2, %v2675_v48  ;;  %v2681_v25 = vrot.slane %v2675_v48, 7  ;;  %v8900_v48 = vld [vmem:[#allocation30_spill] sm:$0xff] }
 0x967   :  { %v2682_v30 = vsel %vm539_vm1, %v2681_v25, %v2674_v51  ;;  %v8898_v51 = vld [vmem:[#allocation28_spill] sm:$0xff]  ;;  %v8901_v25 = vld [vmem:[#allocation31_spill] sm:$0xff] }
 0x968   :  { %2749 = vmatmul.mubr.f32.vlgmr.msra.gmra.mxu0 %v2682_v30  ;;  %2820 = vmatmul.mubr.f32.vlgmr.msra.gmra.mxu1 %v2682_v30  ;;  %v8902_v30 = vld [vmem:[#allocation32_spill] sm:$0xff] }
 0x969   :  { %2913 = vmatpush1.msra.mxu0 %v7313_v18  ;;  %2984 = vmatpush1.msra.mxu1 %v7315_v38 }
 0x96a   :  { %2914 = vmatprep.subr.mxu0 %v7317_v54  ;;  %2985 = vmatprep.subr.mxu1 %v7319_v3 }
 0x96b   :  { %2915 = vmatpush1.msra.mxu0 %v7321_v41  ;;  %2986 = vmatpush1.msra.mxu1 %v7323_v43 }
 0x96c   :  { %2916 = vmatprep.subr.mxu0 %v7329_v52  ;;  %2987 = vmatprep.subr.mxu1 %v7331_v45 }
 0x96d   :  { %2917 = vmatpush1.msra.mxu0 %v7337_v15  ;;  %2988 = vmatpush1.msra.mxu1 %v7339_v59 }
 0x96e   :  { %2918 = vmatprep.subr.mxu0 %v7343_v50  ;;  %2989 = vmatprep.subr.mxu1 %v7345_v53 }
 0x96f   :  { %2919 = vmatpush1.msra.mxu0 %v7347_v40  ;;  %2990 = vmatpush1.msra.mxu1 %v7349_v55 }
 0x970   :  { %2920 = vmatprep.subr.mxu0 %v7353_v56  ;;  %2991 = vmatprep.subr.mxu1 %v7355_v57 }
 0x971   :  { %2921 = vmatpush1.msra.mxu0 %v7359_v58  ;;  %2992 = vmatpush1.msra.mxu1 %v7361_v61 }
 0x972   :  { %2922 = vmatprep.subr.mxu0 %v7365_v26  ;;  %2993 = vmatprep.subr.mxu1 %v7367_v63 }
 0x973   :  { %2923 = vmatpush1.msra.mxu0 %v7371_v28  ;;  %2994 = vmatpush1.msra.mxu1 %v7373_v10 }
 0x974   :  { %2924 = vmatprep.subr.mxu0 %v7377_v1  ;;  %2995 = vmatprep.subr.mxu1 %v7379_v14 }
 0x975   :  { %2925 = vmatpush1.msra.mxu0 %v7383_v35  ;;  %2996 = vmatpush1.msra.mxu1 %v7385_v12 }
 0x976   :  { %2926 = vmatprep.subr.mxu0 %v7389_v4  ;;  %2997 = vmatprep.subr.mxu1 %v7391_v11 }
 0x977   :  { %2927 = vmatpush1.msra.mxu0 %v7395_v8  ;;  %2998 = vmatpush1.msra.mxu1 %v7397_v0 }
 0x978   :  { %2928 = vmatprep.subr.mxu0 %v7401_v13  ;;  %2999 = vmatprep.subr.mxu1 %v7403_v9 }
 0x979   :  { %2929 = vmatpush1.msra.mxu0 %v7407_v5  ;;  %3000 = vmatpush1.msra.mxu1 %v7409_v2 }
 0x97a   :  { %2930 = vmatprep.subr.mxu0 %v7413_v17  ;;  %3001 = vmatprep.subr.mxu1 %v7415_v44 }
 0x97b   :  { %2931 = vmatpush1.msra.mxu0 %v7419_v60  ;;  %3002 = vmatpush1.msra.mxu1 %v7421_v16 }
 0x97c   :  { %2932 = vmatprep.subr.mxu0 %v8885_v22  ;;  %3003 = vmatprep.subr.mxu1 %v8886_v31 }
 0x97d   :  { %2933 = vmatpush1.msra.mxu0 %v8887_v6  ;;  %3004 = vmatpush1.msra.mxu1 %v8888_v7 }
 0x97e   :  { %2934 = vmatprep.subr.mxu0 %v8889_v42  ;;  %3005 = vmatprep.subr.mxu1 %v8890_v34 }
 0x97f   :  { %2935 = vmatpush1.msra.mxu0 %v8891_v46  ;;  %3006 = vmatpush1.msra.mxu1 %v8892_v62  ;;  %v8903_v62 = vld [vmem:[#allocation33_spill] sm:$0xff]  ;;  %v8912_v46 = vld [vmem:[#allocation39_spill] sm:$0xff] }
 0x980   :  { %2936 = vmatprep.subr.mxu0 %v8893_v49  ;;  %3007 = vmatprep.subr.mxu1 %v8894_v20  ;;  %v8904_v49 = vld [vmem:[#allocation34_spill] sm:$0xff]  ;;  %v8905_v20 = vld [vmem:[#allocation35_spill] sm:$0xff] }
 0x981   :  { %2937 = vmatpush1.msra.mxu0 %v8895_v37  ;;  %3008 = vmatpush1.msra.mxu1 %v8896_v19  ;;  %v8906_v37 = vld [vmem:[#allocation36_spill] sm:$0xff]  ;;  %v8907_v19 = vld [vmem:[#allocation37_spill] sm:$0xff] }
 0x982   :  { %2938 = vmatprep.subr.mxu0 %v8897_v36  ;;  %3009 = vmatprep.subr.mxu1 %v8898_v51  ;;  %v8908_v36 = vmov 0.0   ;;  %v8909_v51 = vld [vmem:[#allocation43_spill] sm:$0xff] }
 0x983   :  { %2939 = vmatpush1.msra.mxu0 %v8899_v23  ;;  %3010 = vmatpush1.msra.mxu1 %v8900_v48  ;;  %v8910_v48 = vld [vmem:[#allocation14_spill] sm:$0xff] }
 0x984   :  { %2940 = vmatprep.subr.mxu0 %v8901_v25  ;;  %3011 = vmatprep.subr.mxu1 %v8902_v30  ;;  %v8911_v25 = vld [vmem:[#allocation16_spill] sm:$0xff] }
 0x985   :  { %2941 = vmatpush1.msra.mxu0 %v8903_v62  ;;  %3012 = vmatpush1.msra.mxu1 %v8904_v49 }
 0x986   :  { %2942 = vmatprep.subr.mxu0 %v8905_v20  ;;  %3013 = vmatprep.subr.mxu1 %v8906_v37 }
 0x987   :  { %2943 = vmatpush1.msra.mxu0 %v8907_v19  ;;  %2976 = vmatprep.mubr.f32.mxu0 %v8908_v36 }
 0x988   :  { %3014 = vmatpush1.msra.mxu1 %v8909_v51  ;;  %3047 = vmatprep.mubr.f32.mxu1 %v8908_v36 }
 0x989   :  { %3145 = vmatprep.subr.mxu0 %v8910_v48  ;;  %3216 = vmatprep.subr.mxu1 %v8911_v25 }
 0xa28   :  { %v2750_v30 = vpop.f32.mrf.mxu0  ;;  %v2821_v23 = vpop.f32.mrf.mxu1 }
 0xa29   :  { %v2830_v62 = vrot.slane %v2750_v30, 7  ;;  %v2846_v49 = vadd.f32 %v2750_v30, %v7579_v27 }
 0xa2a   :  { %v2752_v20 = vpop.f32.mrf.mxu0  ;;  %v2823_v48 = vpop.f32.mrf.mxu1 }
 0xa2b   :  { %v2842_v37 = vadd.f32 %v2830_v62, %v8912_v46  ;;  %v5384_v34 = vmul.f32 -1.442695, %v2846_v49  ;;  %v2831_v19 = vrot.slane %v2752_v20, 7  ;;  %v2847_v42 = vadd.f32 %v2752_v20, %v7585_v21 }
 0xa2c   :  { %v2833_v6 = vrot.slane %v2823_v48, 7  ;;  %v2849_v30 = vadd.f32 %v2823_v48, %v7595_v39  ;;  %v2848_v62 = vadd.f32 %v2821_v23, %v7602_v33  ;;  %v2832_v46 = vrot.slane %v2821_v23, 7 }
 0xa2d   :  { %v5383_v7 = vmul.f32 -1.442695, %v2842_v37  ;;  %5838 = vpow2.f32 %v5384_v34  ;;  %v2843_v51 = vadd.f32 %v2831_v19, %v7582_v24  ;;  %v5386_v36 = vmul.f32 -1.442695, %v2847_v42 }
 0xa2e   :  { %v2845_v27 = vadd.f32 %v2833_v6, %v7593_v32  ;;  %v5388_v49 = vmul.f32 -1.442695, %v2849_v30 }
 0xa2f   :  { %5840 = vpow2.f32 %v5383_v7  ;;  %v5385_v25 = vmul.f32 -1.442695, %v2843_v51  ;;  %v8913_v51 = vld [vmem:[#allocation44_spill] sm:$0xff] }
 0xa30   :  { %5842 = vpow2.f32 %v5386_v36  ;;  %v5387_v20 = vmul.f32 -1.442695, %v2845_v27  ;;  %v2844_v36 = vadd.f32 %v2832_v46, %v8913_v51  ;;  %v2890_v46 = vrot.slane %v7605_v47, 7 }
 0xa31   :  { %5844 = vpow2.f32 %v5385_v25 }
 0xa32   :  { %5846 = vtanh.f32 %v2848_v62 }
 0xa33   :  { %5848 = vpow2.f32 %v5388_v49  ;;  %v2891_v49 = vrot.slane %v7607_v29, 7 }
 0xa34   :  { %5850 = vpow2.f32 %v5387_v20 }
 0xa3a   :  { %v5839_v37 = vpop.eup %5838 }
 0xa3b   :  { %v2857_v34 = vadd.f32 1.0, %v5839_v37 }
 0xa3c   :  { %v5841_v19 = vpop.eup %5840 }
 0xa3d   :  { %v5843_v42 = vpop.eup %5842  ;;  %v2856_v7 = vadd.f32 1.0, %v5841_v19  ;;  %5852 = vrcp.f32 %v2857_v34 }
 0xa3e   :  { %v2869_v25 = vadd.f32 1.0, %v5843_v42  ;;  %v5845_v48 = vpop.eup %5844 }
 0xa3f   :  { %5854 = vrcp.f32 %v2856_v7  ;;  %v2868_v6 = vadd.f32 1.0, %v5845_v48  ;;  %v5847_v23 = vpop.eup %5846 }
 0xa40   :  { %5856 = vrcp.f32 %v2869_v25  ;;  %v5849_v27 = vpop.eup %5848 }
 0xa41   :  { %5858 = vtanh.f32 %v2844_v36  ;;  %v5851_v30 = vpop.eup %5850  ;;  %v2883_v19 = vadd.f32 1.0, %v5849_v27 }
 0xa42   :  { %5860 = vrcp.f32 %v2868_v6  ;;  %v2882_v7 = vadd.f32 1.0, %v5851_v30 }
 0xa43   :  { %5862 = vrcp.f32 %v2883_v19 }
 0xa4a   :  { %v5853_v37 = vpop.eup %5852 }
 0xa4b   :  { %v2897_v20 = vmul.f32 %v5853_v37, %v5847_v23 }
 0xa4c   :  { %v5855_v62 = vpop.eup %5854 }
 0xa4d   :  { %v5857_v33 = vpop.eup %5856 }
 0xa4e   :  { %v5859_v39 = vpop.eup %5858  ;;  %v2895_v34 = vmul.f32 %v5857_v33, %v2891_v49 }
 0xa4f   :  { %v5861_v42 = vpop.eup %5860  ;;  %v2896_v48 = vmul.f32 %v5859_v39, %v5855_v62 }
 0xa50   :  { %v2894_v25 = vmul.f32 %v5861_v42, %v2890_v46  ;;  %v7688_v36 = vadd.f32 %v2897_v20, %v2895_v34  ;;  %v5863_v29 = vpop.eup %5862 }
 0xa52   :  { %v7690_v6 = vadd.f32 %v2896_v48, %v2894_v25  ;;  %5864 = vtanh.f32 %v7688_v36  ;;  %v8941_v48 = vld [vmem:[#allocation42_spill] sm:$0xff] }
 0xa53   :  { %5866 = vrcp.f32 %v2882_v7 }
 0xa54   :  { %5868 = vtanh.f32 %v7690_v6 }
 0xa5f   :  { %v5865_v27 = vpop.eup %5864 }
 0xa60   :  { %v5867_v47 = vpop.eup %5866  ;;  %v2903_v23 = vmul.f32 %v5865_v27, %v5863_v29  ;;  %v8942_v27 = vld [vmem:[#allocation45_spill] sm:$0xff] }
 0xa61   :  { %v5869_v33 = vpop.eup %5868 }
 0xa62   :  { %v2902_v37 = vmul.f32 %v5869_v33, %v5867_v47  ;;  %2906 = vst.msk [vmem:[#allocation3 + $0x8] sm:$0x2] %vm2904_vm3, %v2903_v23 }
 0xa64   :  { %2905 = vst.msk [vmem:[#allocation3] sm:$0x2] %vm2904_vm3, %v2902_v37  ;;  %v2909_v39 = vrot.slane %v2902_v37, 1 }
 0xa66   :  { %v2910_v30 = vsel %vm539_vm1, %v2903_v23, %v2909_v39 }
 0xa67   :  { %2977 = vmatmul.mubr.f32.vlgmr.msra.gmra.mxu0 %v2910_v30  ;;  %3048 = vmatmul.mubr.f32.vlgmr.msra.gmra.mxu1 %v2910_v30 }
 0xa68   :  { %3146 = vmatpush1.msra.mxu0 %v7313_v18  ;;  %3217 = vmatpush1.msra.mxu1 %v7315_v38  ;;  %v8914_v18 = vld [vmem:[#allocation17_spill] sm:$0xff]  ;;  %v8915_v38 = vld [vmem:[#allocation18_spill] sm:$0xff] }
 0xa69   :  { %3147 = vmatprep.subr.mxu0 %v7317_v54  ;;  %3218 = vmatprep.subr.mxu1 %v7319_v3  ;;  %v8916_v54 = vld [vmem:[#allocation19_spill] sm:$0xff]  ;;  %v8917_v3 = vld [vmem:[#allocation20_spill] sm:$0xff] }
 0xa6a   :  { %3148 = vmatpush1.msra.mxu0 %v7321_v41  ;;  %3219 = vmatpush1.msra.mxu1 %v7323_v43  ;;  %v8918_v41 = vld [vmem:[#allocation21_spill] sm:$0xff]  ;;  %v8919_v43 = vld [vmem:[#allocation22_spill] sm:$0xff] }
 0xa6b   :  { %3149 = vmatprep.subr.mxu0 %v7329_v52  ;;  %3220 = vmatprep.subr.mxu1 %v7331_v45  ;;  %v8920_v52 = vld [vmem:[#allocation23_spill] sm:$0xff]  ;;  %v8921_v45 = vld [vmem:[#allocation24_spill] sm:$0xff] }
 0xa6c   :  { %3150 = vmatpush1.msra.mxu0 %v7337_v15  ;;  %3221 = vmatpush1.msra.mxu1 %v7339_v59  ;;  %v8922_v15 = vld [vmem:[#allocation25_spill] sm:$0xff]  ;;  %v8923_v59 = vld [vmem:[#allocation26_spill] sm:$0xff] }
 0xa6d   :  { %3151 = vmatprep.subr.mxu0 %v7343_v50  ;;  %3222 = vmatprep.subr.mxu1 %v7345_v53  ;;  %v8924_v50 = vld [vmem:[#allocation27_spill] sm:$0xff]  ;;  %v8925_v53 = vld [vmem:[#allocation28_spill] sm:$0xff] }
 0xa6e   :  { %3152 = vmatpush1.msra.mxu0 %v7347_v40  ;;  %3223 = vmatpush1.msra.mxu1 %v7349_v55  ;;  %v8926_v40 = vld [vmem:[#allocation29_spill] sm:$0xff]  ;;  %v8927_v55 = vld [vmem:[#allocation30_spill] sm:$0xff] }
 0xa6f   :  { %3153 = vmatprep.subr.mxu0 %v7353_v56  ;;  %3224 = vmatprep.subr.mxu1 %v7355_v57  ;;  %v8928_v56 = vld [vmem:[#allocation31_spill] sm:$0xff]  ;;  %v8929_v57 = vld [vmem:[#allocation32_spill] sm:$0xff] }
 0xa70   :  { %3154 = vmatpush1.msra.mxu0 %v7359_v58  ;;  %3225 = vmatpush1.msra.mxu1 %v7361_v61  ;;  %v8930_v58 = vld [vmem:[#allocation33_spill] sm:$0xff]  ;;  %v8931_v61 = vld [vmem:[#allocation34_spill] sm:$0xff] }
 0xa71   :  { %3155 = vmatprep.subr.mxu0 %v7365_v26  ;;  %3226 = vmatprep.subr.mxu1 %v7367_v63  ;;  %v8932_v26 = vld [vmem:[#allocation35_spill] sm:$0xff]  ;;  %v8933_v63 = vld [vmem:[#allocation36_spill] sm:$0xff] }
 0xa72   :  { %3156 = vmatpush1.msra.mxu0 %v7371_v28  ;;  %3227 = vmatpush1.msra.mxu1 %v7373_v10  ;;  %v8934_v28 = vld [vmem:[#allocation37_spill] sm:$0xff]  ;;  %v8935_v10 = vmov 0.0  }
 0xa73   :  { %3157 = vmatprep.subr.mxu0 %v7377_v1  ;;  %3228 = vmatprep.subr.mxu1 %v7379_v14  ;;  %v8936_v1 = vld [vmem:[#allocation43_spill] sm:$0xff]  ;;  %v7759_v14 = vld [vmem:[#allocation7 + $0x3e8] sm:$0xff] }
 0xa74   :  { %3158 = vmatpush1.msra.mxu0 %v7383_v35  ;;  %3229 = vmatpush1.msra.mxu1 %v7385_v12  ;;  %8937 = vst [vmem:[#allocation38_spill] sm:$0xff] %v7759_v14  ;;  %v7762_v35 = vld [vmem:[#allocation7 + $0x3f8] sm:$0xff] }
 0xa75   :  { %3159 = vmatprep.subr.mxu0 %v7389_v4  ;;  %3230 = vmatprep.subr.mxu1 %v7391_v11  ;;  %8938 = vst [vmem:[#allocation15_spill] sm:$0xff] %v7762_v35 }
 0xa76   :  { %3160 = vmatpush1.msra.mxu0 %v7395_v8  ;;  %3231 = vmatpush1.msra.mxu1 %v7397_v0  ;;  %v8939_v0 = vld [vmem:[#allocation39_spill] sm:$0xff] }
 0xa77   :  { %3161 = vmatprep.subr.mxu0 %v7401_v13  ;;  %3232 = vmatprep.subr.mxu1 %v7403_v9  ;;  %v8940_v9 = vld [vmem:[#allocation40_spill] sm:$0xff] }
 0xa78   :  { %3162 = vmatpush1.msra.mxu0 %v7407_v5  ;;  %3233 = vmatpush1.msra.mxu1 %v7409_v2 }
 0xa79   :  { %3163 = vmatprep.subr.mxu0 %v7413_v17  ;;  %3234 = vmatprep.subr.mxu1 %v7415_v44 }
 0xa7a   :  { %3164 = vmatpush1.msra.mxu0 %v7419_v60  ;;  %3235 = vmatpush1.msra.mxu1 %v7421_v16 }
 0xa7b   :  { %3165 = vmatprep.subr.mxu0 %v8885_v22  ;;  %3236 = vmatprep.subr.mxu1 %v8886_v31 }
 0xa7c   :  { %3166 = vmatpush1.msra.mxu0 %v8914_v18  ;;  %3237 = vmatpush1.msra.mxu1 %v8915_v38 }
 0xa7d   :  { %3167 = vmatprep.subr.mxu0 %v8916_v54  ;;  %3238 = vmatprep.subr.mxu1 %v8917_v3 }
 0xa7e   :  { %3168 = vmatpush1.msra.mxu0 %v8918_v41  ;;  %3239 = vmatpush1.msra.mxu1 %v8919_v43 }
 0xa7f   :  { %3169 = vmatprep.subr.mxu0 %v8920_v52  ;;  %3240 = vmatprep.subr.mxu1 %v8921_v45 }
 0xa80   :  { %3170 = vmatpush1.msra.mxu0 %v8922_v15  ;;  %3241 = vmatpush1.msra.mxu1 %v8923_v59 }
 0xa81   :  { %3171 = vmatprep.subr.mxu0 %v8924_v50  ;;  %3242 = vmatprep.subr.mxu1 %v8925_v53  ;;  %v3122_v53 = vrot.slane %v7690_v6, 7 }
 0xa82   :  { %3172 = vmatpush1.msra.mxu0 %v8926_v40  ;;  %3243 = vmatpush1.msra.mxu1 %v8927_v55 }
 0xa83   :  { %3173 = vmatprep.subr.mxu0 %v8928_v56  ;;  %3244 = vmatprep.subr.mxu1 %v8929_v57  ;;  %v3123_v56 = vrot.slane %v7688_v36, 7 }
 0xa84   :  { %3174 = vmatpush1.msra.mxu0 %v8930_v58  ;;  %3245 = vmatpush1.msra.mxu1 %v8931_v61 }
 0xa85   :  { %3175 = vmatprep.subr.mxu0 %v8932_v26  ;;  %3246 = vmatprep.subr.mxu1 %v8933_v63 }
 0xa86   :  { %3176 = vmatpush1.msra.mxu0 %v8934_v28  ;;  %3209 = vmatprep.mubr.f32.mxu0 %v8935_v10 }
 0xa87   :  { %3247 = vmatpush1.msra.mxu1 %v8936_v1  ;;  %3280 = vmatprep.mubr.f32.mxu1 %v8935_v10 }
 0xa88   :  { %3378 = vmatprep.subr.mxu0 %v7759_v14  ;;  %3449 = vmatprep.subr.mxu1 %v7762_v35 }
 0xb27   :  { %v2978_v12 = vpop.f32.mrf.mxu0  ;;  %v3049_v2 = vpop.f32.mrf.mxu1 }
 0xb28   :  { %v3058_v4 = vrot.slane %v2978_v12, 6  ;;  %v3062_v11 = vrot.slane %v2978_v12, 7  ;;  %v3060_v34 = vrot.slane %v3049_v2, 6  ;;  %v3064_v42 = vrot.slane %v3049_v2, 7 }
 0xb29   :  { %v2980_v8 = vpop.f32.mrf.mxu0  ;;  %v3051_v62 = vpop.f32.mrf.mxu1 }
 0xb2a   :  { %v3074_v13 = vadd.f32 %v3058_v4, %v8939_v0  ;;  %v3078_v5 = vadd.f32 %v3062_v11, %v8940_v9  ;;  %v3059_v17 = vrot.slane %v2980_v8, 6  ;;  %v3063_v44 = vrot.slane %v2980_v8, 7 }
 0xb2b   :  { %v3061_v46 = vrot.slane %v3051_v62, 6  ;;  %v3065_v20 = vrot.slane %v3051_v62, 7  ;;  %v3076_v29 = vadd.f32 %v3060_v34, %v8913_v51  ;;  %v3080_v47 = vadd.f32 %v3064_v42, %v8942_v27  ;;  %v7797_v62 = vld [vmem:[#allocation7 + $0x3d0] sm:$0xff]  ;;  %v7812_v34 = vld [vmem:[#allocation7 + $0x388] sm:$0xff]  ;;  %v7815_v42 = vld [vmem:[#allocation7 + $0x398] sm:$0xff] }
 0xb2c   :  { %v5389_v60 = vmul.f32 -1.442695, %v3074_v13  ;;  %v5390_v16 = vmul.f32 -1.442695, %v3078_v5  ;;  %v3075_v22 = vadd.f32 %v3059_v17, %v7582_v24  ;;  %v3079_v31 = vadd.f32 %v3063_v44, %v7585_v21  ;;  %v7782_v44 = vld [vmem:[#allocation7 + $0x3e0] sm:$0xff] }
 0xb2d   :  { %v3077_v7 = vadd.f32 %v3061_v46, %v7593_v32  ;;  %v3081_v25 = vadd.f32 %v3065_v20, %v8941_v48  ;;  %v7806_v46 = vld [vmem:[#allocation7 + $0x3a0] sm:$0xff]  ;;  %v7809_v20 = vld [vmem:[#allocation7 + $0x3b0] sm:$0xff] }
 0xb2e   :  { %5870 = vpow2.f32 %v5389_v60  ;;  %v5391_v49 = vmul.f32 -1.442695, %v3075_v22  ;;  %v5392_v19 = vmul.f32 -1.442695, %v3079_v31  ;;  %v7785_v60 = vld [vmem:[#allocation7 + $0x3f0] sm:$0xff]  ;;  %v7791_v22 = vld [vmem:[#allocation7 + $0x3d8] sm:$0xff] }
 0xb2f   :  { %5872 = vpow2.f32 %v5390_v16  ;;  %v5393_v23 = vmul.f32 -1.442695, %v3077_v7  ;;  %v5394_v33 = vmul.f32 -1.442695, %v3081_v25  ;;  %v7788_v16 = vld [vmem:[#allocation7 + $0x3c8] sm:$0xff]  ;;  %v7794_v31 = vld [vmem:[#allocation7 + $0x3c0] sm:$0xff] }
 0xb30   :  { %5874 = vpow2.f32 %v5391_v49  ;;  %v7800_v49 = vld [vmem:[#allocation7 + $0x3a8] sm:$0xff]  ;;  %v7818_v7 = vld [vmem:[#allocation7 + $0x380] sm:$0xff]  ;;  %v7821_v25 = vld [vmem:[#allocation7 + $0x390] sm:$0xff] }
 0xb31   :  { %5876 = vpow2.f32 %v5392_v19  ;;  %v7803_v19 = vld [vmem:[#allocation7 + $0x3b8] sm:$0xff] }
 0xb32   :  { %5878 = vtanh.f32 %v3076_v29  ;;  %v7824_v29 = vld [vmem:[#allocation7 + $0x368] sm:$0xff] }
 0xb33   :  { %5880 = vtanh.f32 %v3080_v47  ;;  %v7827_v47 = vld [vmem:[#allocation7 + $0x378] sm:$0xff] }
 0xb34   :  { %5882 = vpow2.f32 %v5393_v23  ;;  %v7830_v23 = vld [vmem:[#allocation7 + $0x360] sm:$0xff] }
 0xb35   :  { %5884 = vpow2.f32 %v5394_v33  ;;  %v7833_v33 = vld [vmem:[#allocation7 + $0x370] sm:$0xff] }
 0xb3b   :  { %v5871_v37 = vpop.eup %5870 }
 0xb3c   :  { %v5873_v39 = vpop.eup %5872  ;;  %v3088_v30 = vadd.f32 1.0, %v5871_v37  ;;  %v7836_v37 = vld [vmem:[#allocation7 + $0x348] sm:$0xff] }
 0xb3d   :  { %v3089_v18 = vadd.f32 1.0, %v5873_v39  ;;  %v5875_v38 = vpop.eup %5874  ;;  %v7839_v39 = vld [vmem:[#allocation7 + $0x358] sm:$0xff] }
 0xb3e   :  { %v5877_v54 = vpop.eup %5876  ;;  %5886 = vrcp.f32 %v3088_v30  ;;  %v3100_v3 = vadd.f32 1.0, %v5875_v38  ;;  %v7842_v30 = vld [vmem:[#allocation7 + $0x340] sm:$0xff]  ;;  %v7848_v38 = vld [vmem:[#allocation7 + $0x328] sm:$0xff] }
 0xb3f   :  { %5888 = vrcp.f32 %v3089_v18  ;;  %v3101_v41 = vadd.f32 1.0, %v5877_v54  ;;  %v5879_v43 = vpop.eup %5878  ;;  %v7845_v18 = vld [vmem:[#allocation7 + $0x350] sm:$0xff]  ;;  %v7851_v54 = vld [vmem:[#allocation7 + $0x338] sm:$0xff] }
 0xb40   :  { %5890 = vrcp.f32 %v3100_v3  ;;  %v5881_v52 = vpop.eup %5880  ;;  %v7854_v3 = vld [vmem:[#allocation7 + $0x320] sm:$0xff] }
 0xb41   :  { %5892 = vrcp.f32 %v3101_v41  ;;  %v5883_v45 = vpop.eup %5882  ;;  %v7857_v41 = vld [vmem:[#allocation7 + $0x330] sm:$0xff] }
 0xb42   :  { %v5885_v15 = vpop.eup %5884  ;;  %v3114_v40 = vadd.f32 1.0, %v5883_v45  ;;  %v7866_v45 = vld [vmem:[#allocation7 + $0x300] sm:$0xff] }
 0xb43   :  { %v3115_v57 = vadd.f32 1.0, %v5885_v15  ;;  %v7869_v15 = vld [vmem:[#allocation7 + $0x310] sm:$0xff] }
 0xb44   :  { %5894 = vrcp.f32 %v3114_v40  ;;  %v7881_v40 = vld [vmem:[#allocation7 + $0x2f0] sm:$0xff] }
 0xb45   :  { %5896 = vrcp.f32 %v3115_v57  ;;  %v7890_v57 = vld [vmem:[#allocation7 + $0x2c0] sm:$0xff] }
 0xb4b   :  { %v5887_v59 = vpop.eup %5886 }
 0xb4c   :  { %v5889_v50 = vpop.eup %5888  ;;  %v3128_v61 = vmul.f32 %v5887_v59, %v5879_v43  ;;  %v7860_v43 = vld [vmem:[#allocation7 + $0x308] sm:$0xff] }
 0xb4d   :  { %v5891_v55 = vpop.eup %5890  ;;  %v3129_v63 = vmul.f32 %v5889_v50, %v5881_v52  ;;  %v7863_v52 = vld [vmem:[#allocation7 + $0x318] sm:$0xff]  ;;  %v7872_v59 = vld [vmem:[#allocation7 + $0x2e8] sm:$0xff] }
 0xb4e   :  { %v5893_v58 = vpop.eup %5892  ;;  %v3126_v26 = vmul.f32 %v5891_v55, %v3122_v53  ;;  %v7875_v50 = vld [vmem:[#allocation7 + $0x2f8] sm:$0xff]  ;;  %v7878_v53 = vld [vmem:[#allocation7 + $0x2e0] sm:$0xff]  ;;  %v7884_v55 = vld [vmem:[#allocation7 + $0x2c8] sm:$0xff] }
 0xb4f   :  { %v3127_v28 = vmul.f32 %v5893_v58, %v3123_v56  ;;  %v7887_v56 = vld [vmem:[#allocation7 + $0x2d8] sm:$0xff]  ;;  %v7893_v58 = vld [vmem:[#allocation7 + $0x2d0] sm:$0xff] }
 0xb50   :  { %v7775_v1 = vadd.f32 %v3128_v61, %v3126_v26  ;;  %v7896_v61 = vld [vmem:[#allocation7 + $0x2a8] sm:$0xff]  ;;  %v7899_v26 = vld [vmem:[#allocation7 + $0x2b8] sm:$0xff] }
 0xb51   :  { %v7777_v12 = vadd.f32 %v3129_v63, %v3127_v28  ;;  %v5895_v6 = vpop.eup %5894  ;;  %8943 = vst [vmem:[#allocation13_spill] sm:$0xff] %v7896_v61  ;;  %8944 = vst [vmem:[#allocation14_spill] sm:$0xff] %v7899_v26  ;;  %v7902_v63 = vld [vmem:[#allocation7 + $0x2a0] sm:$0xff]  ;;  %v7905_v28 = vld [vmem:[#allocation7 + $0x2b0] sm:$0xff] }
 0xb52   :  { %5898 = vtanh.f32 %v7775_v1  ;;  %v5897_v4 = vpop.eup %5896  ;;  %8945 = vst [vmem:[#allocation16_spill] sm:$0xff] %v7902_v63  ;;  %8946 = vst [vmem:[#allocation44_spill] sm:$0xff] %v7905_v28 }
 0xb53   :  { %5900 = vtanh.f32 %v7777_v12 }
 0xb5f   :  { %v5899_v11 = vpop.eup %5898 }
 0xb60   :  { %v5901_v36 = vpop.eup %5900  ;;  %v3134_v8 = vmul.f32 %v5899_v11, %v5895_v6  ;;  %v7908_v6 = vld [vmem:[#allocation7 + $0x288] sm:$0xff]  ;;  %v7914_v11 = vld [vmem:[#allocation7 + $0x280] sm:$0xff] }
 0xb61   :  { %v3135_v13 = vmul.f32 %v5901_v36, %v5897_v4  ;;  %8947 = vst [vmem:[#allocation17_spill] sm:$0xff] %v7908_v6  ;;  %v7911_v4 = vld [vmem:[#allocation7 + $0x298] sm:$0xff]  ;;  %8949 = vst [vmem:[#allocation19_spill] sm:$0xff] %v7914_v11  ;;  %v7917_v36 = vld [vmem:[#allocation7 + $0x290] sm:$0xff] }
 0xb62   :  { %3137 = vst.msk [vmem:[#allocation3] sm:$0x4] %vm3136_vm4, %v3134_v8  ;;  %v3141_v5 = vrot.slane %v3134_v8, 2  ;;  %8948 = vst [vmem:[#allocation18_spill] sm:$0xff] %v7911_v4  ;;  %v7920_v8 = vld [vmem:[#allocation7 + $0x268] sm:$0xff] }
 0xb63   :  { %3138 = vst.msk [vmem:[#allocation3 + $0x8] sm:$0x4] %vm3136_vm4, %v3135_v13  ;;  %v3142_v2 = vrot.slane %v3135_v13, 1  ;;  %8950 = vst [vmem:[#allocation20_spill] sm:$0xff] %v7917_v36  ;;  %v7923_v13 = vld [vmem:[#allocation7 + $0x278] sm:$0xff] }
 0xb64   :  { %8951 = vst [vmem:[#allocation21_spill] sm:$0xff] %v7920_v8  ;;  %8952 = vst [vmem:[#allocation22_spill] sm:$0xff] %v7923_v13 }
 0xb65   :  { %v3143_v17 = vsel %vm539_vm1, %v3142_v2, %v3141_v5  ;;  %v7926_v5 = vld [vmem:[#allocation7 + $0x260] sm:$0xff]  ;;  %v7929_v2 = vld [vmem:[#allocation7 + $0x270] sm:$0xff] }
 0xb66   :  { %3210 = vmatmul.mubr.f32.vlgmr.msra.gmra.mxu0 %v3143_v17  ;;  %3281 = vmatmul.mubr.f32.vlgmr.msra.gmra.mxu1 %v3143_v17  ;;  %8953 = vst [vmem:[#allocation23_spill] sm:$0xff] %v7926_v5  ;;  %8954 = vst [vmem:[#allocation24_spill] sm:$0xff] %v7929_v2  ;;  %v7932_v17 = vld [vmem:[#allocation7 + $0x248] sm:$0xff] }
 0xb67   :  { %3379 = vmatpush1.msra.mxu0 %v7782_v44  ;;  %3450 = vmatpush1.msra.mxu1 %v7785_v60  ;;  %8955 = vst [vmem:[#allocation25_spill] sm:$0xff] %v7932_v17 }
 0xb68   :  { %3380 = vmatprep.subr.mxu0 %v7788_v16  ;;  %3451 = vmatprep.subr.mxu1 %v7791_v22 }
 0xb69   :  { %3381 = vmatpush1.msra.mxu0 %v7794_v31  ;;  %3452 = vmatpush1.msra.mxu1 %v7797_v62 }
 0xb6a   :  { %3382 = vmatprep.subr.mxu0 %v7800_v49  ;;  %3453 = vmatprep.subr.mxu1 %v7803_v19 }
 0xb6b   :  { %3383 = vmatpush1.msra.mxu0 %v7806_v46  ;;  %3454 = vmatpush1.msra.mxu1 %v7809_v20 }
 0xb6c   :  { %3384 = vmatprep.subr.mxu0 %v7812_v34  ;;  %3455 = vmatprep.subr.mxu1 %v7815_v42 }
 0xb6d   :  { %3385 = vmatpush1.msra.mxu0 %v7818_v7  ;;  %3456 = vmatpush1.msra.mxu1 %v7821_v25 }
 0xb6e   :  { %3386 = vmatprep.subr.mxu0 %v7824_v29  ;;  %3457 = vmatprep.subr.mxu1 %v7827_v47 }
 0xb6f   :  { %3387 = vmatpush1.msra.mxu0 %v7830_v23  ;;  %3458 = vmatpush1.msra.mxu1 %v7833_v33 }
 0xb70   :  { %3388 = vmatprep.subr.mxu0 %v7836_v37  ;;  %3459 = vmatprep.subr.mxu1 %v7839_v39 }
 0xb71   :  { %3389 = vmatpush1.msra.mxu0 %v7842_v30  ;;  %3460 = vmatpush1.msra.mxu1 %v7845_v18 }
 0xb72   :  { %3390 = vmatprep.subr.mxu0 %v7848_v38  ;;  %3461 = vmatprep.subr.mxu1 %v7851_v54 }
 0xb73   :  { %3391 = vmatpush1.msra.mxu0 %v7854_v3  ;;  %3462 = vmatpush1.msra.mxu1 %v7857_v41 }
 0xb74   :  { %3392 = vmatprep.subr.mxu0 %v7860_v43  ;;  %3463 = vmatprep.subr.mxu1 %v7863_v52 }
 0xb75   :  { %3393 = vmatpush1.msra.mxu0 %v7866_v45  ;;  %3464 = vmatpush1.msra.mxu1 %v7869_v15 }
 0xb76   :  { %3394 = vmatprep.subr.mxu0 %v7872_v59  ;;  %3465 = vmatprep.subr.mxu1 %v7875_v50 }
 0xb77   :  { %3395 = vmatpush1.msra.mxu0 %v7878_v53  ;;  %3466 = vmatpush1.msra.mxu1 %v7881_v40 }
 0xb78   :  { %3396 = vmatprep.subr.mxu0 %v7884_v55  ;;  %3467 = vmatprep.subr.mxu1 %v7887_v56 }
 0xb79   :  { %3397 = vmatpush1.msra.mxu0 %v7890_v57  ;;  %3468 = vmatpush1.msra.mxu1 %v7893_v58 }
 0xb7a   :  { %3398 = vmatprep.subr.mxu0 %v7896_v61  ;;  %3469 = vmatprep.subr.mxu1 %v7899_v26 }
 0xb7b   :  { %3399 = vmatpush1.msra.mxu0 %v7902_v63  ;;  %3470 = vmatpush1.msra.mxu1 %v7905_v28 }
 0xb7c   :  { %3400 = vmatprep.subr.mxu0 %v7908_v6  ;;  %3471 = vmatprep.subr.mxu1 %v7911_v4 }
 0xb7d   :  { %3401 = vmatpush1.msra.mxu0 %v7914_v11  ;;  %3472 = vmatpush1.msra.mxu1 %v7917_v36  ;;  %v7935_v36 = vld [vmem:[#allocation7 + $0x258] sm:$0xff] }
 0xb7e   :  { %3402 = vmatprep.subr.mxu0 %v7920_v8  ;;  %3473 = vmatprep.subr.mxu1 %v7923_v13  ;;  %8956 = vst [vmem:[#allocation26_spill] sm:$0xff] %v7935_v36  ;;  %v7938_v8 = vld [vmem:[#allocation7 + $0x240] sm:$0xff]  ;;  %v7941_v13 = vld [vmem:[#allocation7 + $0x250] sm:$0xff] }
 0xb7f   :  { %3403 = vmatpush1.msra.mxu0 %v7926_v5  ;;  %3474 = vmatpush1.msra.mxu1 %v7929_v2  ;;  %8957 = vst [vmem:[#allocation27_spill] sm:$0xff] %v7938_v8  ;;  %8958 = vst [vmem:[#allocation28_spill] sm:$0xff] %v7941_v13  ;;  %v7944_v5 = vld [vmem:[#allocation7 + $0x228] sm:$0xff]  ;;  %v7947_v2 = vld [vmem:[#allocation7 + $0x238] sm:$0xff] }
 0xb80   :  { %3404 = vmatprep.subr.mxu0 %v7932_v17  ;;  %3475 = vmatprep.subr.mxu1 %v7935_v36  ;;  %8959 = vst [vmem:[#allocation29_spill] sm:$0xff] %v7944_v5  ;;  %8960 = vst [vmem:[#allocation30_spill] sm:$0xff] %v7947_v2  ;;  %v7950_v17 = vld [vmem:[#allocation7 + $0x220] sm:$0xff]  ;;  %v7953_v36 = vld [vmem:[#allocation7 + $0x230] sm:$0xff] }
 0xb81   :  { %3405 = vmatpush1.msra.mxu0 %v7938_v8  ;;  %3476 = vmatpush1.msra.mxu1 %v7941_v13  ;;  %8961 = vst [vmem:[#allocation31_spill] sm:$0xff] %v7950_v17  ;;  %8962 = vst [vmem:[#allocation32_spill] sm:$0xff] %v7953_v36  ;;  %v7956_v8 = vld [vmem:[#allocation7 + $0x208] sm:$0xff]  ;;  %v7959_v13 = vld [vmem:[#allocation7 + $0x218] sm:$0xff] }
 0xb82   :  { %3406 = vmatprep.subr.mxu0 %v7944_v5  ;;  %3477 = vmatprep.subr.mxu1 %v7947_v2  ;;  %8963 = vst [vmem:[#allocation33_spill] sm:$0xff] %v7956_v8  ;;  %8964 = vst [vmem:[#allocation34_spill] sm:$0xff] %v7959_v13  ;;  %v7962_v5 = vld [vmem:[#allocation7 + $0x200] sm:$0xff]  ;;  %v7966_v2 = vld [vmem:[#allocation7 + $0x210] sm:$0xff] }
 0xb83   :  { %3407 = vmatpush1.msra.mxu0 %v7950_v17  ;;  %3478 = vmatpush1.msra.mxu1 %v7953_v36  ;;  %8965 = vst [vmem:[#allocation35_spill] sm:$0xff] %v7962_v5  ;;  %8966 = vst [vmem:[#allocation36_spill] sm:$0xff] %v7966_v2 }
 0xb84   :  { %3408 = vmatprep.subr.mxu0 %v7956_v8  ;;  %3479 = vmatprep.subr.mxu1 %v7959_v13 }
 0xb85   :  { %3409 = vmatpush1.msra.mxu0 %v7962_v5  ;;  %3442 = vmatprep.mubr.f32.mxu0 %v8935_v10 }
 0xb86   :  { %3480 = vmatpush1.msra.mxu1 %v7966_v2  ;;  %3513 = vmatprep.mubr.f32.mxu1 %v8935_v10 }
 0xb87   :  { %3611 = vmatprep.subr.mxu0 %v7759_v14  ;;  %3682 = vmatprep.subr.mxu1 %v7762_v35 }
 0xc26   :  { %v3211_v8 = vpop.f32.mrf.mxu0  ;;  %v3282_v4 = vpop.f32.mrf.mxu1 }
 0xc27   :  { %v3291_v36 = vrot.slane %v3211_v8, 5  ;;  %v3295_v17 = vrot.slane %v3211_v8, 6 }
 0xc28   :  { %v3213_v13 = vpop.f32.mrf.mxu0  ;;  %v3284_v14 = vpop.f32.mrf.mxu1 }
 0xc29   :  { %v3307_v11 = vadd.f32 %v3291_v36, %v8939_v0  ;;  %v3311_v5 = vadd.f32 %v3295_v17, %v8940_v9  ;;  %v3292_v6 = vrot.slane %v3213_v13, 5  ;;  %v3296_v28 = vrot.slane %v3213_v13, 6 }
 0xc2a   :  { %v3294_v8 = vrot.slane %v3284_v14, 5  ;;  %v3298_v36 = vrot.slane %v3284_v14, 6  ;;  %v3293_v0 = vrot.slane %v3282_v4, 5  ;;  %v3297_v17 = vrot.slane %v3282_v4, 6 }
 0xc2b   :  { %v5395_v63 = vmul.f32 -1.442695, %v3307_v11  ;;  %v5396_v26 = vmul.f32 -1.442695, %v3311_v5  ;;  %v3308_v2 = vadd.f32 %v3292_v6, %v7582_v24  ;;  %v3312_v10 = vadd.f32 %v3296_v28, %v7585_v21 }
 0xc2c   :  { %v3310_v9 = vadd.f32 %v3294_v8, %v7593_v32  ;;  %v3314_v11 = vadd.f32 %v3298_v36, %v8941_v48  ;;  %v3309_v13 = vadd.f32 %v3293_v0, %v8913_v51  ;;  %v3313_v6 = vadd.f32 %v3297_v17, %v8942_v27 }
 0xc2d   :  { %5902 = vpow2.f32 %v5395_v63  ;;  %v5397_v35 = vmul.f32 -1.442695, %v3308_v2  ;;  %v5398_v61 = vmul.f32 -1.442695, %v3312_v10 }
 0xc2e   :  { %5904 = vpow2.f32 %v5396_v26  ;;  %v5399_v28 = vmul.f32 -1.442695, %v3310_v9  ;;  %v5400_v63 = vmul.f32 -1.442695, %v3314_v11 }
 0xc2f   :  { %5906 = vpow2.f32 %v5397_v35 }
 0xc30   :  { %5908 = vpow2.f32 %v5398_v61 }
 0xc31   :  { %5910 = vtanh.f32 %v3309_v13  ;;  %v3355_v13 = vrot.slane %v7775_v1, 7 }
 0xc32   :  { %5912 = vtanh.f32 %v3313_v6 }
 0xc33   :  { %5914 = vpow2.f32 %v5399_v28  ;;  %v3356_v28 = vrot.slane %v7777_v12, 7 }
 0xc34   :  { %5916 = vpow2.f32 %v5400_v63 }
 0xc3a   :  { %v5903_v5 = vpop.eup %5902 }
 0xc3b   :  { %v5905_v26 = vpop.eup %5904  ;;  %v3321_v10 = vadd.f32 1.0, %v5903_v5 }
 0xc3c   :  { %v3322_v35 = vadd.f32 1.0, %v5905_v26  ;;  %v5907_v14 = vpop.eup %5906 }
 0xc3d   :  { %v5909_v61 = vpop.eup %5908  ;;  %5918 = vrcp.f32 %v3321_v10  ;;  %v3333_v4 = vadd.f32 1.0, %v5907_v14 }
 0xc3e   :  { %5920 = vrcp.f32 %v3322_v35  ;;  %v3334_v2 = vadd.f32 1.0, %v5909_v61  ;;  %v5911_v0 = vpop.eup %5910 }
 0xc3f   :  { %5922 = vrcp.f32 %v3333_v4  ;;  %v5913_v8 = vpop.eup %5912 }
 0xc40   :  { %5924 = vrcp.f32 %v3334_v2  ;;  %v5915_v9 = vpop.eup %5914 }
 0xc41   :  { %v5917_v36 = vpop.eup %5916  ;;  %v3347_v6 = vadd.f32 1.0, %v5915_v9 }
 0xc42   :  { %v3348_v63 = vadd.f32 1.0, %v5917_v36 }
 0xc43   :  { %5926 = vrcp.f32 %v3347_v6  ;;  %v8969_v6 = vld [vmem:[#allocation16_spill] sm:$0xff] }
 0xc44   :  { %5928 = vrcp.f32 %v3348_v63  ;;  %v8972_v63 = vld [vmem:[#allocation18_spill] sm:$0xff] }
 0xc4a   :  { %v5919_v17 = vpop.eup %5918 }
 0xc4b   :  { %v5921_v11 = vpop.eup %5920  ;;  %v3361_v10 = vmul.f32 %v5919_v17, %v5911_v0 }
 0xc4c   :  { %v5923_v5 = vpop.eup %5922  ;;  %v3362_v35 = vmul.f32 %v5921_v11, %v5913_v8 }
 0xc4d   :  { %v5925_v26 = vpop.eup %5924  ;;  %v3359_v14 = vmul.f32 %v5923_v5, %v3355_v13  ;;  %v8968_v13 = vld [vmem:[#allocation14_spill] sm:$0xff]  ;;  %v8970_v5 = vld [vmem:[#allocation44_spill] sm:$0xff] }
 0xc4e   :  { %v3360_v61 = vmul.f32 %v5925_v26, %v3356_v28  ;;  %v8971_v28 = vld [vmem:[#allocation17_spill] sm:$0xff]  ;;  %v8973_v26 = vld [vmem:[#allocation19_spill] sm:$0xff] }
 0xc4f   :  { %v7982_v4 = vadd.f32 %v3361_v10, %v3359_v14  ;;  %v8974_v10 = vld [vmem:[#allocation20_spill] sm:$0xff]  ;;  %v8975_v14 = vld [vmem:[#allocation21_spill] sm:$0xff] }
 0xc50   :  { %v7984_v2 = vadd.f32 %v3362_v35, %v3360_v61  ;;  %v5927_v1 = vpop.eup %5926  ;;  %v8976_v35 = vld [vmem:[#allocation22_spill] sm:$0xff]  ;;  %v8977_v61 = vld [vmem:[#allocation23_spill] sm:$0xff] }
 0xc51   :  { %5930 = vtanh.f32 %v7982_v4  ;;  %v5929_v9 = vpop.eup %5928 }
 0xc52   :  { %5932 = vtanh.f32 %v7984_v2 }
 0xc5e   :  { %v5931_v27 = vpop.eup %5930 }
 0xc5f   :  { %v5933_v12 = vpop.eup %5932  ;;  %v3367_v36 = vmul.f32 %v5931_v27, %v5927_v1  ;;  %v8967_v27 = vld [vmem:[#allocation13_spill] sm:$0xff]  ;;  %v8978_v1 = vld [vmem:[#allocation24_spill] sm:$0xff] }
 0xc60   :  { %v3368_v0 = vmul.f32 %v5933_v12, %v5929_v9  ;;  %v8979_v9 = vld [vmem:[#allocation25_spill] sm:$0xff]  ;;  %v8980_v12 = vld [vmem:[#allocation26_spill] sm:$0xff] }
 0xc61   :  { %3370 = vst.msk [vmem:[#allocation3] sm:$0x8] %vm3369_vm5, %v3367_v36  ;;  %v3374_v8 = vrot.slane %v3367_v36, 3  ;;  %v8981_v36 = vld [vmem:[#allocation27_spill] sm:$0xff] }
 0xc62   :  { %3371 = vst.msk [vmem:[#allocation3 + $0x8] sm:$0x8] %vm3369_vm5, %v3368_v0  ;;  %v3375_v17 = vrot.slane %v3368_v0, 2  ;;  %v8982_v0 = vld [vmem:[#allocation28_spill] sm:$0xff] }
 0xc64   :  { %v3376_v11 = vsel %vm539_vm1, %v3375_v17, %v3374_v8  ;;  %v8983_v8 = vld [vmem:[#allocation29_spill] sm:$0xff]  ;;  %v8984_v17 = vld [vmem:[#allocation30_spill] sm:$0xff] }
 0xc65   :  { %3443 = vmatmul.mubr.f32.vlgmr.msra.gmra.mxu0 %v3376_v11  ;;  %3514 = vmatmul.mubr.f32.vlgmr.msra.gmra.mxu1 %v3376_v11  ;;  %v8985_v11 = vld [vmem:[#allocation31_spill] sm:$0xff] }
 0xc66   :  { %3612 = vmatpush1.msra.mxu0 %v7782_v44  ;;  %3683 = vmatpush1.msra.mxu1 %v7785_v60 }
 0xc67   :  { %3613 = vmatprep.subr.mxu0 %v7788_v16  ;;  %3684 = vmatprep.subr.mxu1 %v7791_v22 }
 0xc68   :  { %3614 = vmatpush1.msra.mxu0 %v7794_v31  ;;  %3685 = vmatpush1.msra.mxu1 %v7797_v62 }
 0xc69   :  { %3615 = vmatprep.subr.mxu0 %v7800_v49  ;;  %3686 = vmatprep.subr.mxu1 %v7803_v19 }
 0xc6a   :  { %3616 = vmatpush1.msra.mxu0 %v7806_v46  ;;  %3687 = vmatpush1.msra.mxu1 %v7809_v20 }
 0xc6b   :  { %3617 = vmatprep.subr.mxu0 %v7812_v34  ;;  %3688 = vmatprep.subr.mxu1 %v7815_v42 }
 0xc6c   :  { %3618 = vmatpush1.msra.mxu0 %v7818_v7  ;;  %3689 = vmatpush1.msra.mxu1 %v7821_v25 }
 0xc6d   :  { %3619 = vmatprep.subr.mxu0 %v7824_v29  ;;  %3690 = vmatprep.subr.mxu1 %v7827_v47 }
 0xc6e   :  { %3620 = vmatpush1.msra.mxu0 %v7830_v23  ;;  %3691 = vmatpush1.msra.mxu1 %v7833_v33 }
 0xc6f   :  { %3621 = vmatprep.subr.mxu0 %v7836_v37  ;;  %3692 = vmatprep.subr.mxu1 %v7839_v39 }
 0xc70   :  { %3622 = vmatpush1.msra.mxu0 %v7842_v30  ;;  %3693 = vmatpush1.msra.mxu1 %v7845_v18 }
 0xc71   :  { %3623 = vmatprep.subr.mxu0 %v7848_v38  ;;  %3694 = vmatprep.subr.mxu1 %v7851_v54 }
 0xc72   :  { %3624 = vmatpush1.msra.mxu0 %v7854_v3  ;;  %3695 = vmatpush1.msra.mxu1 %v7857_v41 }
 0xc73   :  { %3625 = vmatprep.subr.mxu0 %v7860_v43  ;;  %3696 = vmatprep.subr.mxu1 %v7863_v52 }
 0xc74   :  { %3626 = vmatpush1.msra.mxu0 %v7866_v45  ;;  %3697 = vmatpush1.msra.mxu1 %v7869_v15 }
 0xc75   :  { %3627 = vmatprep.subr.mxu0 %v7872_v59  ;;  %3698 = vmatprep.subr.mxu1 %v7875_v50 }
 0xc76   :  { %3628 = vmatpush1.msra.mxu0 %v7878_v53  ;;  %3699 = vmatpush1.msra.mxu1 %v7881_v40 }
 0xc77   :  { %3629 = vmatprep.subr.mxu0 %v7884_v55  ;;  %3700 = vmatprep.subr.mxu1 %v7887_v56 }
 0xc78   :  { %3630 = vmatpush1.msra.mxu0 %v7890_v57  ;;  %3701 = vmatpush1.msra.mxu1 %v7893_v58 }
 0xc79   :  { %3631 = vmatprep.subr.mxu0 %v8967_v27  ;;  %3702 = vmatprep.subr.mxu1 %v8968_v13 }
 0xc7a   :  { %3632 = vmatpush1.msra.mxu0 %v8969_v6  ;;  %3703 = vmatpush1.msra.mxu1 %v8970_v5 }
 0xc7b   :  { %3633 = vmatprep.subr.mxu0 %v8971_v28  ;;  %3704 = vmatprep.subr.mxu1 %v8972_v63 }
 0xc7c   :  { %3634 = vmatpush1.msra.mxu0 %v8973_v26  ;;  %3705 = vmatpush1.msra.mxu1 %v8974_v10  ;;  %v8994_v10 = vld [vmem:[#allocation39_spill] sm:$0xff]  ;;  %v8995_v26 = vld [vmem:[#allocation40_spill] sm:$0xff] }
 0xc7d   :  { %3635 = vmatprep.subr.mxu0 %v8975_v14  ;;  %3706 = vmatprep.subr.mxu1 %v8976_v35  ;;  %v8986_v14 = vld [vmem:[#allocation32_spill] sm:$0xff]  ;;  %v8987_v35 = vld [vmem:[#allocation33_spill] sm:$0xff] }
 0xc7e   :  { %3636 = vmatpush1.msra.mxu0 %v8977_v61  ;;  %3707 = vmatpush1.msra.mxu1 %v8978_v1  ;;  %v8988_v61 = vld [vmem:[#allocation34_spill] sm:$0xff]  ;;  %v8989_v1 = vld [vmem:[#allocation35_spill] sm:$0xff] }
 0xc7f   :  { %3637 = vmatprep.subr.mxu0 %v8979_v9  ;;  %3708 = vmatprep.subr.mxu1 %v8980_v12  ;;  %v8990_v9 = vmov 0.0   ;;  %v8991_v12 = vld [vmem:[#allocation36_spill] sm:$0xff] }
 0xc80   :  { %3638 = vmatpush1.msra.mxu0 %v8981_v36  ;;  %3709 = vmatpush1.msra.mxu1 %v8982_v0  ;;  %v8992_v0 = vld [vmem:[#allocation38_spill] sm:$0xff] }
 0xc81   :  { %3639 = vmatprep.subr.mxu0 %v8983_v8  ;;  %3710 = vmatprep.subr.mxu1 %v8984_v17  ;;  %v8993_v8 = vld [vmem:[#allocation15_spill] sm:$0xff] }
 0xc82   :  { %3640 = vmatpush1.msra.mxu0 %v8985_v11  ;;  %3711 = vmatpush1.msra.mxu1 %v8986_v14 }
 0xc83   :  { %3641 = vmatprep.subr.mxu0 %v8987_v35  ;;  %3712 = vmatprep.subr.mxu1 %v8988_v61 }
 0xc84   :  { %3642 = vmatpush1.msra.mxu0 %v8989_v1  ;;  %3675 = vmatprep.mubr.f32.mxu0 %v8990_v9 }
 0xc85   :  { %3713 = vmatpush1.msra.mxu1 %v8991_v12  ;;  %3746 = vmatprep.mubr.f32.mxu1 %v8990_v9 }
 0xc86   :  { %3844 = vmatprep.subr.mxu0 %v8992_v0  ;;  %3915 = vmatprep.subr.mxu1 %v8993_v8 }
 0xd25   :  { %v3444_v17 = vpop.f32.mrf.mxu0  ;;  %v3515_v63 = vpop.f32.mrf.mxu1 }
 0xd26   :  { %v3524_v11 = vrot.slane %v3444_v17, 4  ;;  %v3528_v36 = vrot.slane %v3444_v17, 5 }
 0xd27   :  { %v3446_v14 = vpop.f32.mrf.mxu0  ;;  %v3517_v0 = vpop.f32.mrf.mxu1 }
 0xd28   :  { %v3540_v35 = vadd.f32 %v3524_v11, %v8994_v10  ;;  %v3544_v61 = vadd.f32 %v3528_v36, %v8995_v26  ;;  %v3525_v1 = vrot.slane %v3446_v14, 4  ;;  %v3529_v28 = vrot.slane %v3446_v14, 5 }
 0xd29   :  { %v3527_v17 = vrot.slane %v3517_v0, 4  ;;  %v3531_v11 = vrot.slane %v3517_v0, 5  ;;  %v3526_v10 = vrot.slane %v3515_v63, 4  ;;  %v3530_v36 = vrot.slane %v3515_v63, 5 }
 0xd2a   :  { %v5401_v5 = vmul.f32 -1.442695, %v3540_v35  ;;  %v5402_v6 = vmul.f32 -1.442695, %v3544_v61  ;;  %v3541_v12 = vadd.f32 %v3525_v1, %v7582_v24  ;;  %v3545_v9 = vadd.f32 %v3529_v28, %v7585_v21  ;;  %v8996_v61 = vld [vmem:[#allocation45_spill] sm:$0xff] }
 0xd2b   :  { %v3543_v26 = vadd.f32 %v3527_v17, %v7593_v32  ;;  %v3547_v14 = vadd.f32 %v3531_v11, %v8941_v48  ;;  %v3542_v35 = vadd.f32 %v3526_v10, %v8913_v51  ;;  %v3546_v1 = vadd.f32 %v3530_v36, %v8996_v61 }
 0xd2c   :  { %5934 = vpow2.f32 %v5401_v5  ;;  %v5403_v8 = vmul.f32 -1.442695, %v3541_v12  ;;  %v5404_v13 = vmul.f32 -1.442695, %v3545_v9 }
 0xd2d   :  { %5936 = vpow2.f32 %v5402_v6  ;;  %v5405_v28 = vmul.f32 -1.442695, %v3543_v26  ;;  %v5406_v5 = vmul.f32 -1.442695, %v3547_v14 }
 0xd2e   :  { %5938 = vpow2.f32 %v5403_v8 }
 0xd2f   :  { %5940 = vpow2.f32 %v5404_v13 }
 0xd30   :  { %5942 = vtanh.f32 %v3542_v35 }
 0xd31   :  { %5944 = vtanh.f32 %v3546_v1 }
 0xd32   :  { %5946 = vpow2.f32 %v5405_v28  ;;  %v3589_v28 = vrot.slane %v7984_v2, 7 }
 0xd33   :  { %5948 = vpow2.f32 %v5406_v5 }
 0xd39   :  { %v5935_v21 = vpop.eup %5934 }
 0xd3a   :  { %v5937_v6 = vpop.eup %5936  ;;  %v3554_v9 = vadd.f32 1.0, %v5935_v21  ;;  %v3588_v21 = vrot.slane %v7982_v4, 7 }
 0xd3b   :  { %v3555_v12 = vadd.f32 1.0, %v5937_v6  ;;  %v5939_v13 = vpop.eup %5938 }
 0xd3c   :  { %v5941_v63 = vpop.eup %5940  ;;  %5950 = vrcp.f32 %v3554_v9  ;;  %v3566_v0 = vadd.f32 1.0, %v5939_v13 }
 0xd3d   :  { %5952 = vrcp.f32 %v3555_v12  ;;  %v3567_v8 = vadd.f32 1.0, %v5941_v63  ;;  %v5943_v10 = vpop.eup %5942 }
 0xd3e   :  { %5954 = vrcp.f32 %v3566_v0  ;;  %v5945_v17 = vpop.eup %5944 }
 0xd3f   :  { %5956 = vrcp.f32 %v3567_v8  ;;  %v5947_v26 = vpop.eup %5946 }
 0xd40   :  { %v5949_v11 = vpop.eup %5948  ;;  %v3580_v35 = vadd.f32 1.0, %v5947_v26 }
 0xd41   :  { %v3581_v5 = vadd.f32 1.0, %v5949_v11 }
 0xd42   :  { %5958 = vrcp.f32 %v3580_v35  ;;  %v8999_v35 = vld [vmem:[#allocation44_spill] sm:$0xff] }
 0xd43   :  { %5960 = vrcp.f32 %v3581_v5  ;;  %v9002_v5 = vld [vmem:[#allocation19_spill] sm:$0xff] }
 0xd49   :  { %v5951_v36 = vpop.eup %5950 }
 0xd4a   :  { %v5953_v14 = vpop.eup %5952  ;;  %v3594_v9 = vmul.f32 %v5951_v36, %v5943_v10 }
 0xd4b   :  { %v5955_v1 = vpop.eup %5954  ;;  %v3595_v12 = vmul.f32 %v5953_v14, %v5945_v17 }
 0xd4c   :  { %v5957_v6 = vpop.eup %5956  ;;  %v3592_v13 = vmul.f32 %v5955_v1, %v3588_v21  ;;  %v8998_v21 = vld [vmem:[#allocation16_spill] sm:$0xff]  ;;  %v9000_v1 = vld [vmem:[#allocation17_spill] sm:$0xff] }
 0xd4d   :  { %v3593_v63 = vmul.f32 %v5957_v6, %v3589_v28  ;;  %v9001_v28 = vld [vmem:[#allocation18_spill] sm:$0xff]  ;;  %v9003_v6 = vld [vmem:[#allocation20_spill] sm:$0xff] }
 0xd4e   :  { %v8065_v0 = vadd.f32 %v3594_v9, %v3592_v13  ;;  %v9004_v9 = vld [vmem:[#allocation21_spill] sm:$0xff]  ;;  %v9005_v13 = vld [vmem:[#allocation22_spill] sm:$0xff] }
 0xd4f   :  { %v8067_v8 = vadd.f32 %v3595_v12, %v3593_v63  ;;  %v5959_v4 = vpop.eup %5958  ;;  %v9006_v12 = vld [vmem:[#allocation23_spill] sm:$0xff]  ;;  %v9007_v63 = vld [vmem:[#allocation24_spill] sm:$0xff] }
 0xd50   :  { %5962 = vtanh.f32 %v8065_v0  ;;  %v5961_v26 = vpop.eup %5960 }
 0xd51   :  { %5964 = vtanh.f32 %v8067_v8 }
 0xd5d   :  { %v5963_v61 = vpop.eup %5962 }
 0xd5e   :  { %v5965_v2 = vpop.eup %5964  ;;  %v3600_v11 = vmul.f32 %v5963_v61, %v5959_v4  ;;  %v8997_v61 = vld [vmem:[#allocation14_spill] sm:$0xff]  ;;  %v9008_v4 = vld [vmem:[#allocation25_spill] sm:$0xff] }
 0xd5f   :  { %v3601_v10 = vmul.f32 %v5965_v2, %v5961_v26  ;;  %v9009_v26 = vld [vmem:[#allocation26_spill] sm:$0xff]  ;;  %v9010_v2 = vld [vmem:[#allocation27_spill] sm:$0xff] }
 0xd60   :  { %3603 = vst.msk [vmem:[#allocation3] sm:$0x10] %vm3602_vm6, %v3600_v11  ;;  %v3607_v17 = vrot.slane %v3600_v11, 4  ;;  %v9011_v11 = vld [vmem:[#allocation28_spill] sm:$0xff] }
 0xd61   :  { %3604 = vst.msk [vmem:[#allocation3 + $0x8] sm:$0x10] %vm3602_vm6, %v3601_v10  ;;  %v3608_v36 = vrot.slane %v3601_v10, 3  ;;  %v9012_v10 = vld [vmem:[#allocation29_spill] sm:$0xff] }
 0xd63   :  { %v3609_v14 = vsel %vm539_vm1, %v3608_v36, %v3607_v17  ;;  %v9013_v17 = vld [vmem:[#allocation30_spill] sm:$0xff]  ;;  %v9014_v36 = vld [vmem:[#allocation31_spill] sm:$0xff] }
 0xd64   :  { %3676 = vmatmul.mubr.f32.vlgmr.msra.gmra.mxu0 %v3609_v14  ;;  %3747 = vmatmul.mubr.f32.vlgmr.msra.gmra.mxu1 %v3609_v14  ;;  %v9015_v14 = vld [vmem:[#allocation32_spill] sm:$0xff] }
 0xd65   :  { %3845 = vmatpush1.msra.mxu0 %v7782_v44  ;;  %3916 = vmatpush1.msra.mxu1 %v7785_v60 }
 0xd66   :  { %3846 = vmatprep.subr.mxu0 %v7788_v16  ;;  %3917 = vmatprep.subr.mxu1 %v7791_v22 }
 0xd67   :  { %3847 = vmatpush1.msra.mxu0 %v7794_v31  ;;  %3918 = vmatpush1.msra.mxu1 %v7797_v62 }
 0xd68   :  { %3848 = vmatprep.subr.mxu0 %v7800_v49  ;;  %3919 = vmatprep.subr.mxu1 %v7803_v19 }
 0xd69   :  { %3849 = vmatpush1.msra.mxu0 %v7806_v46  ;;  %3920 = vmatpush1.msra.mxu1 %v7809_v20 }
 0xd6a   :  { %3850 = vmatprep.subr.mxu0 %v7812_v34  ;;  %3921 = vmatprep.subr.mxu1 %v7815_v42 }
 0xd6b   :  { %3851 = vmatpush1.msra.mxu0 %v7818_v7  ;;  %3922 = vmatpush1.msra.mxu1 %v7821_v25 }
 0xd6c   :  { %3852 = vmatprep.subr.mxu0 %v7824_v29  ;;  %3923 = vmatprep.subr.mxu1 %v7827_v47 }
 0xd6d   :  { %3853 = vmatpush1.msra.mxu0 %v7830_v23  ;;  %3924 = vmatpush1.msra.mxu1 %v7833_v33 }
 0xd6e   :  { %3854 = vmatprep.subr.mxu0 %v7836_v37  ;;  %3925 = vmatprep.subr.mxu1 %v7839_v39 }
 0xd6f   :  { %3855 = vmatpush1.msra.mxu0 %v7842_v30  ;;  %3926 = vmatpush1.msra.mxu1 %v7845_v18 }
 0xd70   :  { %3856 = vmatprep.subr.mxu0 %v7848_v38  ;;  %3927 = vmatprep.subr.mxu1 %v7851_v54 }
 0xd71   :  { %3857 = vmatpush1.msra.mxu0 %v7854_v3  ;;  %3928 = vmatpush1.msra.mxu1 %v7857_v41 }
 0xd72   :  { %3858 = vmatprep.subr.mxu0 %v7860_v43  ;;  %3929 = vmatprep.subr.mxu1 %v7863_v52 }
 0xd73   :  { %3859 = vmatpush1.msra.mxu0 %v7866_v45  ;;  %3930 = vmatpush1.msra.mxu1 %v7869_v15 }
 0xd74   :  { %3860 = vmatprep.subr.mxu0 %v7872_v59  ;;  %3931 = vmatprep.subr.mxu1 %v7875_v50 }
 0xd75   :  { %3861 = vmatpush1.msra.mxu0 %v7878_v53  ;;  %3932 = vmatpush1.msra.mxu1 %v7881_v40 }
 0xd76   :  { %3862 = vmatprep.subr.mxu0 %v7884_v55  ;;  %3933 = vmatprep.subr.mxu1 %v7887_v56 }
 0xd77   :  { %3863 = vmatpush1.msra.mxu0 %v7890_v57  ;;  %3934 = vmatpush1.msra.mxu1 %v7893_v58 }
 0xd78   :  { %3864 = vmatprep.subr.mxu0 %v8967_v27  ;;  %3935 = vmatprep.subr.mxu1 %v8997_v61 }
 0xd79   :  { %3865 = vmatpush1.msra.mxu0 %v8998_v21  ;;  %3936 = vmatpush1.msra.mxu1 %v8999_v35 }
 0xd7a   :  { %3866 = vmatprep.subr.mxu0 %v9000_v1  ;;  %3937 = vmatprep.subr.mxu1 %v9001_v28 }
 0xd7b   :  { %3867 = vmatpush1.msra.mxu0 %v9002_v5  ;;  %3938 = vmatpush1.msra.mxu1 %v9003_v6  ;;  %v9024_v6 = vld [vmem:[#allocation40_spill] sm:$0xff] }
 0xd7c   :  { %3868 = vmatprep.subr.mxu0 %v9004_v9  ;;  %3939 = vmatprep.subr.mxu1 %v9005_v13  ;;  %v9016_v13 = vld [vmem:[#allocation33_spill] sm:$0xff]  ;;  %v9023_v9 = vld [vmem:[#allocation39_spill] sm:$0xff] }
 0xd7d   :  { %3869 = vmatpush1.msra.mxu0 %v9006_v12  ;;  %3940 = vmatpush1.msra.mxu1 %v9007_v63  ;;  %v9017_v12 = vld [vmem:[#allocation34_spill] sm:$0xff]  ;;  %v9018_v63 = vld [vmem:[#allocation35_spill] sm:$0xff] }
 0xd7e   :  { %3870 = vmatprep.subr.mxu0 %v9008_v4  ;;  %3941 = vmatprep.subr.mxu1 %v9009_v26  ;;  %v9019_v4 = vmov 0.0   ;;  %v9020_v26 = vld [vmem:[#allocation36_spill] sm:$0xff] }
 0xd7f   :  { %3871 = vmatpush1.msra.mxu0 %v9010_v2  ;;  %3942 = vmatpush1.msra.mxu1 %v9011_v11  ;;  %v9021_v11 = vld [vmem:[#allocation38_spill] sm:$0xff] }
 0xd80   :  { %3872 = vmatprep.subr.mxu0 %v9012_v10  ;;  %3943 = vmatprep.subr.mxu1 %v9013_v17  ;;  %v9022_v10 = vld [vmem:[#allocation15_spill] sm:$0xff] }
 0xd81   :  { %3873 = vmatpush1.msra.mxu0 %v9014_v36  ;;  %3944 = vmatpush1.msra.mxu1 %v9015_v14 }
 0xd82   :  { %3874 = vmatprep.subr.mxu0 %v9016_v13  ;;  %3945 = vmatprep.subr.mxu1 %v9017_v12 }
 0xd83   :  { %3875 = vmatpush1.msra.mxu0 %v9018_v63  ;;  %3908 = vmatprep.mubr.f32.mxu0 %v9019_v4 }
 0xd84   :  { %3946 = vmatpush1.msra.mxu1 %v9020_v26  ;;  %3979 = vmatprep.mubr.f32.mxu1 %v9019_v4  ;;  %v9025_v4 = vld [vmem:[#allocation41_spill] sm:$0xff] }
 0xd85   :  { %4077 = vmatprep.subr.mxu0 %v9021_v11  ;;  %4148 = vmatprep.subr.mxu1 %v9022_v10 }
 0xe24   :  { %v3677_v17 = vpop.f32.mrf.mxu0  ;;  %v3748_v5 = vpop.f32.mrf.mxu1 }
 0xe25   :  { %v3757_v36 = vrot.slane %v3677_v17, 3  ;;  %v3761_v2 = vrot.slane %v3677_v17, 4 }
 0xe26   :  { %v3679_v14 = vpop.f32.mrf.mxu0  ;;  %v3750_v11 = vpop.f32.mrf.mxu1 }
 0xe27   :  { %v3773_v13 = vadd.f32 %v3757_v36, %v9023_v9  ;;  %v3777_v12 = vadd.f32 %v3761_v2, %v9024_v6  ;;  %v3758_v63 = vrot.slane %v3679_v14, 3  ;;  %v3762_v28 = vrot.slane %v3679_v14, 4 }
 0xe28   :  { %v3760_v17 = vrot.slane %v3750_v11, 3  ;;  %v3764_v36 = vrot.slane %v3750_v11, 4  ;;  %v3759_v9 = vrot.slane %v3748_v5, 3  ;;  %v3763_v2 = vrot.slane %v3748_v5, 4 }
 0xe29   :  { %v5407_v1 = vmul.f32 -1.442695, %v3773_v13  ;;  %v5408_v35 = vmul.f32 -1.442695, %v3777_v12  ;;  %v3774_v26 = vadd.f32 %v3758_v63, %v7582_v24  ;;  %v3778_v21 = vadd.f32 %v3762_v28, %v9025_v4  ;;  %v9026_v63 = vld [vmem:[#allocation45_spill] sm:$0xff] }
 0xe2a   :  { %v3776_v6 = vadd.f32 %v3760_v17, %v7593_v32  ;;  %v3780_v13 = vadd.f32 %v3764_v36, %v8941_v48  ;;  %v3775_v12 = vadd.f32 %v3759_v9, %v8913_v51  ;;  %v3779_v14 = vadd.f32 %v3763_v2, %v9026_v63 }
 0xe2b   :  { %5966 = vpow2.f32 %v5407_v1  ;;  %v5409_v10 = vmul.f32 -1.442695, %v3774_v26  ;;  %v5410_v61 = vmul.f32 -1.442695, %v3778_v21 }
 0xe2c   :  { %5968 = vpow2.f32 %v5408_v35  ;;  %v5411_v28 = vmul.f32 -1.442695, %v3776_v6  ;;  %v5412_v1 = vmul.f32 -1.442695, %v3780_v13 }
 0xe2d   :  { %5970 = vpow2.f32 %v5409_v10 }
 0xe2e   :  { %5972 = vpow2.f32 %v5410_v61 }
 0xe2f   :  { %5974 = vtanh.f32 %v3775_v12 }
 0xe30   :  { %5976 = vtanh.f32 %v3779_v14 }
 0xe31   :  { %5978 = vpow2.f32 %v5411_v28  ;;  %v3822_v28 = vrot.slane %v8067_v8, 7 }
 0xe32   :  { %5980 = vpow2.f32 %v5412_v1 }
 0xe38   :  { %v5967_v4 = vpop.eup %5966 }
 0xe39   :  { %v5969_v35 = vpop.eup %5968  ;;  %v3787_v21 = vadd.f32 1.0, %v5967_v4  ;;  %v3821_v4 = vrot.slane %v8065_v0, 7 }
 0xe3a   :  { %v3788_v26 = vadd.f32 1.0, %v5969_v35  ;;  %v5971_v61 = vpop.eup %5970 }
 0xe3b   :  { %v5973_v5 = vpop.eup %5972  ;;  %5982 = vrcp.f32 %v3787_v21  ;;  %v3799_v11 = vadd.f32 1.0, %v5971_v61 }
 0xe3c   :  { %5984 = vrcp.f32 %v3788_v26  ;;  %v3800_v10 = vadd.f32 1.0, %v5973_v5  ;;  %v5975_v9 = vpop.eup %5974 }
 0xe3d   :  { %5986 = vrcp.f32 %v3799_v11  ;;  %v5977_v17 = vpop.eup %5976 }
 0xe3e   :  { %5988 = vrcp.f32 %v3800_v10  ;;  %v5979_v6 = vpop.eup %5978 }
 0xe3f   :  { %v5981_v36 = vpop.eup %5980  ;;  %v3813_v12 = vadd.f32 1.0, %v5979_v6 }
 0xe40   :  { %v3814_v1 = vadd.f32 1.0, %v5981_v36 }
 0xe41   :  { %5990 = vrcp.f32 %v3813_v12 }
 0xe42   :  { %5992 = vrcp.f32 %v3814_v1 }
 0xe48   :  { %v5983_v2 = vpop.eup %5982 }
 0xe49   :  { %v5985_v13 = vpop.eup %5984  ;;  %v3827_v21 = vmul.f32 %v5983_v2, %v5975_v9 }
 0xe4a   :  { %v5987_v14 = vpop.eup %5986  ;;  %v3828_v26 = vmul.f32 %v5985_v13, %v5977_v17 }
 0xe4b   :  { %v5989_v35 = vpop.eup %5988  ;;  %v3825_v61 = vmul.f32 %v5987_v14, %v3821_v4  ;;  %v9053_v4 = vld [vmem:[#allocation41_spill] sm:$0xff] }
 0xe4c   :  { %v3826_v5 = vmul.f32 %v5989_v35, %v3822_v28 }
 0xe4d   :  { %v8148_v11 = vadd.f32 %v3827_v21, %v3825_v61 }
 0xe4e   :  { %v8150_v10 = vadd.f32 %v3828_v26, %v3826_v5  ;;  %v5991_v0 = vpop.eup %5990 }
 0xe4f   :  { %5994 = vtanh.f32 %v8148_v11  ;;  %v5993_v6 = vpop.eup %5992 }
 0xe50   :  { %5996 = vtanh.f32 %v8150_v10 }
 0xe5c   :  { %v5995_v63 = vpop.eup %5994 }
 0xe5d   :  { %v5997_v8 = vpop.eup %5996  ;;  %v3833_v36 = vmul.f32 %v5995_v63, %v5991_v0 }
 0xe5e   :  { %v3834_v9 = vmul.f32 %v5997_v8, %v5993_v6  ;;  %v9054_v8 = vld [vmem:[#allocation45_spill] sm:$0xff] }
 0xe5f   :  { %3836 = vst.msk [vmem:[#allocation3] sm:$0x20] %vm3835_vm7, %v3833_v36  ;;  %v3840_v17 = vrot.slane %v3833_v36, 5 }
 0xe60   :  { %3837 = vst.msk [vmem:[#allocation3 + $0x8] sm:$0x20] %vm3835_vm7, %v3834_v9  ;;  %v3841_v2 = vrot.slane %v3834_v9, 4  ;;  %vm5068_vm7 = vcmask 1043456  }
 0xe62   :  { %v3842_v13 = vsel %vm539_vm1, %v3841_v2, %v3840_v17 }
 0xe63   :  { %3909 = vmatmul.mubr.f32.vlgmr.msra.gmra.mxu0 %v3842_v13  ;;  %3980 = vmatmul.mubr.f32.vlgmr.msra.gmra.mxu1 %v3842_v13 }
 0xe64   :  { %4078 = vmatpush1.msra.mxu0 %v7782_v44  ;;  %4149 = vmatpush1.msra.mxu1 %v7785_v60  ;;  %v9027_v44 = vld [vmem:[#allocation14_spill] sm:$0xff]  ;;  %v9028_v60 = vld [vmem:[#allocation16_spill] sm:$0xff] }
 0xe65   :  { %4079 = vmatprep.subr.mxu0 %v7788_v16  ;;  %4150 = vmatprep.subr.mxu1 %v7791_v22  ;;  %v9029_v16 = vld [vmem:[#allocation44_spill] sm:$0xff]  ;;  %v9030_v22 = vld [vmem:[#allocation17_spill] sm:$0xff] }
 0xe66   :  { %4080 = vmatpush1.msra.mxu0 %v7794_v31  ;;  %4151 = vmatpush1.msra.mxu1 %v7797_v62  ;;  %v9031_v31 = vld [vmem:[#allocation18_spill] sm:$0xff]  ;;  %v9032_v62 = vld [vmem:[#allocation19_spill] sm:$0xff] }
 0xe67   :  { %4081 = vmatprep.subr.mxu0 %v7800_v49  ;;  %4152 = vmatprep.subr.mxu1 %v7803_v19  ;;  %v9033_v49 = vld [vmem:[#allocation20_spill] sm:$0xff]  ;;  %v9034_v19 = vld [vmem:[#allocation21_spill] sm:$0xff] }
 0xe68   :  { %4082 = vmatpush1.msra.mxu0 %v7806_v46  ;;  %4153 = vmatpush1.msra.mxu1 %v7809_v20  ;;  %v9035_v46 = vld [vmem:[#allocation22_spill] sm:$0xff]  ;;  %v9036_v20 = vld [vmem:[#allocation23_spill] sm:$0xff] }
 0xe69   :  { %4083 = vmatprep.subr.mxu0 %v7812_v34  ;;  %4154 = vmatprep.subr.mxu1 %v7815_v42  ;;  %v9037_v34 = vld [vmem:[#allocation24_spill] sm:$0xff]  ;;  %v9038_v42 = vld [vmem:[#allocation25_spill] sm:$0xff] }
 0xe6a   :  { %4084 = vmatpush1.msra.mxu0 %v7818_v7  ;;  %4155 = vmatpush1.msra.mxu1 %v7821_v25  ;;  %v9039_v7 = vld [vmem:[#allocation26_spill] sm:$0xff]  ;;  %v9040_v25 = vld [vmem:[#allocation27_spill] sm:$0xff] }
 0xe6b   :  { %4085 = vmatprep.subr.mxu0 %v7824_v29  ;;  %4156 = vmatprep.subr.mxu1 %v7827_v47  ;;  %v9041_v29 = vld [vmem:[#allocation28_spill] sm:$0xff]  ;;  %v9042_v47 = vld [vmem:[#allocation29_spill] sm:$0xff] }
 0xe6c   :  { %4086 = vmatpush1.msra.mxu0 %v7830_v23  ;;  %4157 = vmatpush1.msra.mxu1 %v7833_v33  ;;  %v9043_v23 = vld [vmem:[#allocation30_spill] sm:$0xff]  ;;  %v9044_v33 = vld [vmem:[#allocation31_spill] sm:$0xff] }
 0xe6d   :  { %4087 = vmatprep.subr.mxu0 %v7836_v37  ;;  %4158 = vmatprep.subr.mxu1 %v7839_v39  ;;  %v9045_v37 = vld [vmem:[#allocation32_spill] sm:$0xff]  ;;  %v9046_v39 = vld [vmem:[#allocation33_spill] sm:$0xff] }
 0xe6e   :  { %4088 = vmatpush1.msra.mxu0 %v7842_v30  ;;  %4159 = vmatpush1.msra.mxu1 %v7845_v18  ;;  %v9047_v30 = vld [vmem:[#allocation34_spill] sm:$0xff]  ;;  %v9048_v18 = vld [vmem:[#allocation35_spill] sm:$0xff] }
 0xe6f   :  { %4089 = vmatprep.subr.mxu0 %v7848_v38  ;;  %4160 = vmatprep.subr.mxu1 %v7851_v54  ;;  %v9049_v38 = vmov 0.0   ;;  %v9050_v54 = vld [vmem:[#allocation36_spill] sm:$0xff] }
 0xe70   :  { %4090 = vmatpush1.msra.mxu0 %v7854_v3  ;;  %4161 = vmatpush1.msra.mxu1 %v7857_v41  ;;  %v8222_v3 = vld [vmem:[%s8376_s0] sm:$0xff]  ;;  %v8228_v41 = vld [vmem:[%s8376_s0 + $0x8] sm:$0xff] }
 0xe71   :  { %4091 = vmatprep.subr.mxu0 %v7860_v43  ;;  %4162 = vmatprep.subr.mxu1 %v7863_v52 }
 0xe72   :  { %4092 = vmatpush1.msra.mxu0 %v7866_v45  ;;  %4163 = vmatpush1.msra.mxu1 %v7869_v15 }
 0xe73   :  { %4093 = vmatprep.subr.mxu0 %v7872_v59  ;;  %4164 = vmatprep.subr.mxu1 %v7875_v50  ;;  %v9051_v59 = vld [vmem:[#allocation39_spill] sm:$0xff] }
 0xe74   :  { %4094 = vmatpush1.msra.mxu0 %v7878_v53  ;;  %4165 = vmatpush1.msra.mxu1 %v7881_v40  ;;  %v9052_v53 = vld [vmem:[#allocation40_spill] sm:$0xff] }
 0xe75   :  { %4095 = vmatprep.subr.mxu0 %v7884_v55  ;;  %4166 = vmatprep.subr.mxu1 %v7887_v56 }
 0xe76   :  { %4096 = vmatpush1.msra.mxu0 %v7890_v57  ;;  %4167 = vmatpush1.msra.mxu1 %v7893_v58 }
 0xe77   :  { %4097 = vmatprep.subr.mxu0 %v8967_v27  ;;  %4168 = vmatprep.subr.mxu1 %v9027_v44 }
 0xe78   :  { %4098 = vmatpush1.msra.mxu0 %v9028_v60  ;;  %4169 = vmatpush1.msra.mxu1 %v9029_v16 }
 0xe79   :  { %4099 = vmatprep.subr.mxu0 %v9030_v22  ;;  %4170 = vmatprep.subr.mxu1 %v9031_v31 }
 0xe7a   :  { %4100 = vmatpush1.msra.mxu0 %v9032_v62  ;;  %4171 = vmatpush1.msra.mxu1 %v9033_v49 }
 0xe7b   :  { %4101 = vmatprep.subr.mxu0 %v9034_v19  ;;  %4172 = vmatprep.subr.mxu1 %v9035_v46 }
 0xe7c   :  { %4102 = vmatpush1.msra.mxu0 %v9036_v20  ;;  %4173 = vmatpush1.msra.mxu1 %v9037_v34 }
 0xe7d   :  { %4103 = vmatprep.subr.mxu0 %v9038_v42  ;;  %4174 = vmatprep.subr.mxu1 %v9039_v7  ;;  %v4054_v7 = vrot.slane %v8148_v11, 7 }
 0xe7e   :  { %4104 = vmatpush1.msra.mxu0 %v9040_v25  ;;  %4175 = vmatpush1.msra.mxu1 %v9041_v29 }
 0xe7f   :  { %4105 = vmatprep.subr.mxu0 %v9042_v47  ;;  %4176 = vmatprep.subr.mxu1 %v9043_v23  ;;  %v4055_v47 = vrot.slane %v8150_v10, 7 }
 0xe80   :  { %4106 = vmatpush1.msra.mxu0 %v9044_v33  ;;  %4177 = vmatpush1.msra.mxu1 %v9045_v37 }
 0xe81   :  { %4107 = vmatprep.subr.mxu0 %v9046_v39  ;;  %4178 = vmatprep.subr.mxu1 %v9047_v30 }
 0xe82   :  { %4108 = vmatpush1.msra.mxu0 %v9048_v18  ;;  %4141 = vmatprep.mubr.f32.mxu0 %v9049_v38 }
 0xe83   :  { %4179 = vmatpush1.msra.mxu1 %v9050_v54  ;;  %4212 = vmatprep.mubr.f32.mxu1 %v9049_v38 }
 0xe84   :  { %5481 = vmatprep.subr.mxu0 %v8222_v3  ;;  %5486 = vmatprep.subr.mxu1 %v8228_v41 }
 0xf23   :  { %v3910_v43 = vpop.f32.mrf.mxu0  ;;  %v3981_v55 = vpop.f32.mrf.mxu1 }
 0xf24   :  { %v3990_v52 = vrot.slane %v3910_v43, 2  ;;  %v3994_v45 = vrot.slane %v3910_v43, 3  ;;  %v3992_v61 = vrot.slane %v3981_v55, 2  ;;  %v3996_v26 = vrot.slane %v3981_v55, 3 }
 0xf25   :  { %v3912_v15 = vpop.f32.mrf.mxu0  ;;  %v3983_v14 = vpop.f32.mrf.mxu1 }
 0xf26   :  { %v4006_v50 = vadd.f32 %v3990_v52, %v9051_v59  ;;  %v4010_v40 = vadd.f32 %v3994_v45, %v9052_v53  ;;  %v3991_v56 = vrot.slane %v3912_v15, 2  ;;  %v3995_v57 = vrot.slane %v3912_v15, 3 }
 0xf27   :  { %v3993_v35 = vrot.slane %v3983_v14, 2  ;;  %v3997_v21 = vrot.slane %v3983_v14, 3  ;;  %v4008_v6 = vadd.f32 %v3992_v61, %v8913_v51  ;;  %v4012_v36 = vadd.f32 %v3996_v26, %v9054_v8 }
 0xf28   :  { %v5413_v58 = vmul.f32 -1.442695, %v4006_v50  ;;  %v5414_v27 = vmul.f32 -1.442695, %v4010_v40  ;;  %v4007_v63 = vadd.f32 %v3991_v56, %v7582_v24  ;;  %v4011_v12 = vadd.f32 %v3995_v57, %v9053_v4 }
 0xf29   :  { %v4009_v5 = vadd.f32 %v3993_v35, %v7593_v32  ;;  %v4013_v0 = vadd.f32 %v3997_v21, %v8941_v48 }
 0xf2a   :  { %5998 = vpow2.f32 %v5413_v58  ;;  %v5415_v28 = vmul.f32 -1.442695, %v4007_v63  ;;  %v5416_v1 = vmul.f32 -1.442695, %v4011_v12 }
 0xf2b   :  { %6000 = vpow2.f32 %v5414_v27  ;;  %v5417_v9 = vmul.f32 -1.442695, %v4009_v5  ;;  %v5418_v17 = vmul.f32 -1.442695, %v4013_v0 }
 0xf2c   :  { %6002 = vpow2.f32 %v5415_v28 }
 0xf2d   :  { %6004 = vpow2.f32 %v5416_v1 }
 0xf2e   :  { %6006 = vtanh.f32 %v4008_v6 }
 0xf2f   :  { %6008 = vtanh.f32 %v4012_v36 }
 0xf30   :  { %6010 = vpow2.f32 %v5417_v9 }
 0xf31   :  { %6012 = vpow2.f32 %v5418_v17 }
 0xf37   :  { %v5999_v2 = vpop.eup %5998 }
 0xf38   :  { %v6001_v13 = vpop.eup %6000  ;;  %v4020_v44 = vadd.f32 1.0, %v5999_v2 }
 0xf39   :  { %v4021_v60 = vadd.f32 1.0, %v6001_v13  ;;  %v6003_v16 = vpop.eup %6002 }
 0xf3a   :  { %v6005_v22 = vpop.eup %6004  ;;  %6014 = vrcp.f32 %v4020_v44  ;;  %v4032_v31 = vadd.f32 1.0, %v6003_v16 }
 0xf3b   :  { %6016 = vrcp.f32 %v4021_v60  ;;  %v4033_v62 = vadd.f32 1.0, %v6005_v22  ;;  %v6007_v49 = vpop.eup %6006 }
 0xf3c   :  { %6018 = vrcp.f32 %v4032_v31  ;;  %v6009_v19 = vpop.eup %6008 }
 0xf3d   :  { %6020 = vrcp.f32 %v4033_v62  ;;  %v6011_v46 = vpop.eup %6010 }
 0xf3e   :  { %v6013_v20 = vpop.eup %6012  ;;  %v4046_v25 = vadd.f32 1.0, %v6011_v46 }
 0xf3f   :  { %v4047_v23 = vadd.f32 1.0, %v6013_v20 }
 0xf40   :  { %6022 = vrcp.f32 %v4046_v25 }
 0xf41   :  { %6024 = vrcp.f32 %v4047_v23 }
 0xf47   :  { %v6015_v34 = vpop.eup %6014 }
 0xf48   :  { %v6017_v42 = vpop.eup %6016  ;;  %v4060_v37 = vmul.f32 %v6015_v34, %v6007_v49 }
 0xf49   :  { %v6019_v29 = vpop.eup %6018  ;;  %v4061_v30 = vmul.f32 %v6017_v42, %v6009_v19 }
 0xf4a   :  { %v6021_v33 = vpop.eup %6020  ;;  %v4058_v39 = vmul.f32 %v6019_v29, %v4054_v7 }
 0xf4b   :  { %v4059_v18 = vmul.f32 %v6021_v33, %v4055_v47 }
 0xf4c   :  { %v8241_v54 = vadd.f32 %v4060_v37, %v4058_v39 }
 0xf4d   :  { %v8243_v43 = vadd.f32 %v4061_v30, %v4059_v18  ;;  %v6023_v11 = vpop.eup %6022 }
 0xf4e   :  { %6026 = vtanh.f32 %v8241_v54  ;;  %v6025_v52 = vpop.eup %6024  ;;  %v4287_v34 = vrot.slane %v8241_v54, 7 }
 0xf4f   :  { %6028 = vtanh.f32 %v8243_v43  ;;  %v4288_v25 = vrot.slane %v8243_v43, 7 }
 0xf5b   :  { %v6027_v45 = vpop.eup %6026 }
 0xf5c   :  { %v6029_v10 = vpop.eup %6028  ;;  %v4066_v15 = vmul.f32 %v6027_v45, %v6023_v11 }
 0xf5d   :  { %v4067_v50 = vmul.f32 %v6029_v10, %v6025_v52 }
 0xf5e   :  { %4069 = vst.msk [vmem:[#allocation3] sm:$0x40] %vm4068_vm8, %v4066_v15  ;;  %v4073_v40 = vrot.slane %v4066_v15, 6 }
 0xf5f   :  { %4070 = vst.msk [vmem:[#allocation3 + $0x8] sm:$0x40] %vm4068_vm8, %v4067_v50  ;;  %v4074_v55 = vrot.slane %v4067_v50, 5  ;;  %vm5061_vm8 = vcmask 31744  }
 0xf61   :  { %v4075_v56 = vsel %vm539_vm1, %v4074_v55, %v4073_v40 }
 0xf62   :  { %4142 = vmatmul.mubr.f32.vlgmr.msra.gmra.mxu0 %v4075_v56  ;;  %4213 = vmatmul.mubr.f32.vlgmr.msra.gmra.mxu1 %v4075_v56 }
 0xf63   :  { %5482 = vmatpush3.msra.mxu0 %v8222_v3  ;;  %5487 = vmatpush3.msra.mxu1 %v8228_v41 }
0x1022   :  { %v4143_v57 = vpop.f32.mrf.mxu0  ;;  %v4214_v28 = vpop.f32.mrf.mxu1 }
0x1023   :  { %v4223_v58 = vrot.slane %v4143_v57, 1  ;;  %v4227_v27 = vrot.slane %v4143_v57, 2  ;;  %v4225_v36 = vrot.slane %v4214_v28, 1 }
0x1024   :  { %v4145_v63 = vpop.f32.mrf.mxu0  ;;  %v4216_v3 = vpop.f32.mrf.mxu1 }
0x1025   :  { %v4239_v12 = vadd.f32 %v4223_v58, %v9051_v59  ;;  %v4243_v14 = vadd.f32 %v4227_v27, %v9052_v53  ;;  %v4224_v1 = vrot.slane %v4145_v63, 1  ;;  %v4228_v35 = vrot.slane %v4145_v63, 2 }
0x1026   :  { %v4226_v6 = vrot.slane %v4216_v3, 1  ;;  %v4230_v59 = vrot.slane %v4216_v3, 2  ;;  %v4229_v53 = vrot.slane %v4214_v28, 2  ;;  %v4241_v2 = vadd.f32 %v4225_v36, %v8913_v51 }
0x1027   :  { %v5419_v21 = vmul.f32 -1.442695, %v4239_v12  ;;  %v5420_v61 = vmul.f32 -1.442695, %v4243_v14  ;;  %v4240_v26 = vadd.f32 %v4224_v1, %v7582_v24  ;;  %v4244_v5 = vadd.f32 %v4228_v35, %v9053_v4 }
0x1028   :  { %v4242_v9 = vadd.f32 %v4226_v6, %v7593_v32  ;;  %v4246_v17 = vadd.f32 %v4230_v59, %v8941_v48  ;;  %v4245_v24 = vadd.f32 %v4229_v53, %v9054_v8 }
0x1029   :  { %6030 = vpow2.f32 %v5419_v21  ;;  %v5421_v41 = vmul.f32 -1.442695, %v4240_v26  ;;  %v5422_v0 = vmul.f32 -1.442695, %v4244_v5 }
0x102a   :  { %6032 = vpow2.f32 %v5420_v61  ;;  %v5423_v4 = vmul.f32 -1.442695, %v4242_v9  ;;  %v5424_v13 = vmul.f32 -1.442695, %v4246_v17  ;;  %v4556_v9 = vld [vmem:[%s8380_s4 + $0x10] sm:$0xff]  ;;  %v4555_v17 = vld [vmem:[%s8380_s4 + $0x8] sm:$0xff] }
0x102b   :  { %6034 = vpow2.f32 %v5421_v41 }
0x102c   :  { %6036 = vpow2.f32 %v5422_v0  ;;  %v4557_v0 = vld [vmem:[%s8380_s4 + $0x18] sm:$0xff] }
0x102d   :  { %6038 = vtanh.f32 %v4241_v2  ;;  %5491 = vmatprep.subr.mxu0 %v4557_v0  ;;  %v4561_v2 = vld [vmem:[%s8380_s4 + $0x38] sm:$0xff] }
0x102e   :  { %6040 = vtanh.f32 %v4245_v24  ;;  %5502 = vmatprep.subr.mxu1 %v4561_v2  ;;  %v4554_v24 = vld [vmem:[%s8380_s4] sm:$0xff] }
0x102f   :  { %6042 = vpow2.f32 %v5423_v4  ;;  %v4560_v4 = vld [vmem:[%s8380_s4 + $0x30] sm:$0xff] }
0x1030   :  { %6044 = vpow2.f32 %v5424_v13  ;;  %v4559_v13 = vld [vmem:[%s8380_s4 + $0x28] sm:$0xff] }
0x1036   :  { %v6031_v44 = vpop.eup %6030 }
0x1037   :  { %v6033_v60 = vpop.eup %6032  ;;  %v4253_v16 = vadd.f32 1.0, %v6031_v44  ;;  %v54_v44 = vld [vmem:[%s8377_s1] sm:$0xff] }
0x1038   :  { %v4254_v22 = vadd.f32 1.0, %v6033_v60  ;;  %v6035_v31 = vpop.eup %6034  ;;  %v55_v60 = vld [vmem:[%s8377_s1 + $0x8] sm:$0xff] }
0x1039   :  { %v6037_v62 = vpop.eup %6036  ;;  %6046 = vrcp.f32 %v4253_v16  ;;  %v4265_v32 = vadd.f32 1.0, %v6035_v31 }
0x103a   :  { %6048 = vrcp.f32 %v4254_v22  ;;  %v4266_v48 = vadd.f32 1.0, %v6037_v62  ;;  %v6039_v51 = vpop.eup %6038 }
0x103b   :  { %6050 = vrcp.f32 %v4265_v32  ;;  %v6041_v8 = vpop.eup %6040 }
0x103c   :  { %6052 = vrcp.f32 %v4266_v48  ;;  %v6043_v49 = vpop.eup %6042  ;;  %v5432_v48 = vld [vmem:[%s8380_s4 + $0x40] ss:$0 sm:$0xff] }
0x103d   :  { %v6045_v19 = vpop.eup %6044  ;;  %v4279_v42 = vadd.f32 1.0, %v6043_v49 }
0x103e   :  { %v4280_v29 = vadd.f32 1.0, %v6045_v19 }
0x103f   :  { %6054 = vrcp.f32 %v4279_v42 }
0x1040   :  { %6056 = vrcp.f32 %v4280_v29 }
0x1046   :  { %v6047_v46 = vpop.eup %6046 }
0x1047   :  { %v6049_v20 = vpop.eup %6048  ;;  %v4293_v23 = vmul.f32 %v6047_v46, %v6039_v51  ;;  %v5429_v51 = vld [vmem:[%s8380_s4 + $0x20] ss:$0 sm:$0xff] }
0x1048   :  { %v6051_v7 = vpop.eup %6050  ;;  %v4294_v37 = vmul.f32 %v6049_v20, %v6041_v8 }
0x1049   :  { %v6053_v47 = vpop.eup %6052  ;;  %v4291_v33 = vmul.f32 %v6051_v7, %v4287_v34 }
0x104a   :  { %v4292_v39 = vmul.f32 %v6053_v47, %v4288_v25 }
0x104b   :  { %v4295_v30 = vadd.f32 %v4293_v23, %v4291_v33 }
0x104c   :  { %v4296_v18 = vadd.f32 %v4294_v37, %v4292_v39  ;;  %v6055_v11 = vpop.eup %6054 }
0x104d   :  { %6058 = vtanh.f32 %v4295_v30  ;;  %v6057_v52 = vpop.eup %6056 }
0x104e   :  { %6060 = vtanh.f32 %v4296_v18 }
0x105a   :  { %v6059_v45 = vpop.eup %6058 }
0x105b   :  { %v6061_v54 = vpop.eup %6060  ;;  %v4299_v10 = vmul.f32 %v6059_v45, %v6055_v11 }
0x105c   :  { %v4300_v15 = vmul.f32 %v6061_v54, %v6057_v52 }
0x105d   :  { %4302 = vst.msk [vmem:[#allocation3] sm:$0x80] %vm4301_vm9, %v4299_v10 }
0x105e   :  { %4303 = vst.msk [vmem:[#allocation3 + $0x8] sm:$0x80] %vm4301_vm9, %v4300_v15 }
0x1064   :  { %v4304_v43 = vld [vmem:[#allocation3] sm:$0xff] }
0x1065   :  { %v4307_v50 = vsel %vm4306_vm10, %v4304_v43, -inf  ;;  %v4305_v40 = vld [vmem:[#allocation3 + $0x8] sm:$0xff] }
0x1066   :  { %4308 = vmax.xlane.f32.xlu0 %v4307_v50  ;;  %v4310_v55 = vsel %vm4306_vm10, %v4305_v40, -inf }
0x106a   :  { %4311 = vmax.xlane.f32.xlu0 %v4310_v55 }
0x10ef   :  { %v4309_v56 = vpop.xlane.xlu0 %4308 }
0x10f0   :  { %v4313_v57 = vsub.f32 %v4304_v43, %v4309_v56 }
0x10f2   :  { %v4315_v58 = vmul.f32 1.442695, %v4313_v57 }
0x10f3   :  { %v4312_v27 = vpop.xlane.xlu0 %4311 }
0x10f4   :  { %6062 = vpow2.f32 %v4315_v58  ;;  %v4314_v63 = vsub.f32 %v4305_v40, %v4312_v27 }
0x10f6   :  { %v4317_v12 = vmul.f32 1.442695, %v4314_v63 }
0x10f8   :  { %6064 = vpow2.f32 %v4317_v12 }
0x1101   :  { %v6063_v14 = vpop.eup %6062 }
0x1102   :  { %v4319_v28 = vsel %vm4306_vm10, %v6063_v14, 0.0 }
0x1103   :  { %4320 = vadd.xlane.f32.xlu1 %v4319_v28 }
0x1105   :  { %v6065_v1 = vpop.eup %6064 }
0x1106   :  { %v4322_v35 = vsel %vm4306_vm10, %v6065_v1, 0.0 }
0x1107   :  { %4323 = vadd.xlane.f32.xlu1 %v4322_v35 }
0x118c   :  { %v4321_v21 = vpop.xlane.xlu1 %4320 }
0x118d   :  { %6066 = vrcp.f32 %v4321_v21 }
0x1190   :  { %v4324_v61 = vpop.xlane.xlu1 %4323 }
0x1191   :  { %6068 = vrcp.f32 %v4324_v61 }
0x119a   :  { %v6067_v26 = vpop.eup %6066 }
0x119b   :  { %v4326_v5 = vmul.f32 %v6067_v26, %v6063_v14 }
0x119d   :  { %4329 = vxpose.xlu0.b32.start.end [1/1] (short) (narrow) %v4326_v5, 16 }
0x119e   :  { %v6069_v3 = vpop.eup %6068 }
0x119f   :  { %v4328_v41 = vmul.f32 %v6069_v3, %v6065_v1 }
0x11a1   :  { %4442 = vxpose.xlu1.b32.start.end [1/1] (short) (narrow) %v4328_v41, 16 }
0x1219   :  { %v4345_v6 = vpop.trf.xlu0 }
0x121a   :  { %5483 = vmatprep.mubr.msk.f32.mxu0 %vm4361_vm11, %v4345_v6 }
0x121d   :  { %v4458_v59 = vpop.trf.xlu1  ;;  %v4346_v36 = vpop.trf.xlu0 }
0x121e   :  { %5488 = vmatprep.mubr.msk.f32.mxu1 %vm4361_vm11, %v4458_v59  ;;  %5484 = vmatmul.mubr.msk.f32.vlgmr.msra.gmra.mxu0 %vm4361_vm11, %v4346_v36 }
0x121f   :  { %5492 = vmatpush3.msra.mxu0 %v4557_v0 }
0x1220   :  { %5493 = vmatprep.subr.mxu0 %v4556_v9 }
0x1221   :  { %v4459_v53 = vpop.trf.xlu1  ;;  %5494 = vmatpush3.msra.mxu0 %v4556_v9 }
0x1222   :  { %5489 = vmatmul.mubr.msk.f32.vlgmr.msra.gmra.mxu1 %vm4361_vm11, %v4459_v53  ;;  %5495 = vmatprep.subr.mxu0 %v4555_v17 }
0x1223   :  { %5496 = vmatpush3.msra.mxu0 %v4555_v17  ;;  %5503 = vmatpush3.msra.mxu1 %v4561_v2 }
0x1224   :  { %5497 = vmatprep.subr.mxu0 %v4554_v24  ;;  %5504 = vmatprep.subr.mxu1 %v4560_v4 }
0x1225   :  { %5498 = vmatpush3.msra.mxu0 %v4554_v24  ;;  %5505 = vmatpush3.msra.mxu1 %v4560_v4 }
0x1226   :  { %5516 = vmatprep.subr.mxu0 %v9049_v38  ;;  %5506 = vmatprep.subr.mxu1 %v4559_v13 }
0x1227   :  { %5508 = vmatprep.mubr.msk.f32.mxu1 %vm4680_vm12, %v54_v44  ;;  %5507 = vmatpush3.msra.mxu1 %v4559_v13 }
0x1228   :  { %5509 = vmatmul.mubr.msk.f32.vlgmr.msra.gmra.mxu1 %vm4680_vm12, %v55_v60  ;;  %5511 = vmatprep.subr.mxu1 %v9049_v38 }
0x1229   :  { %5513 = vmatprep.mubr.msk.f32.mxu1 %vm6303_vm13, %v9049_v38 }
0x12de   :  { %v5485_v16 = vpop.f32.mrf.mxu0 }
0x12e0   :  { %v8297_v22 = vpop.f32.mrf.mxu0 }
0x12e1   :  { %5499 = vmatprep.mubr.msk.f32.mxu0 %vm159_vm0, %v8297_v22 }
0x12e2   :  { %v5490_v31 = vpop.f32.mrf.mxu1 }
0x12e4   :  { %v8301_v62 = vpop.f32.mrf.mxu1 }
0x12e5   :  { %5500 = vmatmul.mubr.msk.f32.vlgmr.msra.gmra.mxu0 %vm159_vm0, %v8301_v62 }
0x12e6   :  { %5518 = vmatprep.mubr.msk.f32.mxu0 %vm6303_vm13, %v9049_v38 }
0x12e8   :  { %v5510_v32 = vpop.f32.mrf.mxu1 }
0x12e9   :  { %v8311_v8 = vadd.f32 %v5510_v32, %v5432_v48 }
0x12ea   :  { %v4753_v19 = vpop.f32.mrf.mxu1 }
0x12eb   :  { %v8317_v42 = vadd.f32 %v5432_v48, %v4753_v19  ;;  %v4763_v25 = vmul.f32 %v8311_v8, %v8311_v8 }
0x12ed   :  { %v4767_v33 = vsel %vm159_vm0, %v4763_v25, 0.0  ;;  %v4762_v37 = vmul.f32 %v8317_v42, %v8317_v42  ;;  %v4966_v25 = vld [vmem:[%s8381_s5] sm:$0xff] }
0x12ef   :  { %v4764_v39 = vsel %vm159_vm0, %v4762_v37, 0.0 }
0x13a5   :  { %v5501_v49 = vpop.f32.mrf.mxu0 }
0x13a6   :  { %v8313_v46 = vadd.f32 %v5501_v49, %v5429_v51 }
0x13a7   :  { %v4639_v20 = vpop.f32.mrf.mxu0 }
0x13a8   :  { %v8315_v34 = vadd.f32 %v5429_v51, %v4639_v20  ;;  %v4649_v7 = vmul.f32 %v8313_v46, %v8313_v46 }
0x13aa   :  { %v4653_v29 = vsel %vm159_vm0, %v4649_v7, 0.0  ;;  %v4648_v47 = vmul.f32 %v8315_v34, %v8315_v34 }
0x13ab   :  { %4654 = vadd.xlane.f32.xlu1 %v4653_v29 }
0x13ac   :  { %v4650_v23 = vsel %vm159_vm0, %v4648_v47, 0.0 }
0x13ad   :  { %4651 = vadd.xlane.f32.xlu0 %v4650_v23 }
0x13af   :  { %4768 = vadd.xlane.f32.xlu1 %v4767_v33 }
0x13b1   :  { %4765 = vadd.xlane.f32.xlu0 %v4764_v39 }
0x1434   :  { %v4655_v30 = vpop.xlane.xlu1 %4654 }
0x1435   :  { %6070 = vrsqrt.f32 %v4655_v30  ;;  %vm4665_vm14 = vcmp.eq.f32.partialorder %v4655_v30, inf  ;;  %v4668_v15 = vand.u32 2147483648, %v4655_v30  ;;  %vm4667_vm15 = vcmp.eq.f32.partialorder %v4655_v30, 0.0 }
0x1436   :  { %v4652_v18 = vpop.xlane.xlu0 %4651 }
0x1437   :  { %6072 = vrsqrt.f32 %v4652_v18  ;;  %vm4658_vm1 = vcmp.eq.f32.partialorder %v4652_v18, inf  ;;  %v4661_v56 = vand.u32 2147483648, %v4652_v18  ;;  %vm4660_vm2 = vcmp.eq.f32.partialorder %v4652_v18, 0.0 }
0x1438   :  { %v4769_v11 = vpop.xlane.xlu1 %4768 }
0x1439   :  { %6074 = vrsqrt.f32 %v4769_v11  ;;  %vm4779_vm3 = vcmp.eq.f32.partialorder %v4769_v11, inf  ;;  %vm4781_vm4 = vcmp.eq.f32.partialorder %v4769_v11, 0.0  ;;  %v4782_v14 = vand.u32 2147483648, %v4769_v11 }
0x143a   :  { %v4766_v52 = vpop.xlane.xlu0 %4765 }
0x143b   :  { %6076 = vrsqrt.f32 %v4766_v52  ;;  %vm4772_vm5 = vcmp.eq.f32.partialorder %v4766_v52, inf  ;;  %v4775_v61 = vand.u32 2147483648, %v4766_v52  ;;  %vm4774_vm6 = vcmp.eq.f32.partialorder %v4766_v52, 0.0 }
0x1442   :  { %v6071_v45 = vpop.eup %6070 }
0x1443   :  { %v4664_v54 = vmul.f32 %v6071_v45, %v4655_v30 }
0x1444   :  { %v6073_v10 = vpop.eup %6072 }
0x1445   :  { %v4666_v43 = vsel %vm4665_vm14, %v4655_v30, %v4664_v54  ;;  %v4657_v50 = vmul.f32 %v6073_v10, %v4652_v18  ;;  %v4968_v30 = vld [vmem:[%s8381_s5 + $0x10] sm:$0xf] }
0x1446   :  { %v6075_v40 = vpop.eup %6074  ;;  %v4669_v55 = vsel %vm4667_vm15, %v4668_v15, %v4666_v43  ;;  %v5442_v15 = vld [vmem:[%s8381_s5 + $0x18] ss:$0 sm:$0xff] }
0x1447   :  { %v4671_v57 = vmax.f32 %v4669_v55, 1e-06  ;;  %v4659_v58 = vsel %vm4658_vm1, %v4652_v18, %v4657_v50  ;;  %v4778_v27 = vmul.f32 %v6075_v40, %v4769_v11  ;;  %v5439_v18 = vld [vmem:[%s8381_s5 + $0x8] ss:$0 sm:$0xff]  ;;  %s6304_s5 = smov [#allocation9]  }
0x1448   :  { %v6077_v63 = vpop.eup %6076  ;;  %v4662_v12 = vsel %vm4660_vm2, %v4661_v56, %v4659_v58  ;;  %s5312_s15 = sshll.u32 %s6304_s5, 4  ;;  %s5313_s15 = int_to_ptr.vmem [resolvable:$true] %s5312_s15 }
0x1449   :  { %6078 = vrcp.f32 %v4671_v57  ;;  %v4670_v28 = vmax.f32 %v4662_v12, 1e-06  ;;  %v4780_v1 = vsel %vm4779_vm3, %v4769_v11, %v4778_v27  ;;  %v4771_v35 = vmul.f32 %v6077_v63, %v4766_v52  ;;  %s6272_s16 = scalar_lea.vmem %s5313_s15, 256  ;;  %p6277_p11 = scmp.lt.s32.totalorder %s5313_s15, %s5313_s15 }
0x144a   :  { %v4783_v21 = vsel %vm4781_vm4, %v4782_v14, %v4780_v1  ;;  %p6273_p10 = scmp.ne.s32.totalorder %s5313_s15, %s6272_s16  ;;  %p6278_p12 = scmp.lt.s32.totalorder %s6272_s16, %s6272_s16 }
0x144b   :  { %6080 = vrcp.f32 %v4670_v28  ;;  %v4785_v26 = vmax.f32 %v4783_v21, 1e-06  ;;  %v4773_v5 = vsel %vm4772_vm5, %v4766_v52, %v4771_v35 }
0x144c   :  { %v4776_v3 = vsel %vm4774_vm6, %v4775_v61, %v4773_v5  ;;  %p6279_p13 = por %p6278_p12, %p6277_p11 }
0x144d   :  { %6082 = vrcp.f32 %v4785_v26  ;;  %v4784_v41 = vmax.f32 %v4776_v3, 1e-06 }
0x144e   :  { %p6280_p0 = pnand %p6279_p13, %p6273_p10 }
0x144f   :  { %6084 = vrcp.f32 %v4784_v41 }
0x1456   :  { %v6079_v0 = vpop.eup %6078 }
0x1457   :  { %v4675_v6 = vmul.f32 %v6079_v0, %v8313_v46 }
0x1458   :  { %v6081_v59 = vpop.eup %6080 }
0x1459   :  { %5517 = vmatpush3.xpose.msk.msra.mxu0 %vm159_vm0, %v4675_v6  ;;  %v4673_v36 = vmul.f32 %v6081_v59, %v8315_v34 }
0x145a   :  { %v6083_v53 = vpop.eup %6082  ;;  %5526 = vmatprep.subr.msk.mxu0 %vm5068_vm7, %v4968_v30 }
0x145b   :  { %5512 = vmatpush3.xpose.msk.msra.mxu1 %vm159_vm0, %v4673_v36  ;;  %v4789_v9 = vmul.f32 %v6083_v53, %v8311_v8 }
0x145c   :  { %v6085_v17 = vpop.eup %6084  ;;  %5521 = vmatprep.subr.mxu1 %v4966_v25 }
0x145d   :  { %5519 = vmatmul.mubr.msk.f32.vlgmr.msra.gmra.mxu0 %vm159_vm0, %v4789_v9  ;;  %v4787_v2 = vmul.f32 %v6085_v17, %v8317_v42 }
0x145e   :  { %5527 = vmatpush3.msk.msra.mxu0 %vm5068_vm7, %v4968_v30 }
0x145f   :  { %5514 = vmatmul.mubr.msk.f32.vlgmr.msra.gmra.mxu1 %vm159_vm0, %v4787_v2  ;;  %5536 = vmatprep.subr.mxu0 %v9049_v38 }
0x1460   :  { %5522 = vmatpush3.msra.mxu1 %v4966_v25 }
0x1461   :  { %5531 = vmatprep.subr.mxu1 %v9049_v38 }
0x151d   :  { %v4938_v24 = vpop.f32.mrf.mxu0 }
0x151e   :  { %v4943_v4 = vmul.f32 14.285714, %v4938_v24 }
0x151f   :  { %v4862_v13 = vpop.f32.mrf.mxu1  ;;  %v5520_v44 = vpop.f32.mrf.mxu0 }
0x1520   :  { %v4942_v60 = vmul.f32 14.285714, %v4862_v13  ;;  %v4947_v16 = vsel %vm4361_vm11, %v4943_v4, -inf }
0x1521   :  { %4948 = vmax.xlane.f32.xlu1 %v4947_v16  ;;  %v5515_v31 = vpop.f32.mrf.mxu1 }
0x1522   :  { %v4944_v32 = vsel %vm4361_vm11, %v4942_v60, -inf }
0x1523   :  { %4945 = vmax.xlane.f32.xlu0 %v4944_v32 }
0x15aa   :  { %v4949_v48 = vpop.xlane.xlu1 %4948 }
0x15ab   :  { %v4951_v51 = vsub.f32 %v4943_v4, %v4949_v48 }
0x15ac   :  { %v4946_v8 = vpop.xlane.xlu0 %4945 }
0x15ad   :  { %v4954_v49 = vmul.f32 1.442695, %v4951_v51  ;;  %v4950_v19 = vsub.f32 %v4942_v60, %v4946_v8 }
0x15af   :  { %6086 = vpow2.f32 %v4954_v49  ;;  %v4952_v46 = vmul.f32 1.442695, %v4950_v19 }
0x15b1   :  { %6088 = vpow2.f32 %v4952_v46 }
0x15bc   :  { %v6087_v20 = vpop.eup %6086 }
0x15bd   :  { %v4959_v34 = vsel %vm4361_vm11, %v6087_v20, 0.0 }
0x15be   :  { %v6089_v42 = vpop.eup %6088  ;;  %4960 = vadd.xlane.f32.xlu1 %v4959_v34 }
0x15bf   :  { %v4956_v7 = vsel %vm4361_vm11, %v6089_v42, 0.0 }
0x15c0   :  { %4957 = vadd.xlane.f32.xlu0 %v4956_v7 }
0x1647   :  { %v4961_v29 = vpop.xlane.xlu1 %4960 }
0x1648   :  { %6090 = vrcp.f32 %v4961_v29 }
0x1649   :  { %v4958_v47 = vpop.xlane.xlu0 %4957 }
0x164a   :  { %6092 = vrcp.f32 %v4958_v47 }
0x1655   :  { %v6091_v23 = vpop.eup %6090 }
0x1656   :  { %v4965_v39 = vmul.f32 %v6091_v23, %v6087_v20 }
0x1657   :  { %v6093_v33 = vpop.eup %6092 }
0x1658   :  { %v4963_v37 = vmul.f32 %v6093_v33, %v6089_v42 }
0x165a   :  { %5523 = vmatprep.mubr.msk.f32.mxu1 %vm4361_vm11, %v4963_v37 }
0x165b   :  { %5524 = vmatmul.mubr.msk.f32.vlgmr.msra.gmra.mxu1 %vm4361_vm11, %v4965_v39 }
0x165c   :  { %5532 = vmatpush3.msra.mxu1 %v8297_v22  ;;  %5533 = vmatprep.mubr.msk.f32.mxu1 %vm6303_vm13, %v9049_v38 }
0x171b   :  { %v5525_v11 = vpop.f32.mrf.mxu1 }
0x171c   :  { %v5052_v52 = vadd.f32 %v5525_v11, %v5439_v18 }
0x171d   :  { %v5046_v45 = vpop.f32.mrf.mxu1 }
0x171e   :  { %v5047_v22 = vadd.f32 %v5439_v18, %v5046_v45  ;;  %v5056_v10 = vmax.f32 %v5052_v52, 0.0 }
0x1720   :  { %v5055_v54 = vmax.f32 %v5047_v22, 0.0 }
0x1722   :  { %5528 = vmatprep.mubr.msk.f32.mxu0 %vm5061_vm8, %v5055_v54 }
0x1723   :  { %5529 = vmatmul.mubr.msk.f32.vlgmr.msra.gmra.mxu0 %vm5061_vm8, %v5056_v10 }
0x1724   :  { %5537 = vmatpush3.msra.mxu0 %v8301_v62  ;;  %5538 = vmatprep.mubr.msk.f32.mxu0 %vm6303_vm13, %v9049_v38 }
0x17e3   :  { %v5530_v43 = vpop.f32.mrf.mxu0 }
0x17e4   :  { %v5144_v50 = vadd.f32 %v5530_v43, %v5442_v15 }
0x17e5   :  { %v5138_v40 = vpop.f32.mrf.mxu0 }
0x17e6   :  { %v5447_v55 = vmul.f32 -1.442695, %v5144_v50  ;;  %v5139_v56 = vadd.f32 %v5442_v15, %v5138_v40 }
0x17e8   :  { %6094 = vpow2.f32 %v5447_v55  ;;  %v5446_v57 = vmul.f32 -1.442695, %v5139_v56 }
0x17ea   :  { %6096 = vpow2.f32 %v5446_v57 }
0x17f5   :  { %v6095_v58 = vpop.eup %6094 }
0x17f6   :  { %v5154_v27 = vadd.f32 1.0, %v6095_v58 }
0x17f7   :  { %v6097_v63 = vpop.eup %6096 }
0x17f8   :  { %6098 = vrcp.f32 %v5154_v27  ;;  %v5153_v62 = vadd.f32 1.0, %v6097_v63 }
0x17fa   :  { %6100 = vrcp.f32 %v5153_v62 }
0x1805   :  { %v6099_v12 = vpop.eup %6098 }
0x1806   :  { %5539 = vmatmul.mubr.msk.f32.vlgmr.msra.gmra.mxu0 %vm4361_vm11, %v6099_v12 }
0x1807   :  { %v6101_v38 = vpop.eup %6100 }
0x1808   :  { %5534 = vmatmul.mubr.msk.f32.vlgmr.msra.gmra.mxu1 %vm4361_vm11, %v6101_v38 }
0x18c6   :  { %v5301_v14 = vpop.f32.mrf.mxu0 }
0x18c7   :  { %5306 = vst.msk [vmem:[#allocation9 + $0x8] sm:$0xff] %vm159_vm0, %v5301_v14 }
0x18c8   :  { %v5228_v28 = vpop.f32.mrf.mxu1  ;;  %v5540_v1 = vpop.f32.mrf.mxu0 }
0x18c9   :  { %5305 = vst.msk [vmem:[#allocation9] sm:$0xff] %vm159_vm0, %v5228_v28 }
0x18ca   :  { %v5535_v35 = vpop.f32.mrf.mxu1 }
0x18cb   :  { %6283 = shalt.err (!%p6280_p0)
}
0x18cc   :  { %s6305_s17 = smov 128   ;;  %s6306_s18 = smov 8  }
0x18cd   :  { %5318 = dma.vmem_to_hbm [thread:$0]  %s5313_s15, 256, %s8382_s6, [#allocation6], %s6305_s17, %s6305_s17, %s6306_s18  }
0x18ce   :  { %6296 = dma.done.wait [#allocation6], 256  }
0x18cf   :  { %6297 = vsyncadd [#allocation6], 4294967040 }
0x18d0   :  { %5322 = vsyncpa [#allocation5], 1 }
0x18d1   :  { %5323 = vsyncpa [#allocation8], 1 }
0x18d2   :  { %5324 = vsyncpa [#allocation6], 1 }

</bundles_post_ra>
